<compile_context>
chip_gen: v7x
topology: tpu7x:2x2x1
jax: 0.10.0
libtpu: 0.0.40
codegen_flags: <defaults>
</compile_context>

<pallas_src>
import functools
import math

import jax
import jax.numpy as jnp
from jax import lax
from jax.experimental import pallas as pl
from jax.experimental.pallas import tpu as pltpu


# ----------------------------------------------------------------------------
# Fused gate layout (host-side helper, used only when building parameters)
# ----------------------------------------------------------------------------
# Fused gate-column order over 8H columns (each block H wide):
#     [ i_f | i_b | f_f | f_b | o_f | o_b | g_f | g_b ]
# -> all sigmoid-activated gates (i, f, o; both directions) occupy the first
#    6H contiguous lanes, both tanh-activated g gates the last 2H lanes, and
#    every per-gate slice [dir_f | dir_b] lines up with the fused (B, 2H)
#    state layout [h_f | h_b] / [c_f | c_b].
def _scatter_gates(w4, direction, H):
    """w4: (rows, 4H) with per-direction gate blocks [i, f, g, o].
    Returns (rows, 8H) in the fused interleaved layout, zeros elsewhere."""
    off = 0 if direction == "f" else H
    i = w4[:, 0 * H:1 * H]
    f = w4[:, 1 * H:2 * H]
    g = w4[:, 2 * H:3 * H]
    o = w4[:, 3 * H:4 * H]
    out = jnp.zeros((w4.shape[0], 8 * H), w4.dtype)
    out = out.at[:, 0 * H + off:0 * H + off + H].set(i)
    out = out.at[:, 2 * H + off:2 * H + off + H].set(f)
    out = out.at[:, 4 * H + off:4 * H + off + H].set(o)
    out = out.at[:, 6 * H + off:6 * H + off + H].set(g)
    return out


# ----------------------------------------------------------------------------
# The single fused Pallas kernel (whole forward pass, no grid)
# ----------------------------------------------------------------------------
def _make_encoder_kernel(*, T, B, H, num_layers, n_pairs):
    H2, H4, H6 = 2 * H, 4 * H, 6 * H
    unroll = True if T <= 16 else 4     # gate full unroll on sequence length

    def kernel(*refs):
        # ---- unpack refs: inputs, outputs, scratch (in pallas_call order) ---
        pos = 0
        x2d_ref, mask_ref = refs[0], refs[1]
        pos = 2
        layer_refs = []
        for l in range(num_layers):
            n = 4 if l == 0 else 6
            layer_refs.append(refs[pos:pos + n])
            pos += n
        wfc_ref, bfc_ref = refs[pos], refs[pos + 1]
        pos += 2
        outf_ref, outb_ref, hid_ref, cell_ref = refs[pos:pos + 4]
        pos += 4
        gxF_ref, gxB_ref = refs[pos], refs[pos + 1]
        pos += 2
        pairs = []
        for _ in range(n_pairs):
            pairs.append((refs[pos], refs[pos + 1]))
            pos += 2

        def run_layer(l, src_f, src_b, dst_f, dst_b):
            lr = layer_refs[l]
            # -- hoisted input projection (one big bf16 matmul pair per layer,
            #    off the recurrence critical path); bias folded into the
            #    "same-index" stream gxF.
            if l == 0:
                wF_r, wB_r, whh_r, b_r = lr
                x = x2d_ref[...]                                    # (T*B, E) bf16
                yF = jnp.dot(x, wF_r[...],
                             preferred_element_type=jnp.float32) + b_r[...]
                yB = jnp.dot(x, wB_r[...],
                             preferred_element_type=jnp.float32)
            else:
                wFf_r, wFb_r, wBf_r, wBb_r, whh_r, b_r = lr
                xf = src_f[...].astype(jnp.bfloat16)                # (T*B, H)
                xb = src_b[...].astype(jnp.bfloat16)
                yF = (jnp.dot(xf, wFf_r[...], preferred_element_type=jnp.float32)
                      + jnp.dot(xb, wFb_r[...], preferred_element_type=jnp.float32)
                      + b_r[...])
                yB = (jnp.dot(xf, wBf_r[...], preferred_element_type=jnp.float32)
                      + jnp.dot(xb, wBb_r[...], preferred_element_type=jnp.float32))
            gxF_ref[...] = yF                                       # (T*B, 8H) f32
            gxB_ref[...] = yB

            whh = whh_r[...]                                        # (2H, 8H) bf16
            zero = jnp.zeros((B, H2), jnp.float32)

            # -- fused bidirectional recurrence: loop step s handles forward
            #    time s and backward time T-1-s with a single MXU dot.
            def step(s, carry):
                hc, c = carry                                       # (B, 2H) f32
                row = s * B
                rrow = (T - 1 - s) * B
                gates = (gxF_ref[pl.ds(row, B), :]
                         + gxB_ref[pl.ds(rrow, B), :]
                         + jnp.dot(hc.astype(jnp.bfloat16), whh,
                                   preferred_element_type=jnp.float32))
                sig = jax.nn.sigmoid(gates[:, :H6])     # i,f,o (both dirs), 1 EUP slab
                g = jnp.tanh(gates[:, H6:])             # g (both dirs)
                i_g = sig[:, :H2]
                f_g = sig[:, H2:H4]
                o_g = sig[:, H4:]
                c_new = f_g * c + i_g * g
                h_new = o_g * jnp.tanh(c_new)
                m = mask_ref[pl.ds(row, B), :]          # (B, 2H): [:H]=fwd valid, [H:]=bwd valid
                h_out = h_new * m                       # zero padded output positions
                dst_f[pl.ds(row, B), :] = h_out[:, :H]
                dst_b[pl.ds(rrow, B), :] = h_out[:, H:]
                valid = m > 0.0
                hc_next = jnp.where(valid, h_new, hc)   # freeze state past seq end
                c_next = jnp.where(valid, c_new, c)
                return hc_next, c_next

            return lax.fori_loop(0, T, step, (zero, zero), unroll=unroll)

        # ---- layer stack (inter-layer activations stay in VMEM scratch) -----
        src_f = src_b = None
        hc = c = None
        for l in range(num_layers):
            if l == num_layers - 1:
                dst_f, dst_b = outf_ref, outb_ref
            else:
                dst_f, dst_b = pairs[l % n_pairs]
            hc, c = run_layer(l, src_f, src_b, dst_f, dst_b)
            src_f, src_b = dst_f, dst_b

        # ---- final projections, fused into the same kernel.
        # hc / c are already [fwd | bwd] concatenated (B, 2H); the reference
        # module applies self.fc (NOT self.cell_fc) to both hidden and cell.
        wfc = wfc_ref[...]                                           # (2H, dec) bf16
        bfc = bfc_ref[...]                                           # (1, dec) f32
        hid_ref[...] = jnp.tanh(
            jnp.dot(hc.astype(jnp.bfloat16), wfc,
                    preferred_element_type=jnp.float32) + bfc)
        cell_ref[...] = jnp.tanh(
            jnp.dot(c.astype(jnp.bfloat16), wfc,
                    preferred_element_type=jnp.float32) + bfc)

    return kernel


# ----------------------------------------------------------------------------
# Parameters: generated raw (PyTorch-style uniform init), then pre-permuted /
# pre-split / fused into the kernel's layouts so the forward has zero glue.
# ----------------------------------------------------------------------------
def init_params(key, *, vocab, emb_dim, enc_hid, dec_hid, num_layers):
    H = enc_hid
    params = {}
    key, k_emb = jax.random.split(key)
    params["embedding"] = jax.random.normal(k_emb, (vocab, emb_dim),
                                            jnp.float32) * 0.1

    bound = 1.0 / float(H) ** 0.5
    layers = []
    for layer in range(num_layers):
        d_in = emb_dim if layer == 0 else 2 * H
        key, k1, k2, k3, k4, k5, k6, k7, k8 = jax.random.split(key, 9)
        # Raw per-direction weights, gate order [i, f, g, o] (PyTorch order).
        wih_f = jax.random.uniform(k1, (d_in, 4 * H), jnp.float32, -bound, bound)
        wih_b = jax.random.uniform(k2, (d_in, 4 * H), jnp.float32, -bound, bound)
        whh_f = jax.random.uniform(k3, (H, 4 * H), jnp.float32, -bound, bound)
        whh_b = jax.random.uniform(k4, (H, 4 * H), jnp.float32, -bound, bound)
        b_f = (jax.random.uniform(k5, (4 * H,), jnp.float32, -bound, bound)
               + jax.random.uniform(k6, (4 * H,), jnp.float32, -bound, bound))
        b_b = (jax.random.uniform(k7, (4 * H,), jnp.float32, -bound, bound)
               + jax.random.uniform(k8, (4 * H,), jnp.float32, -bound, bound))

        # Fused block-"diagonal" recurrent weight: rows 0:H = h_f -> fwd gate
        # columns, rows H:2H = h_b -> bwd gate columns.
        whh_fused = jnp.concatenate(
            [_scatter_gates(whh_f, "f", H), _scatter_gates(whh_b, "b", H)],
            axis=0).astype(jnp.bfloat16)                          # (2H, 8H)
        bias = (_scatter_gates(b_f[None, :], "f", H)
                + _scatter_gates(b_b[None, :], "b", H))           # (1, 8H) f32

        entry = {"whh": whh_fused, "bias": bias}
        if layer == 0:
            entry["wF"] = _scatter_gates(wih_f, "f", H).astype(jnp.bfloat16)
            entry["wB"] = _scatter_gates(wih_b, "b", H).astype(jnp.bfloat16)
        else:
            # Input of deeper layers is [h_f | h_b]; pre-split the input weight
            # rows so the kernel never slices refs.
            entry["wF_hf"] = _scatter_gates(wih_f[:H], "f", H).astype(jnp.bfloat16)
            entry["wF_hb"] = _scatter_gates(wih_f[H:], "f", H).astype(jnp.bfloat16)
            entry["wB_hf"] = _scatter_gates(wih_b[:H], "b", H).astype(jnp.bfloat16)
            entry["wB_hb"] = _scatter_gates(wih_b[H:], "b", H).astype(jnp.bfloat16)
        layers.append(entry)
    params["lstm"] = layers

    fc_bound = 1.0 / float(2 * H) ** 0.5
    key, k1, k2, k3, k4 = jax.random.split(key, 5)
    params["fc_w"] = jax.random.uniform(
        k1, (2 * H, dec_hid), jnp.float32, -fc_bound, fc_bound).astype(jnp.bfloat16)
    params["fc_b"] = jax.random.uniform(
        k2, (1, dec_hid), jnp.float32, -fc_bound, fc_bound)
    # cell_fc exists in the module but is NOT used in its forward (self.fc is
    # applied to the cell state too); kept only for parameter fidelity.
    params["cell_fc_w"] = jax.random.uniform(
        k3, (2 * H, dec_hid), jnp.float32, -fc_bound, fc_bound)
    params["cell_fc_b"] = jax.random.uniform(
        k4, (1, dec_hid), jnp.float32, -fc_bound, fc_bound)
    return params


# ----------------------------------------------------------------------------
# Encoder_pack forward (one pallas_call)
# ----------------------------------------------------------------------------
def encoder_pack_forward(params, src, src_len, *, num_layers):
    """
    src:     (T, B) int32 token ids
    src_len: (B,)   int32 valid lengths (max == T, all >= 1, sorted descending)
    returns: outputs (T, B, 2H), hidden (B, dec_hid), cell (B, dec_hid)
    """
    T, B = src.shape
    H = params["lstm"][0]["whh"].shape[0] // 2
    E = params["embedding"].shape[1]
    dec = params["fc_w"].shape[1]

    # Embedding lookup (XLA gather glue feeding the kernel).
    # TODO(synk): nn.Dropout / LSTM inter-layer dropout are identity in eval
    # mode; no stochastic dropout is applied here.
    emb = jnp.take(params["embedding"], src, axis=0)              # (T, B, E)
    x2d = emb.reshape(T * B, E).astype(jnp.bfloat16)

    # Precomputed packed-sequence validity mask (one compare/select per step
    # inside the kernel, no per-step length handling):
    #   rows t*B+b, cols [:H] -> t       < src_len[b]  (fwd dir at time t)
    #   rows t*B+b, cols [H:] -> T-1-t   < src_len[b]  (bwd dir, consumed at loop step t)
    t_ids = jnp.arange(T, dtype=jnp.int32)[:, None]               # (T, 1)
    lens = src_len.astype(jnp.int32)[None, :]                     # (1, B)
    m_f = (t_ids < lens).astype(jnp.float32)                      # (T, B)
    m_b = ((T - 1 - t_ids) < lens).astype(jnp.float32)            # (T, B)
    mask = jnp.concatenate(
        [jnp.broadcast_to(m_f[:, :, None], (T, B, H)),
         jnp.broadcast_to(m_b[:, :, None], (T, B, H))],
        axis=-1).reshape(T * B, 2 * H)

    inputs = [x2d, mask]
    for l in range(num_layers):
        lp = params["lstm"][l]
        if l == 0:
            inputs += [lp["wF"], lp["wB"], lp["whh"], lp["bias"]]
        else:
            inputs += [lp["wF_hf"], lp["wF_hb"], lp["wB_hf"], lp["wB_hb"],
                       lp["whh"], lp["bias"]]
    inputs += [params["fc_w"], params["fc_b"]]

    out_shapes = [
        jax.ShapeDtypeStruct((T * B, H), jnp.float32),   # last-layer fwd outputs
        jax.ShapeDtypeStruct((T * B, H), jnp.float32),   # last-layer bwd outputs
        jax.ShapeDtypeStruct((B, dec), jnp.float32),     # hidden
        jax.ShapeDtypeStruct((B, dec), jnp.float32),     # cell
    ]

    # Scratch: gx streams (reused by every layer) + ping/pong inter-layer outputs.
    n_pairs = 0 if num_layers == 1 else min(2, num_layers - 1)
    scratch = [pltpu.VMEM((T * B, 8 * H), jnp.float32),
               pltpu.VMEM((T * B, 8 * H), jnp.float32)]
    for _ in range(n_pairs):
        scratch += [pltpu.VMEM((T * B, H), jnp.float32),
                    pltpu.VMEM((T * B, H), jnp.float32)]

    def _nbytes(shape, dtype):
        return math.prod(shape) * jnp.dtype(dtype).itemsize

    buf_bytes = (sum(int(a.size) * a.dtype.itemsize for a in inputs)
                 + sum(_nbytes(s.shape, s.dtype) for s in out_shapes)
                 + 2 * _nbytes((T * B, 8 * H), jnp.float32)
                 + 2 * n_pairs * _nbytes((T * B, H), jnp.float32))
    # VMEM limit derived from the actual footprint (generous headroom).
    vmem_limit = int(max(8 * 1024 * 1024, 4 * buf_bytes))

    kernel = _make_encoder_kernel(T=T, B=B, H=H,
                                  num_layers=num_layers, n_pairs=n_pairs)
    out_f2d, out_b2d, hidden, cell = pl.pallas_call(
        kernel,
        out_shape=out_shapes,
        scratch_shapes=scratch,
        compiler_params=pltpu.CompilerParams(vmem_limit_bytes=vmem_limit),
    )(*inputs)

    # Single concat for the returned padded outputs (T, B, 2H).
    outputs = jnp.concatenate(
        [out_f2d.reshape(T, B, H), out_b2d.reshape(T, B, H)], axis=-1)
    return outputs, hidden, cell


# ----------------------------------------------------------------------------
# Demo
# ----------------------------------------------------------------------------
if __name__ == "__main__":
    VOCAB = 30
    EMB_DIM = 16
    ENC_HID = 32        # H=32 -> fused gate width 8H = 256 lanes
    DEC_HID = 32
    NUM_LAYERS = 2
    T, B = 8, 8         # B = 8 -> sublane-aligned per-timestep row blocks

    key = jax.random.PRNGKey(0)
    key, k_src = jax.random.split(key)
    params = init_params(key, vocab=VOCAB, emb_dim=EMB_DIM, enc_hid=ENC_HID,
                         dec_hid=DEC_HID, num_layers=NUM_LAYERS)

    src = jax.random.randint(k_src, (T, B), 0, VOCAB, dtype=jnp.int32)
    # pack_padded_sequence default expects lengths sorted descending, all >= 1.
    src_len = jnp.array([8, 8, 7, 6, 5, 4, 3, 2], dtype=jnp.int32)

    fwd = jax.jit(functools.partial(encoder_pack_forward, num_layers=NUM_LAYERS))
    outputs, hidden, cell = fwd(params, src, src_len)

    jax.block_until_ready((outputs, hidden, cell))
    assert outputs.shape == (T, B, 2 * ENC_HID)
    assert hidden.shape == (B, DEC_HID)
    assert cell.shape == (B, DEC_HID)
    print("KERNEL_OK")
</pallas_src>

<mosaic_0001>
module attributes {stable_mosaic.version = 11 : i64} {
  func.func @kernel(%arg0: memref<64x16xbf16, #tpu.memory_space<vmem>>, %arg1: memref<64x64xf32, #tpu.memory_space<vmem>>, %arg2: memref<16x256xbf16, #tpu.memory_space<vmem>>, %arg3: memref<16x256xbf16, #tpu.memory_space<vmem>>, %arg4: memref<64x256xbf16, #tpu.memory_space<vmem>>, %arg5: memref<1x256xf32, #tpu.memory_space<vmem>>, %arg6: memref<32x256xbf16, #tpu.memory_space<vmem>>, %arg7: memref<32x256xbf16, #tpu.memory_space<vmem>>, %arg8: memref<32x256xbf16, #tpu.memory_space<vmem>>, %arg9: memref<32x256xbf16, #tpu.memory_space<vmem>>, %arg10: memref<64x256xbf16, #tpu.memory_space<vmem>>, %arg11: memref<1x256xf32, #tpu.memory_space<vmem>>, %arg12: memref<64x32xbf16, #tpu.memory_space<vmem>>, %arg13: memref<1x32xf32, #tpu.memory_space<vmem>>, %arg14: memref<64x32xf32, #tpu.memory_space<vmem>>, %arg15: memref<64x32xf32, #tpu.memory_space<vmem>>, %arg16: memref<8x32xf32, #tpu.memory_space<vmem>>, %arg17: memref<8x32xf32, #tpu.memory_space<vmem>>, %arg18: memref<64x256xf32, #tpu.memory_space<vmem>>, %arg19: memref<64x256xf32, #tpu.memory_space<vmem>>, %arg20: memref<64x32xf32, #tpu.memory_space<vmem>>, %arg21: memref<64x32xf32, #tpu.memory_space<vmem>>) attributes {dimension_semantics = [], scalar_prefetch = 0 : i64, scratch_operands = 4 : i64, tpu.core_type = #tpu.core_type<tc>} {
    %c0 = arith.constant 0 : index
    %c0_0 = arith.constant 0 : index
    %0 = vector.load %arg0[%c0, %c0_0] : memref<64x16xbf16, #tpu.memory_space<vmem>>, vector<64x16xbf16>
    %c0_1 = arith.constant 0 : index
    %c0_2 = arith.constant 0 : index
    %1 = vector.load %arg2[%c0_1, %c0_2] : memref<16x256xbf16, #tpu.memory_space<vmem>>, vector<16x256xbf16>
    %cst = arith.constant dense<0.000000e+00> : vector<64x256xf32>
    %2 = tpu.matmul %0, %1, %cst {dimension_numbers = #tpu.dot_dimension_numbers<[1], [0], [0], [1], [0, 0, 1, 1], [], []>} : vector<64x16xbf16>, vector<16x256xbf16>, vector<64x256xf32> -> vector<64x256xf32>
    %c0_3 = arith.constant 0 : index
    %c0_4 = arith.constant 0 : index
    %3 = vector.load %arg5[%c0_3, %c0_4] : memref<1x256xf32, #tpu.memory_space<vmem>>, vector<1x256xf32>
    %4 = vector.broadcast %3 : vector<1x256xf32> to vector<64x256xf32>
    %5 = arith.addf %2, %4 : vector<64x256xf32>
    %c0_5 = arith.constant 0 : index
    %c0_6 = arith.constant 0 : index
    %6 = vector.load %arg3[%c0_5, %c0_6] : memref<16x256xbf16, #tpu.memory_space<vmem>>, vector<16x256xbf16>
    %cst_7 = arith.constant dense<0.000000e+00> : vector<64x256xf32>
    %7 = tpu.matmul %0, %6, %cst_7 {dimension_numbers = #tpu.dot_dimension_numbers<[1], [0], [0], [1], [0, 0, 1, 1], [], []>} : vector<64x16xbf16>, vector<16x256xbf16>, vector<64x256xf32> -> vector<64x256xf32>
    %c0_8 = arith.constant 0 : index
    %c0_9 = arith.constant 0 : index
    %8 = vector.load %arg18[%c0_8, %c0_9] : memref<64x256xf32, #tpu.memory_space<vmem>>, vector<64x256xf32>
    tpu.vector_store %arg18[%c0_8, %c0_9], %5 {strides = array<i32>} : memref<64x256xf32, #tpu.memory_space<vmem>>, vector<64x256xf32>,
    %c0_10 = arith.constant 0 : index
    %c0_11 = arith.constant 0 : index
    %9 = vector.load %arg19[%c0_10, %c0_11] : memref<64x256xf32, #tpu.memory_space<vmem>>, vector<64x256xf32>
    tpu.vector_store %arg19[%c0_10, %c0_11], %7 {strides = array<i32>} : memref<64x256xf32, #tpu.memory_space<vmem>>, vector<64x256xf32>,
    %c0_12 = arith.constant 0 : index
    %c0_13 = arith.constant 0 : index
    %10 = vector.load %arg4[%c0_12, %c0_13] : memref<64x256xbf16, #tpu.memory_space<vmem>>, vector<64x256xbf16>
    %cst_14 = arith.constant 0.000000e+00 : f32
    %11 = vector.broadcast %cst_14 : f32 to vector<8x64xf32>
    %c0_i32 = arith.constant 0 : i32
    %c8_i32 = arith.constant 8 : i32
    %12 = arith.muli %c0_i32, %c8_i32 : i32
    %c7_i32 = arith.constant 7 : i32
    %13 = arith.subi %c7_i32, %c0_i32 : i32
    %c8_i32_15 = arith.constant 8 : i32
    %14 = arith.muli %13, %c8_i32_15 : i32
    %15 = arith.index_cast %12 : i32 to index
    %c0_16 = arith.constant 0 : index
    %16 = vector.load %arg18[%15, %c0_16] : memref<64x256xf32, #tpu.memory_space<vmem>>, vector<8x256xf32>
    %17 = arith.index_cast %14 : i32 to index
    %c0_17 = arith.constant 0 : index
    %18 = vector.load %arg19[%17, %c0_17] : memref<64x256xf32, #tpu.memory_space<vmem>>, vector<8x256xf32>
    %19 = arith.addf %16, %18 : vector<8x256xf32>
    %20 = arith.truncf %11 : vector<8x64xf32> to vector<8x64xbf16>
    %cst_18 = arith.constant dense<0.000000e+00> : vector<8x256xf32>
    %21 = tpu.matmul %20, %10, %cst_18 {dimension_numbers = #tpu.dot_dimension_numbers<[1], [0], [0], [1], [0, 0, 1, 1], [], []>} : vector<8x64xbf16>, vector<64x256xbf16>, vector<8x256xf32> -> vector<8x256xf32>
    %22 = arith.addf %19, %21 : vector<8x256xf32>
    %23 = vector.extract_strided_slice %22 {offsets = [0, 0], sizes = [8, 192], strides = [1, 1]} : vector<8x256xf32> to vector<8x192xf32>
    %24 = arith.negf %23 : vector<8x192xf32>
    %25 = math.exp %24 : vector<8x192xf32>
    %cst_19 = arith.constant 1.000000e+00 : f32
    %26 = vector.broadcast %cst_19 : f32 to vector<8x192xf32>
    %27 = arith.addf %26, %25 : vector<8x192xf32>
    %28 = arith.divf %26, %27 : vector<8x192xf32>
    %29 = vector.extract_strided_slice %22 {offsets = [0, 192], sizes = [8, 64], strides = [1, 1]} : vector<8x256xf32> to vector<8x64xf32>
    %30 = math.tanh %29 : vector<8x64xf32>
    %31 = vector.extract_strided_slice %28 {offsets = [0, 0], sizes = [8, 64], strides = [1, 1]} : vector<8x192xf32> to vector<8x64xf32>
    %32 = vector.extract_strided_slice %28 {offsets = [0, 64], sizes = [8, 64], strides = [1, 1]} : vector<8x192xf32> to vector<8x64xf32>
    %33 = vector.extract_strided_slice %28 {offsets = [0, 128], sizes = [8, 64], strides = [1, 1]} : vector<8x192xf32> to vector<8x64xf32>
    %34 = arith.mulf %32, %11 : vector<8x64xf32>
    %35 = arith.mulf %31, %30 : vector<8x64xf32>
    %36 = arith.addf %34, %35 : vector<8x64xf32>
    %37 = math.tanh %36 : vector<8x64xf32>
    %38 = arith.mulf %33, %37 : vector<8x64xf32>
    %39 = arith.index_cast %12 : i32 to index
    %c0_20 = arith.constant 0 : index
    %40 = vector.load %arg1[%39, %c0_20] : memref<64x64xf32, #tpu.memory_space<vmem>>, vector<8x64xf32>
    %41 = arith.mulf %38, %40 : vector<8x64xf32>
    %42 = vector.extract_strided_slice %41 {offsets = [0, 0], sizes = [8, 32], strides = [1, 1]} : vector<8x64xf32> to vector<8x32xf32>
    %43 = arith.index_cast %12 : i32 to index
    %c0_21 = arith.constant 0 : index
    %44 = vector.load %arg20[%43, %c0_21] : memref<64x32xf32, #tpu.memory_space<vmem>>, vector<8x32xf32>
    tpu.vector_store %arg20[%43, %c0_21], %42 {strides = array<i32>} : memref<64x32xf32, #tpu.memory_space<vmem>>, vector<8x32xf32>,
    %45 = vector.extract_strided_slice %41 {offsets = [0, 32], sizes = [8, 32], strides = [1, 1]} : vector<8x64xf32> to vector<8x32xf32>
    %46 = arith.index_cast %14 : i32 to index
    %c0_22 = arith.constant 0 : index
    %47 = vector.load %arg21[%46, %c0_22] : memref<64x32xf32, #tpu.memory_space<vmem>>, vector<8x32xf32>
    tpu.vector_store %arg21[%46, %c0_22], %45 {strides = array<i32>} : memref<64x32xf32, #tpu.memory_space<vmem>>, vector<8x32xf32>,
    %cst_23 = arith.constant 0.000000e+00 : f32
    %48 = vector.broadcast %cst_23 : f32 to vector<8x64xf32>
    %49 = arith.cmpf ogt, %40, %48 : vector<8x64xf32>
    %50 = arith.select %49, %38, %11 : vector<8x64xi1>, vector<8x64xf32>
    %51 = arith.select %49, %36, %11 : vector<8x64xi1>, vector<8x64xf32>
    %c1_i32 = arith.constant 1 : i32
    %c8_i32_24 = arith.constant 8 : i32
    %52 = arith.muli %c1_i32, %c8_i32_24 : i32
    %c7_i32_25 = arith.constant 7 : i32
    %53 = arith.subi %c7_i32_25, %c1_i32 : i32
    %c8_i32_26 = arith.constant 8 : i32
    %54 = arith.muli %53, %c8_i32_26 : i32
    %55 = arith.index_cast %52 : i32 to index
    %c0_27 = arith.constant 0 : index
    %56 = vector.load %arg18[%55, %c0_27] : memref<64x256xf32, #tpu.memory_space<vmem>>, vector<8x256xf32>
    %57 = arith.index_cast %54 : i32 to index
    %c0_28 = arith.constant 0 : index
    %58 = vector.load %arg19[%57, %c0_28] : memref<64x256xf32, #tpu.memory_space<vmem>>, vector<8x256xf32>
    %59 = arith.addf %56, %58 : vector<8x256xf32>
    %60 = arith.truncf %50 : vector<8x64xf32> to vector<8x64xbf16>
    %cst_29 = arith.constant dense<0.000000e+00> : vector<8x256xf32>
    %61 = tpu.matmul %60, %10, %cst_29 {dimension_numbers = #tpu.dot_dimension_numbers<[1], [0], [0], [1], [0, 0, 1, 1], [], []>} : vector<8x64xbf16>, vector<64x256xbf16>, vector<8x256xf32> -> vector<8x256xf32>
    %62 = arith.addf %59, %61 : vector<8x256xf32>
    %63 = vector.extract_strided_slice %62 {offsets = [0, 0], sizes = [8, 192], strides = [1, 1]} : vector<8x256xf32> to vector<8x192xf32>
    %64 = arith.negf %63 : vector<8x192xf32>
    %65 = math.exp %64 : vector<8x192xf32>
    %cst_30 = arith.constant 1.000000e+00 : f32
    %66 = vector.broadcast %cst_30 : f32 to vector<8x192xf32>
    %67 = arith.addf %66, %65 : vector<8x192xf32>
    %68 = arith.divf %66, %67 : vector<8x192xf32>
    %69 = vector.extract_strided_slice %62 {offsets = [0, 192], sizes = [8, 64], strides = [1, 1]} : vector<8x256xf32> to vector<8x64xf32>
    %70 = math.tanh %69 : vector<8x64xf32>
    %71 = vector.extract_strided_slice %68 {offsets = [0, 0], sizes = [8, 64], strides = [1, 1]} : vector<8x192xf32> to vector<8x64xf32>
    %72 = vector.extract_strided_slice %68 {offsets = [0, 64], sizes = [8, 64], strides = [1, 1]} : vector<8x192xf32> to vector<8x64xf32>
    %73 = vector.extract_strided_slice %68 {offsets = [0, 128], sizes = [8, 64], strides = [1, 1]} : vector<8x192xf32> to vector<8x64xf32>
    %74 = arith.mulf %72, %51 : vector<8x64xf32>
    %75 = arith.mulf %71, %70 : vector<8x64xf32>
    %76 = arith.addf %74, %75 : vector<8x64xf32>
    %77 = math.tanh %76 : vector<8x64xf32>
    %78 = arith.mulf %73, %77 : vector<8x64xf32>
    %79 = arith.index_cast %52 : i32 to index
    %c0_31 = arith.constant 0 : index
    %80 = vector.load %arg1[%79, %c0_31] : memref<64x64xf32, #tpu.memory_space<vmem>>, vector<8x64xf32>
    %81 = arith.mulf %78, %80 : vector<8x64xf32>
    %82 = vector.extract_strided_slice %81 {offsets = [0, 0], sizes = [8, 32], strides = [1, 1]} : vector<8x64xf32> to vector<8x32xf32>
    %83 = arith.index_cast %52 : i32 to index
    %c0_32 = arith.constant 0 : index
    %84 = vector.load %arg20[%83, %c0_32] : memref<64x32xf32, #tpu.memory_space<vmem>>, vector<8x32xf32>
    tpu.vector_store %arg20[%83, %c0_32], %82 {strides = array<i32>} : memref<64x32xf32, #tpu.memory_space<vmem>>, vector<8x32xf32>,
    %85 = vector.extract_strided_slice %81 {offsets = [0, 32], sizes = [8, 32], strides = [1, 1]} : vector<8x64xf32> to vector<8x32xf32>
    %86 = arith.index_cast %54 : i32 to index
    %c0_33 = arith.constant 0 : index
    %87 = vector.load %arg21[%86, %c0_33] : memref<64x32xf32, #tpu.memory_space<vmem>>, vector<8x32xf32>
    tpu.vector_store %arg21[%86, %c0_33], %85 {strides = array<i32>} : memref<64x32xf32, #tpu.memory_space<vmem>>, vector<8x32xf32>,
    %cst_34 = arith.constant 0.000000e+00 : f32
    %88 = vector.broadcast %cst_34 : f32 to vector<8x64xf32>
    %89 = arith.cmpf ogt, %80, %88 : vector<8x64xf32>
    %90 = arith.select %89, %78, %50 : vector<8x64xi1>, vector<8x64xf32>
    %91 = arith.select %89, %76, %51 : vector<8x64xi1>, vector<8x64xf32>
    %c2_i32 = arith.constant 2 : i32
    %c8_i32_35 = arith.constant 8 : i32
    %92 = arith.muli %c2_i32, %c8_i32_35 : i32
    %c7_i32_36 = arith.constant 7 : i32
    %93 = arith.subi %c7_i32_36, %c2_i32 : i32
    %c8_i32_37 = arith.constant 8 : i32
    %94 = arith.muli %93, %c8_i32_37 : i32
    %95 = arith.index_cast %92 : i32 to index
    %c0_38 = arith.constant 0 : index
    %96 = vector.load %arg18[%95, %c0_38] : memref<64x256xf32, #tpu.memory_space<vmem>>, vector<8x256xf32>
    %97 = arith.index_cast %94 : i32 to index
    %c0_39 = arith.constant 0 : index
    %98 = vector.load %arg19[%97, %c0_39] : memref<64x256xf32, #tpu.memory_space<vmem>>, vector<8x256xf32>
    %99 = arith.addf %96, %98 : vector<8x256xf32>
    %100 = arith.truncf %90 : vector<8x64xf32> to vector<8x64xbf16>
    %cst_40 = arith.constant dense<0.000000e+00> : vector<8x256xf32>
    %101 = tpu.matmul %100, %10, %cst_40 {dimension_numbers = #tpu.dot_dimension_numbers<[1], [0], [0], [1], [0, 0, 1, 1], [], []>} : vector<8x64xbf16>, vector<64x256xbf16>, vector<8x256xf32> -> vector<8x256xf32>
    %102 = arith.addf %99, %101 : vector<8x256xf32>
    %103 = vector.extract_strided_slice %102 {offsets = [0, 0], sizes = [8, 192], strides = [1, 1]} : vector<8x256xf32> to vector<8x192xf32>
    %104 = arith.negf %103 : vector<8x192xf32>
    %105 = math.exp %104 : vector<8x192xf32>
    %cst_41 = arith.constant 1.000000e+00 : f32
    %106 = vector.broadcast %cst_41 : f32 to vector<8x192xf32>
    %107 = arith.addf %106, %105 : vector<8x192xf32>
    %108 = arith.divf %106, %107 : vector<8x192xf32>
    %109 = vector.extract_strided_slice %102 {offsets = [0, 192], sizes = [8, 64], strides = [1, 1]} : vector<8x256xf32> to vector<8x64xf32>
    %110 = math.tanh %109 : vector<8x64xf32>
    %111 = vector.extract_strided_slice %108 {offsets = [0, 0], sizes = [8, 64], strides = [1, 1]} : vector<8x192xf32> to vector<8x64xf32>
    %112 = vector.extract_strided_slice %108 {offsets = [0, 64], sizes = [8, 64], strides = [1, 1]} : vector<8x192xf32> to vector<8x64xf32>
    %113 = vector.extract_strided_slice %108 {offsets = [0, 128], sizes = [8, 64], strides = [1, 1]} : vector<8x192xf32> to vector<8x64xf32>
    %114 = arith.mulf %112, %91 : vector<8x64xf32>
    %115 = arith.mulf %111, %110 : vector<8x64xf32>
    %116 = arith.addf %114, %115 : vector<8x64xf32>
    %117 = math.tanh %116 : vector<8x64xf32>
    %118 = arith.mulf %113, %117 : vector<8x64xf32>
    %119 = arith.index_cast %92 : i32 to index
    %c0_42 = arith.constant 0 : index
    %120 = vector.load %arg1[%119, %c0_42] : memref<64x64xf32, #tpu.memory_space<vmem>>, vector<8x64xf32>
    %121 = arith.mulf %118, %120 : vector<8x64xf32>
    %122 = vector.extract_strided_slice %121 {offsets = [0, 0], sizes = [8, 32], strides = [1, 1]} : vector<8x64xf32> to vector<8x32xf32>
    %123 = arith.index_cast %92 : i32 to index
    %c0_43 = arith.constant 0 : index
    %124 = vector.load %arg20[%123, %c0_43] : memref<64x32xf32, #tpu.memory_space<vmem>>, vector<8x32xf32>
    tpu.vector_store %arg20[%123, %c0_43], %122 {strides = array<i32>} : memref<64x32xf32, #tpu.memory_space<vmem>>, vector<8x32xf32>,
    %125 = vector.extract_strided_slice %121 {offsets = [0, 32], sizes = [8, 32], strides = [1, 1]} : vector<8x64xf32> to vector<8x32xf32>
    %126 = arith.index_cast %94 : i32 to index
    %c0_44 = arith.constant 0 : index
    %127 = vector.load %arg21[%126, %c0_44] : memref<64x32xf32, #tpu.memory_space<vmem>>, vector<8x32xf32>
    tpu.vector_store %arg21[%126, %c0_44], %125 {strides = array<i32>} : memref<64x32xf32, #tpu.memory_space<vmem>>, vector<8x32xf32>,
    %cst_45 = arith.constant 0.000000e+00 : f32
    %128 = vector.broadcast %cst_45 : f32 to vector<8x64xf32>
    %129 = arith.cmpf ogt, %120, %128 : vector<8x64xf32>
    %130 = arith.select %129, %118, %90 : vector<8x64xi1>, vector<8x64xf32>
    %131 = arith.select %129, %116, %91 : vector<8x64xi1>, vector<8x64xf32>
    %c3_i32 = arith.constant 3 : i32
    %c8_i32_46 = arith.constant 8 : i32
    %132 = arith.muli %c3_i32, %c8_i32_46 : i32
    %c7_i32_47 = arith.constant 7 : i32
    %133 = arith.subi %c7_i32_47, %c3_i32 : i32
    %c8_i32_48 = arith.constant 8 : i32
    %134 = arith.muli %133, %c8_i32_48 : i32
    %135 = arith.index_cast %132 : i32 to index
    %c0_49 = arith.constant 0 : index
    %136 = vector.load %arg18[%135, %c0_49] : memref<64x256xf32, #tpu.memory_space<vmem>>, vector<8x256xf32>
    %137 = arith.index_cast %134 : i32 to index
    %c0_50 = arith.constant 0 : index
    %138 = vector.load %arg19[%137, %c0_50] : memref<64x256xf32, #tpu.memory_space<vmem>>, vector<8x256xf32>
    %139 = arith.addf %136, %138 : vector<8x256xf32>
    %140 = arith.truncf %130 : vector<8x64xf32> to vector<8x64xbf16>
    %cst_51 = arith.constant dense<0.000000e+00> : vector<8x256xf32>
    %141 = tpu.matmul %140, %10, %cst_51 {dimension_numbers = #tpu.dot_dimension_numbers<[1], [0], [0], [1], [0, 0, 1, 1], [], []>} : vector<8x64xbf16>, vector<64x256xbf16>, vector<8x256xf32> -> vector<8x256xf32>
    %142 = arith.addf %139, %141 : vector<8x256xf32>
    %143 = vector.extract_strided_slice %142 {offsets = [0, 0], sizes = [8, 192], strides = [1, 1]} : vector<8x256xf32> to vector<8x192xf32>
    %144 = arith.negf %143 : vector<8x192xf32>
    %145 = math.exp %144 : vector<8x192xf32>
    %cst_52 = arith.constant 1.000000e+00 : f32
    %146 = vector.broadcast %cst_52 : f32 to vector<8x192xf32>
    %147 = arith.addf %146, %145 : vector<8x192xf32>
    %148 = arith.divf %146, %147 : vector<8x192xf32>
    %149 = vector.extract_strided_slice %142 {offsets = [0, 192], sizes = [8, 64], strides = [1, 1]} : vector<8x256xf32> to vector<8x64xf32>
    %150 = math.tanh %149 : vector<8x64xf32>
    %151 = vector.extract_strided_slice %148 {offsets = [0, 0], sizes = [8, 64], strides = [1, 1]} : vector<8x192xf32> to vector<8x64xf32>
    %152 = vector.extract_strided_slice %148 {offsets = [0, 64], sizes = [8, 64], strides = [1, 1]} : vector<8x192xf32> to vector<8x64xf32>
    %153 = vector.extract_strided_slice %148 {offsets = [0, 128], sizes = [8, 64], strides = [1, 1]} : vector<8x192xf32> to vector<8x64xf32>
    %154 = arith.mulf %152, %131 : vector<8x64xf32>
    %155 = arith.mulf %151, %150 : vector<8x64xf32>
    %156 = arith.addf %154, %155 : vector<8x64xf32>
    %157 = math.tanh %156 : vector<8x64xf32>
    %158 = arith.mulf %153, %157 : vector<8x64xf32>
    %159 = arith.index_cast %132 : i32 to index
    %c0_53 = arith.constant 0 : index
    %160 = vector.load %arg1[%159, %c0_53] : memref<64x64xf32, #tpu.memory_space<vmem>>, vector<8x64xf32>
    %161 = arith.mulf %158, %160 : vector<8x64xf32>
    %162 = vector.extract_strided_slice %161 {offsets = [0, 0], sizes = [8, 32], strides = [1, 1]} : vector<8x64xf32> to vector<8x32xf32>
    %163 = arith.index_cast %132 : i32 to index
    %c0_54 = arith.constant 0 : index
    %164 = vector.load %arg20[%163, %c0_54] : memref<64x32xf32, #tpu.memory_space<vmem>>, vector<8x32xf32>
    tpu.vector_store %arg20[%163, %c0_54], %162 {strides = array<i32>} : memref<64x32xf32, #tpu.memory_space<vmem>>, vector<8x32xf32>,
    %165 = vector.extract_strided_slice %161 {offsets = [0, 32], sizes = [8, 32], strides = [1, 1]} : vector<8x64xf32> to vector<8x32xf32>
    %166 = arith.index_cast %134 : i32 to index
    %c0_55 = arith.constant 0 : index
    %167 = vector.load %arg21[%166, %c0_55] : memref<64x32xf32, #tpu.memory_space<vmem>>, vector<8x32xf32>
    tpu.vector_store %arg21[%166, %c0_55], %165 {strides = array<i32>} : memref<64x32xf32, #tpu.memory_space<vmem>>, vector<8x32xf32>,
    %cst_56 = arith.constant 0.000000e+00 : f32
    %168 = vector.broadcast %cst_56 : f32 to vector<8x64xf32>
    %169 = arith.cmpf ogt, %160, %168 : vector<8x64xf32>
    %170 = arith.select %169, %158, %130 : vector<8x64xi1>, vector<8x64xf32>
    %171 = arith.select %169, %156, %131 : vector<8x64xi1>, vector<8x64xf32>
    %c4_i32 = arith.constant 4 : i32
    %c8_i32_57 = arith.constant 8 : i32
    %172 = arith.muli %c4_i32, %c8_i32_57 : i32
    %c7_i32_58 = arith.constant 7 : i32
    %173 = arith.subi %c7_i32_58, %c4_i32 : i32
    %c8_i32_59 = arith.constant 8 : i32
    %174 = arith.muli %173, %c8_i32_59 : i32
    %175 = arith.index_cast %172 : i32 to index
    %c0_60 = arith.constant 0 : index
    %176 = vector.load %arg18[%175, %c0_60] : memref<64x256xf32, #tpu.memory_space<vmem>>, vector<8x256xf32>
    %177 = arith.index_cast %174 : i32 to index
    %c0_61 = arith.constant 0 : index
    %178 = vector.load %arg19[%177, %c0_61] : memref<64x256xf32, #tpu.memory_space<vmem>>, vector<8x256xf32>
    %179 = arith.addf %176, %178 : vector<8x256xf32>
    %180 = arith.truncf %170 : vector<8x64xf32> to vector<8x64xbf16>
    %cst_62 = arith.constant dense<0.000000e+00> : vector<8x256xf32>
    %181 = tpu.matmul %180, %10, %cst_62 {dimension_numbers = #tpu.dot_dimension_numbers<[1], [0], [0], [1], [0, 0, 1, 1], [], []>} : vector<8x64xbf16>, vector<64x256xbf16>, vector<8x256xf32> -> vector<8x256xf32>
    %182 = arith.addf %179, %181 : vector<8x256xf32>
    %183 = vector.extract_strided_slice %182 {offsets = [0, 0], sizes = [8, 192], strides = [1, 1]} : vector<8x256xf32> to vector<8x192xf32>
    %184 = arith.negf %183 : vector<8x192xf32>
    %185 = math.exp %184 : vector<8x192xf32>
    %cst_63 = arith.constant 1.000000e+00 : f32
    %186 = vector.broadcast %cst_63 : f32 to vector<8x192xf32>
    %187 = arith.addf %186, %185 : vector<8x192xf32>
    %188 = arith.divf %186, %187 : vector<8x192xf32>
    %189 = vector.extract_strided_slice %182 {offsets = [0, 192], sizes = [8, 64], strides = [1, 1]} : vector<8x256xf32> to vector<8x64xf32>
    %190 = math.tanh %189 : vector<8x64xf32>
    %191 = vector.extract_strided_slice %188 {offsets = [0, 0], sizes = [8, 64], strides = [1, 1]} : vector<8x192xf32> to vector<8x64xf32>
    %192 = vector.extract_strided_slice %188 {offsets = [0, 64], sizes = [8, 64], strides = [1, 1]} : vector<8x192xf32> to vector<8x64xf32>
    %193 = vector.extract_strided_slice %188 {offsets = [0, 128], sizes = [8, 64], strides = [1, 1]} : vector<8x192xf32> to vector<8x64xf32>
    %194 = arith.mulf %192, %171 : vector<8x64xf32>
    %195 = arith.mulf %191, %190 : vector<8x64xf32>
    %196 = arith.addf %194, %195 : vector<8x64xf32>
    %197 = math.tanh %196 : vector<8x64xf32>
    %198 = arith.mulf %193, %197 : vector<8x64xf32>
    %199 = arith.index_cast %172 : i32 to index
    %c0_64 = arith.constant 0 : index
    %200 = vector.load %arg1[%199, %c0_64] : memref<64x64xf32, #tpu.memory_space<vmem>>, vector<8x64xf32>
    %201 = arith.mulf %198, %200 : vector<8x64xf32>
    %202 = vector.extract_strided_slice %201 {offsets = [0, 0], sizes = [8, 32], strides = [1, 1]} : vector<8x64xf32> to vector<8x32xf32>
    %203 = arith.index_cast %172 : i32 to index
    %c0_65 = arith.constant 0 : index
    %204 = vector.load %arg20[%203, %c0_65] : memref<64x32xf32, #tpu.memory_space<vmem>>, vector<8x32xf32>
    tpu.vector_store %arg20[%203, %c0_65], %202 {strides = array<i32>} : memref<64x32xf32, #tpu.memory_space<vmem>>, vector<8x32xf32>,
    %205 = vector.extract_strided_slice %201 {offsets = [0, 32], sizes = [8, 32], strides = [1, 1]} : vector<8x64xf32> to vector<8x32xf32>
    %206 = arith.index_cast %174 : i32 to index
    %c0_66 = arith.constant 0 : index
    %207 = vector.load %arg21[%206, %c0_66] : memref<64x32xf32, #tpu.memory_space<vmem>>, vector<8x32xf32>
    tpu.vector_store %arg21[%206, %c0_66], %205 {strides = array<i32>} : memref<64x32xf32, #tpu.memory_space<vmem>>, vector<8x32xf32>,
    %cst_67 = arith.constant 0.000000e+00 : f32
    %208 = vector.broadcast %cst_67 : f32 to vector<8x64xf32>
    %209 = arith.cmpf ogt, %200, %208 : vector<8x64xf32>
    %210 = arith.select %209, %198, %170 : vector<8x64xi1>, vector<8x64xf32>
    %211 = arith.select %209, %196, %171 : vector<8x64xi1>, vector<8x64xf32>
    %c5_i32 = arith.constant 5 : i32
    %c8_i32_68 = arith.constant 8 : i32
    %212 = arith.muli %c5_i32, %c8_i32_68 : i32
    %c7_i32_69 = arith.constant 7 : i32
    %213 = arith.subi %c7_i32_69, %c5_i32 : i32
    %c8_i32_70 = arith.constant 8 : i32
    %214 = arith.muli %213, %c8_i32_70 : i32
    %215 = arith.index_cast %212 : i32 to index
    %c0_71 = arith.constant 0 : index
    %216 = vector.load %arg18[%215, %c0_71] : memref<64x256xf32, #tpu.memory_space<vmem>>, vector<8x256xf32>
    %217 = arith.index_cast %214 : i32 to index
    %c0_72 = arith.constant 0 : index
    %218 = vector.load %arg19[%217, %c0_72] : memref<64x256xf32, #tpu.memory_space<vmem>>, vector<8x256xf32>
    %219 = arith.addf %216, %218 : vector<8x256xf32>
    %220 = arith.truncf %210 : vector<8x64xf32> to vector<8x64xbf16>
    %cst_73 = arith.constant dense<0.000000e+00> : vector<8x256xf32>
    %221 = tpu.matmul %220, %10, %cst_73 {dimension_numbers = #tpu.dot_dimension_numbers<[1], [0], [0], [1], [0, 0, 1, 1], [], []>} : vector<8x64xbf16>, vector<64x256xbf16>, vector<8x256xf32> -> vector<8x256xf32>
    %222 = arith.addf %219, %221 : vector<8x256xf32>
    %223 = vector.extract_strided_slice %222 {offsets = [0, 0], sizes = [8, 192], strides = [1, 1]} : vector<8x256xf32> to vector<8x192xf32>
    %224 = arith.negf %223 : vector<8x192xf32>
    %225 = math.exp %224 : vector<8x192xf32>
    %cst_74 = arith.constant 1.000000e+00 : f32
    %226 = vector.broadcast %cst_74 : f32 to vector<8x192xf32>
    %227 = arith.addf %226, %225 : vector<8x192xf32>
    %228 = arith.divf %226, %227 : vector<8x192xf32>
    %229 = vector.extract_strided_slice %222 {offsets = [0, 192], sizes = [8, 64], strides = [1, 1]} : vector<8x256xf32> to vector<8x64xf32>
    %230 = math.tanh %229 : vector<8x64xf32>
    %231 = vector.extract_strided_slice %228 {offsets = [0, 0], sizes = [8, 64], strides = [1, 1]} : vector<8x192xf32> to vector<8x64xf32>
    %232 = vector.extract_strided_slice %228 {offsets = [0, 64], sizes = [8, 64], strides = [1, 1]} : vector<8x192xf32> to vector<8x64xf32>
    %233 = vector.extract_strided_slice %228 {offsets = [0, 128], sizes = [8, 64], strides = [1, 1]} : vector<8x192xf32> to vector<8x64xf32>
    %234 = arith.mulf %232, %211 : vector<8x64xf32>
    %235 = arith.mulf %231, %230 : vector<8x64xf32>
    %236 = arith.addf %234, %235 : vector<8x64xf32>
    %237 = math.tanh %236 : vector<8x64xf32>
    %238 = arith.mulf %233, %237 : vector<8x64xf32>
    %239 = arith.index_cast %212 : i32 to index
    %c0_75 = arith.constant 0 : index
    %240 = vector.load %arg1[%239, %c0_75] : memref<64x64xf32, #tpu.memory_space<vmem>>, vector<8x64xf32>
    %241 = arith.mulf %238, %240 : vector<8x64xf32>
    %242 = vector.extract_strided_slice %241 {offsets = [0, 0], sizes = [8, 32], strides = [1, 1]} : vector<8x64xf32> to vector<8x32xf32>
    %243 = arith.index_cast %212 : i32 to index
    %c0_76 = arith.constant 0 : index
    %244 = vector.load %arg20[%243, %c0_76] : memref<64x32xf32, #tpu.memory_space<vmem>>, vector<8x32xf32>
    tpu.vector_store %arg20[%243, %c0_76], %242 {strides = array<i32>} : memref<64x32xf32, #tpu.memory_space<vmem>>, vector<8x32xf32>,
    %245 = vector.extract_strided_slice %241 {offsets = [0, 32], sizes = [8, 32], strides = [1, 1]} : vector<8x64xf32> to vector<8x32xf32>
    %246 = arith.index_cast %214 : i32 to index
    %c0_77 = arith.constant 0 : index
    %247 = vector.load %arg21[%246, %c0_77] : memref<64x32xf32, #tpu.memory_space<vmem>>, vector<8x32xf32>
    tpu.vector_store %arg21[%246, %c0_77], %245 {strides = array<i32>} : memref<64x32xf32, #tpu.memory_space<vmem>>, vector<8x32xf32>,
    %cst_78 = arith.constant 0.000000e+00 : f32
    %248 = vector.broadcast %cst_78 : f32 to vector<8x64xf32>
    %249 = arith.cmpf ogt, %240, %248 : vector<8x64xf32>
    %250 = arith.select %249, %238, %210 : vector<8x64xi1>, vector<8x64xf32>
    %251 = arith.select %249, %236, %211 : vector<8x64xi1>, vector<8x64xf32>
    %c6_i32 = arith.constant 6 : i32
    %c8_i32_79 = arith.constant 8 : i32
    %252 = arith.muli %c6_i32, %c8_i32_79 : i32
    %c7_i32_80 = arith.constant 7 : i32
    %253 = arith.subi %c7_i32_80, %c6_i32 : i32
    %c8_i32_81 = arith.constant 8 : i32
    %254 = arith.muli %253, %c8_i32_81 : i32
    %255 = arith.index_cast %252 : i32 to index
    %c0_82 = arith.constant 0 : index
    %256 = vector.load %arg18[%255, %c0_82] : memref<64x256xf32, #tpu.memory_space<vmem>>, vector<8x256xf32>
    %257 = arith.index_cast %254 : i32 to index
    %c0_83 = arith.constant 0 : index
    %258 = vector.load %arg19[%257, %c0_83] : memref<64x256xf32, #tpu.memory_space<vmem>>, vector<8x256xf32>
    %259 = arith.addf %256, %258 : vector<8x256xf32>
    %260 = arith.truncf %250 : vector<8x64xf32> to vector<8x64xbf16>
    %cst_84 = arith.constant dense<0.000000e+00> : vector<8x256xf32>
    %261 = tpu.matmul %260, %10, %cst_84 {dimension_numbers = #tpu.dot_dimension_numbers<[1], [0], [0], [1], [0, 0, 1, 1], [], []>} : vector<8x64xbf16>, vector<64x256xbf16>, vector<8x256xf32> -> vector<8x256xf32>
    %262 = arith.addf %259, %261 : vector<8x256xf32>
    %263 = vector.extract_strided_slice %262 {offsets = [0, 0], sizes = [8, 192], strides = [1, 1]} : vector<8x256xf32> to vector<8x192xf32>
    %264 = arith.negf %263 : vector<8x192xf32>
    %265 = math.exp %264 : vector<8x192xf32>
    %cst_85 = arith.constant 1.000000e+00 : f32
    %266 = vector.broadcast %cst_85 : f32 to vector<8x192xf32>
    %267 = arith.addf %266, %265 : vector<8x192xf32>
    %268 = arith.divf %266, %267 : vector<8x192xf32>
    %269 = vector.extract_strided_slice %262 {offsets = [0, 192], sizes = [8, 64], strides = [1, 1]} : vector<8x256xf32> to vector<8x64xf32>
    %270 = math.tanh %269 : vector<8x64xf32>
    %271 = vector.extract_strided_slice %268 {offsets = [0, 0], sizes = [8, 64], strides = [1, 1]} : vector<8x192xf32> to vector<8x64xf32>
    %272 = vector.extract_strided_slice %268 {offsets = [0, 64], sizes = [8, 64], strides = [1, 1]} : vector<8x192xf32> to vector<8x64xf32>
    %273 = vector.extract_strided_slice %268 {offsets = [0, 128], sizes = [8, 64], strides = [1, 1]} : vector<8x192xf32> to vector<8x64xf32>
    %274 = arith.mulf %272, %251 : vector<8x64xf32>
    %275 = arith.mulf %271, %270 : vector<8x64xf32>
    %276 = arith.addf %274, %275 : vector<8x64xf32>
    %277 = math.tanh %276 : vector<8x64xf32>
    %278 = arith.mulf %273, %277 : vector<8x64xf32>
    %279 = arith.index_cast %252 : i32 to index
    %c0_86 = arith.constant 0 : index
    %280 = vector.load %arg1[%279, %c0_86] : memref<64x64xf32, #tpu.memory_space<vmem>>, vector<8x64xf32>
    %281 = arith.mulf %278, %280 : vector<8x64xf32>
    %282 = vector.extract_strided_slice %281 {offsets = [0, 0], sizes = [8, 32], strides = [1, 1]} : vector<8x64xf32> to vector<8x32xf32>
    %283 = arith.index_cast %252 : i32 to index
    %c0_87 = arith.constant 0 : index
    %284 = vector.load %arg20[%283, %c0_87] : memref<64x32xf32, #tpu.memory_space<vmem>>, vector<8x32xf32>
    tpu.vector_store %arg20[%283, %c0_87], %282 {strides = array<i32>} : memref<64x32xf32, #tpu.memory_space<vmem>>, vector<8x32xf32>,
    %285 = vector.extract_strided_slice %281 {offsets = [0, 32], sizes = [8, 32], strides = [1, 1]} : vector<8x64xf32> to vector<8x32xf32>
    %286 = arith.index_cast %254 : i32 to index
    %c0_88 = arith.constant 0 : index
    %287 = vector.load %arg21[%286, %c0_88] : memref<64x32xf32, #tpu.memory_space<vmem>>, vector<8x32xf32>
    tpu.vector_store %arg21[%286, %c0_88], %285 {strides = array<i32>} : memref<64x32xf32, #tpu.memory_space<vmem>>, vector<8x32xf32>,
    %cst_89 = arith.constant 0.000000e+00 : f32
    %288 = vector.broadcast %cst_89 : f32 to vector<8x64xf32>
    %289 = arith.cmpf ogt, %280, %288 : vector<8x64xf32>
    %290 = arith.select %289, %278, %250 : vector<8x64xi1>, vector<8x64xf32>
    %291 = arith.select %289, %276, %251 : vector<8x64xi1>, vector<8x64xf32>
    %c7_i32_90 = arith.constant 7 : i32
    %c8_i32_91 = arith.constant 8 : i32
    %292 = arith.muli %c7_i32_90, %c8_i32_91 : i32
    %c7_i32_92 = arith.constant 7 : i32
    %293 = arith.subi %c7_i32_92, %c7_i32_90 : i32
    %c8_i32_93 = arith.constant 8 : i32
    %294 = arith.muli %293, %c8_i32_93 : i32
    %295 = arith.index_cast %292 : i32 to index
    %c0_94 = arith.constant 0 : index
    %296 = vector.load %arg18[%295, %c0_94] : memref<64x256xf32, #tpu.memory_space<vmem>>, vector<8x256xf32>
    %297 = arith.index_cast %294 : i32 to index
    %c0_95 = arith.constant 0 : index
    %298 = vector.load %arg19[%297, %c0_95] : memref<64x256xf32, #tpu.memory_space<vmem>>, vector<8x256xf32>
    %299 = arith.addf %296, %298 : vector<8x256xf32>
    %300 = arith.truncf %290 : vector<8x64xf32> to vector<8x64xbf16>
    %cst_96 = arith.constant dense<0.000000e+00> : vector<8x256xf32>
    %301 = tpu.matmul %300, %10, %cst_96 {dimension_numbers = #tpu.dot_dimension_numbers<[1], [0], [0], [1], [0, 0, 1, 1], [], []>} : vector<8x64xbf16>, vector<64x256xbf16>, vector<8x256xf32> -> vector<8x256xf32>
    %302 = arith.addf %299, %301 : vector<8x256xf32>
    %303 = vector.extract_strided_slice %302 {offsets = [0, 0], sizes = [8, 192], strides = [1, 1]} : vector<8x256xf32> to vector<8x192xf32>
    %304 = arith.negf %303 : vector<8x192xf32>
    %305 = math.exp %304 : vector<8x192xf32>
    %cst_97 = arith.constant 1.000000e+00 : f32
    %306 = vector.broadcast %cst_97 : f32 to vector<8x192xf32>
    %307 = arith.addf %306, %305 : vector<8x192xf32>
    %308 = arith.divf %306, %307 : vector<8x192xf32>
    %309 = vector.extract_strided_slice %302 {offsets = [0, 192], sizes = [8, 64], strides = [1, 1]} : vector<8x256xf32> to vector<8x64xf32>
    %310 = math.tanh %309 : vector<8x64xf32>
    %311 = vector.extract_strided_slice %308 {offsets = [0, 0], sizes = [8, 64], strides = [1, 1]} : vector<8x192xf32> to vector<8x64xf32>
    %312 = vector.extract_strided_slice %308 {offsets = [0, 64], sizes = [8, 64], strides = [1, 1]} : vector<8x192xf32> to vector<8x64xf32>
    %313 = vector.extract_strided_slice %308 {offsets = [0, 128], sizes = [8, 64], strides = [1, 1]} : vector<8x192xf32> to vector<8x64xf32>
    %314 = arith.mulf %312, %291 : vector<8x64xf32>
    %315 = arith.mulf %311, %310 : vector<8x64xf32>
    %316 = arith.addf %314, %315 : vector<8x64xf32>
    %317 = math.tanh %316 : vector<8x64xf32>
    %318 = arith.mulf %313, %317 : vector<8x64xf32>
    %319 = arith.index_cast %292 : i32 to index
    %c0_98 = arith.constant 0 : index
    %320 = vector.load %arg1[%319, %c0_98] : memref<64x64xf32, #tpu.memory_space<vmem>>, vector<8x64xf32>
    %321 = arith.mulf %318, %320 : vector<8x64xf32>
    %322 = vector.extract_strided_slice %321 {offsets = [0, 0], sizes = [8, 32], strides = [1, 1]} : vector<8x64xf32> to vector<8x32xf32>
    %323 = arith.index_cast %292 : i32 to index
    %c0_99 = arith.constant 0 : index
    %324 = vector.load %arg20[%323, %c0_99] : memref<64x32xf32, #tpu.memory_space<vmem>>, vector<8x32xf32>
    tpu.vector_store %arg20[%323, %c0_99], %322 {strides = array<i32>} : memref<64x32xf32, #tpu.memory_space<vmem>>, vector<8x32xf32>,
    %325 = vector.extract_strided_slice %321 {offsets = [0, 32], sizes = [8, 32], strides = [1, 1]} : vector<8x64xf32> to vector<8x32xf32>
    %326 = arith.index_cast %294 : i32 to index
    %c0_100 = arith.constant 0 : index
    %327 = vector.load %arg21[%326, %c0_100] : memref<64x32xf32, #tpu.memory_space<vmem>>, vector<8x32xf32>
    tpu.vector_store %arg21[%326, %c0_100], %325 {strides = array<i32>} : memref<64x32xf32, #tpu.memory_space<vmem>>, vector<8x32xf32>,
    %cst_101 = arith.constant 0.000000e+00 : f32
    %328 = vector.broadcast %cst_101 : f32 to vector<8x64xf32>
    %329 = arith.cmpf ogt, %320, %328 : vector<8x64xf32>
    %330 = arith.select %329, %318, %290 : vector<8x64xi1>, vector<8x64xf32>
    %331 = arith.select %329, %316, %291 : vector<8x64xi1>, vector<8x64xf32>
    %c8_i32_102 = arith.constant 8 : i32
    %c0_103 = arith.constant 0 : index
    %c0_104 = arith.constant 0 : index
    %332 = vector.load %arg20[%c0_103, %c0_104] : memref<64x32xf32, #tpu.memory_space<vmem>>, vector<64x32xf32>
    %333 = arith.truncf %332 : vector<64x32xf32> to vector<64x32xbf16>
    %c0_105 = arith.constant 0 : index
    %c0_106 = arith.constant 0 : index
    %334 = vector.load %arg21[%c0_105, %c0_106] : memref<64x32xf32, #tpu.memory_space<vmem>>, vector<64x32xf32>
    %335 = arith.truncf %334 : vector<64x32xf32> to vector<64x32xbf16>
    %c0_107 = arith.constant 0 : index
    %c0_108 = arith.constant 0 : index
    %336 = vector.load %arg6[%c0_107, %c0_108] : memref<32x256xbf16, #tpu.memory_space<vmem>>, vector<32x256xbf16>
    %cst_109 = arith.constant dense<0.000000e+00> : vector<64x256xf32>
    %337 = tpu.matmul %333, %336, %cst_109 {dimension_numbers = #tpu.dot_dimension_numbers<[1], [0], [0], [1], [0, 0, 1, 1], [], []>} : vector<64x32xbf16>, vector<32x256xbf16>, vector<64x256xf32> -> vector<64x256xf32>
    %c0_110 = arith.constant 0 : index
    %c0_111 = arith.constant 0 : index
    %338 = vector.load %arg7[%c0_110, %c0_111] : memref<32x256xbf16, #tpu.memory_space<vmem>>, vector<32x256xbf16>
    %cst_112 = arith.constant dense<0.000000e+00> : vector<64x256xf32>
    %339 = tpu.matmul %335, %338, %cst_112 {dimension_numbers = #tpu.dot_dimension_numbers<[1], [0], [0], [1], [0, 0, 1, 1], [], []>} : vector<64x32xbf16>, vector<32x256xbf16>, vector<64x256xf32> -> vector<64x256xf32>
    %340 = arith.addf %337, %339 : vector<64x256xf32>
    %c0_113 = arith.constant 0 : index
    %c0_114 = arith.constant 0 : index
    %341 = vector.load %arg11[%c0_113, %c0_114] : memref<1x256xf32, #tpu.memory_space<vmem>>, vector<1x256xf32>
    %342 = vector.broadcast %341 : vector<1x256xf32> to vector<64x256xf32>
    %343 = arith.addf %340, %342 : vector<64x256xf32>
    %c0_115 = arith.constant 0 : index
    %c0_116 = arith.constant 0 : index
    %344 = vector.load %arg8[%c0_115, %c0_116] : memref<32x256xbf16, #tpu.memory_space<vmem>>, vector<32x256xbf16>
    %cst_117 = arith.constant dense<0.000000e+00> : vector<64x256xf32>
    %345 = tpu.matmul %333, %344, %cst_117 {dimension_numbers = #tpu.dot_dimension_numbers<[1], [0], [0], [1], [0, 0, 1, 1], [], []>} : vector<64x32xbf16>, vector<32x256xbf16>, vector<64x256xf32> -> vector<64x256xf32>
    %c0_118 = arith.constant 0 : index
    %c0_119 = arith.constant 0 : index
    %346 = vector.load %arg9[%c0_118, %c0_119] : memref<32x256xbf16, #tpu.memory_space<vmem>>, vector<32x256xbf16>
    %cst_120 = arith.constant dense<0.000000e+00> : vector<64x256xf32>
    %347 = tpu.matmul %335, %346, %cst_120 {dimension_numbers = #tpu.dot_dimension_numbers<[1], [0], [0], [1], [0, 0, 1, 1], [], []>} : vector<64x32xbf16>, vector<32x256xbf16>, vector<64x256xf32> -> vector<64x256xf32>
    %348 = arith.addf %345, %347 : vector<64x256xf32>
    %c0_121 = arith.constant 0 : index
    %c0_122 = arith.constant 0 : index
    %349 = vector.load %arg18[%c0_121, %c0_122] : memref<64x256xf32, #tpu.memory_space<vmem>>, vector<64x256xf32>
    tpu.vector_store %arg18[%c0_121, %c0_122], %343 {strides = array<i32>} : memref<64x256xf32, #tpu.memory_space<vmem>>, vector<64x256xf32>,
    %c0_123 = arith.constant 0 : index
    %c0_124 = arith.constant 0 : index
    %350 = vector.load %arg19[%c0_123, %c0_124] : memref<64x256xf32, #tpu.memory_space<vmem>>, vector<64x256xf32>
    tpu.vector_store %arg19[%c0_123, %c0_124], %348 {strides = array<i32>} : memref<64x256xf32, #tpu.memory_space<vmem>>, vector<64x256xf32>,
    %c0_125 = arith.constant 0 : index
    %c0_126 = arith.constant 0 : index
    %351 = vector.load %arg10[%c0_125, %c0_126] : memref<64x256xbf16, #tpu.memory_space<vmem>>, vector<64x256xbf16>
    %cst_127 = arith.constant 0.000000e+00 : f32
    %352 = vector.broadcast %cst_127 : f32 to vector<8x64xf32>
    %c0_i32_128 = arith.constant 0 : i32
    %c8_i32_129 = arith.constant 8 : i32
    %353 = arith.muli %c0_i32_128, %c8_i32_129 : i32
    %c7_i32_130 = arith.constant 7 : i32
    %354 = arith.subi %c7_i32_130, %c0_i32_128 : i32
    %c8_i32_131 = arith.constant 8 : i32
    %355 = arith.muli %354, %c8_i32_131 : i32
    %356 = arith.index_cast %353 : i32 to index
    %c0_132 = arith.constant 0 : index
    %357 = vector.load %arg18[%356, %c0_132] : memref<64x256xf32, #tpu.memory_space<vmem>>, vector<8x256xf32>
    %358 = arith.index_cast %355 : i32 to index
    %c0_133 = arith.constant 0 : index
    %359 = vector.load %arg19[%358, %c0_133] : memref<64x256xf32, #tpu.memory_space<vmem>>, vector<8x256xf32>
    %360 = arith.addf %357, %359 : vector<8x256xf32>
    %361 = arith.truncf %352 : vector<8x64xf32> to vector<8x64xbf16>
    %cst_134 = arith.constant dense<0.000000e+00> : vector<8x256xf32>
    %362 = tpu.matmul %361, %351, %cst_134 {dimension_numbers = #tpu.dot_dimension_numbers<[1], [0], [0], [1], [0, 0, 1, 1], [], []>} : vector<8x64xbf16>, vector<64x256xbf16>, vector<8x256xf32> -> vector<8x256xf32>
    %363 = arith.addf %360, %362 : vector<8x256xf32>
    %364 = vector.extract_strided_slice %363 {offsets = [0, 0], sizes = [8, 192], strides = [1, 1]} : vector<8x256xf32> to vector<8x192xf32>
    %365 = arith.negf %364 : vector<8x192xf32>
    %366 = math.exp %365 : vector<8x192xf32>
    %cst_135 = arith.constant 1.000000e+00 : f32
    %367 = vector.broadcast %cst_135 : f32 to vector<8x192xf32>
    %368 = arith.addf %367, %366 : vector<8x192xf32>
    %369 = arith.divf %367, %368 : vector<8x192xf32>
    %370 = vector.extract_strided_slice %363 {offsets = [0, 192], sizes = [8, 64], strides = [1, 1]} : vector<8x256xf32> to vector<8x64xf32>
    %371 = math.tanh %370 : vector<8x64xf32>
    %372 = vector.extract_strided_slice %369 {offsets = [0, 0], sizes = [8, 64], strides = [1, 1]} : vector<8x192xf32> to vector<8x64xf32>
    %373 = vector.extract_strided_slice %369 {offsets = [0, 64], sizes = [8, 64], strides = [1, 1]} : vector<8x192xf32> to vector<8x64xf32>
    %374 = vector.extract_strided_slice %369 {offsets = [0, 128], sizes = [8, 64], strides = [1, 1]} : vector<8x192xf32> to vector<8x64xf32>
    %375 = arith.mulf %373, %352 : vector<8x64xf32>
    %376 = arith.mulf %372, %371 : vector<8x64xf32>
    %377 = arith.addf %375, %376 : vector<8x64xf32>
    %378 = math.tanh %377 : vector<8x64xf32>
    %379 = arith.mulf %374, %378 : vector<8x64xf32>
    %380 = arith.index_cast %353 : i32 to index
    %c0_136 = arith.constant 0 : index
    %381 = vector.load %arg1[%380, %c0_136] : memref<64x64xf32, #tpu.memory_space<vmem>>, vector<8x64xf32>
    %382 = arith.mulf %379, %381 : vector<8x64xf32>
    %383 = vector.extract_strided_slice %382 {offsets = [0, 0], sizes = [8, 32], strides = [1, 1]} : vector<8x64xf32> to vector<8x32xf32>
    %384 = arith.index_cast %353 : i32 to index
    %c0_137 = arith.constant 0 : index
    %385 = vector.load %arg14[%384, %c0_137] : memref<64x32xf32, #tpu.memory_space<vmem>>, vector<8x32xf32>
    tpu.vector_store %arg14[%384, %c0_137], %383 {strides = array<i32>} : memref<64x32xf32, #tpu.memory_space<vmem>>, vector<8x32xf32>,
    %386 = vector.extract_strided_slice %382 {offsets = [0, 32], sizes = [8, 32], strides = [1, 1]} : vector<8x64xf32> to vector<8x32xf32>
    %387 = arith.index_cast %355 : i32 to index
    %c0_138 = arith.constant 0 : index
    %388 = vector.load %arg15[%387, %c0_138] : memref<64x32xf32, #tpu.memory_space<vmem>>, vector<8x32xf32>
    tpu.vector_store %arg15[%387, %c0_138], %386 {strides = array<i32>} : memref<64x32xf32, #tpu.memory_space<vmem>>, vector<8x32xf32>,
    %cst_139 = arith.constant 0.000000e+00 : f32
    %389 = vector.broadcast %cst_139 : f32 to vector<8x64xf32>
    %390 = arith.cmpf ogt, %381, %389 : vector<8x64xf32>
    %391 = arith.select %390, %379, %352 : vector<8x64xi1>, vector<8x64xf32>
    %392 = arith.select %390, %377, %352 : vector<8x64xi1>, vector<8x64xf32>
    %c1_i32_140 = arith.constant 1 : i32
    %c8_i32_141 = arith.constant 8 : i32
    %393 = arith.muli %c1_i32_140, %c8_i32_141 : i32
    %c7_i32_142 = arith.constant 7 : i32
    %394 = arith.subi %c7_i32_142, %c1_i32_140 : i32
    %c8_i32_143 = arith.constant 8 : i32
    %395 = arith.muli %394, %c8_i32_143 : i32
    %396 = arith.index_cast %393 : i32 to index
    %c0_144 = arith.constant 0 : index
    %397 = vector.load %arg18[%396, %c0_144] : memref<64x256xf32, #tpu.memory_space<vmem>>, vector<8x256xf32>
    %398 = arith.index_cast %395 : i32 to index
    %c0_145 = arith.constant 0 : index
    %399 = vector.load %arg19[%398, %c0_145] : memref<64x256xf32, #tpu.memory_space<vmem>>, vector<8x256xf32>
    %400 = arith.addf %397, %399 : vector<8x256xf32>
    %401 = arith.truncf %391 : vector<8x64xf32> to vector<8x64xbf16>
    %cst_146 = arith.constant dense<0.000000e+00> : vector<8x256xf32>
    %402 = tpu.matmul %401, %351, %cst_146 {dimension_numbers = #tpu.dot_dimension_numbers<[1], [0], [0], [1], [0, 0, 1, 1], [], []>} : vector<8x64xbf16>, vector<64x256xbf16>, vector<8x256xf32> -> vector<8x256xf32>
    %403 = arith.addf %400, %402 : vector<8x256xf32>
    %404 = vector.extract_strided_slice %403 {offsets = [0, 0], sizes = [8, 192], strides = [1, 1]} : vector<8x256xf32> to vector<8x192xf32>
    %405 = arith.negf %404 : vector<8x192xf32>
    %406 = math.exp %405 : vector<8x192xf32>
    %cst_147 = arith.constant 1.000000e+00 : f32
    %407 = vector.broadcast %cst_147 : f32 to vector<8x192xf32>
    %408 = arith.addf %407, %406 : vector<8x192xf32>
    %409 = arith.divf %407, %408 : vector<8x192xf32>
    %410 = vector.extract_strided_slice %403 {offsets = [0, 192], sizes = [8, 64], strides = [1, 1]} : vector<8x256xf32> to vector<8x64xf32>
    %411 = math.tanh %410 : vector<8x64xf32>
    %412 = vector.extract_strided_slice %409 {offsets = [0, 0], sizes = [8, 64], strides = [1, 1]} : vector<8x192xf32> to vector<8x64xf32>
    %413 = vector.extract_strided_slice %409 {offsets = [0, 64], sizes = [8, 64], strides = [1, 1]} : vector<8x192xf32> to vector<8x64xf32>
    %414 = vector.extract_strided_slice %409 {offsets = [0, 128], sizes = [8, 64], strides = [1, 1]} : vector<8x192xf32> to vector<8x64xf32>
    %415 = arith.mulf %413, %392 : vector<8x64xf32>
    %416 = arith.mulf %412, %411 : vector<8x64xf32>
    %417 = arith.addf %415, %416 : vector<8x64xf32>
    %418 = math.tanh %417 : vector<8x64xf32>
    %419 = arith.mulf %414, %418 : vector<8x64xf32>
    %420 = arith.index_cast %393 : i32 to index
    %c0_148 = arith.constant 0 : index
    %421 = vector.load %arg1[%420, %c0_148] : memref<64x64xf32, #tpu.memory_space<vmem>>, vector<8x64xf32>
    %422 = arith.mulf %419, %421 : vector<8x64xf32>
    %423 = vector.extract_strided_slice %422 {offsets = [0, 0], sizes = [8, 32], strides = [1, 1]} : vector<8x64xf32> to vector<8x32xf32>
    %424 = arith.index_cast %393 : i32 to index
    %c0_149 = arith.constant 0 : index
    %425 = vector.load %arg14[%424, %c0_149] : memref<64x32xf32, #tpu.memory_space<vmem>>, vector<8x32xf32>
    tpu.vector_store %arg14[%424, %c0_149], %423 {strides = array<i32>} : memref<64x32xf32, #tpu.memory_space<vmem>>, vector<8x32xf32>,
    %426 = vector.extract_strided_slice %422 {offsets = [0, 32], sizes = [8, 32], strides = [1, 1]} : vector<8x64xf32> to vector<8x32xf32>
    %427 = arith.index_cast %395 : i32 to index
    %c0_150 = arith.constant 0 : index
    %428 = vector.load %arg15[%427, %c0_150] : memref<64x32xf32, #tpu.memory_space<vmem>>, vector<8x32xf32>
    tpu.vector_store %arg15[%427, %c0_150], %426 {strides = array<i32>} : memref<64x32xf32, #tpu.memory_space<vmem>>, vector<8x32xf32>,
    %cst_151 = arith.constant 0.000000e+00 : f32
    %429 = vector.broadcast %cst_151 : f32 to vector<8x64xf32>
    %430 = arith.cmpf ogt, %421, %429 : vector<8x64xf32>
    %431 = arith.select %430, %419, %391 : vector<8x64xi1>, vector<8x64xf32>
    %432 = arith.select %430, %417, %392 : vector<8x64xi1>, vector<8x64xf32>
    %c2_i32_152 = arith.constant 2 : i32
    %c8_i32_153 = arith.constant 8 : i32
    %433 = arith.muli %c2_i32_152, %c8_i32_153 : i32
    %c7_i32_154 = arith.constant 7 : i32
    %434 = arith.subi %c7_i32_154, %c2_i32_152 : i32
    %c8_i32_155 = arith.constant 8 : i32
    %435 = arith.muli %434, %c8_i32_155 : i32
    %436 = arith.index_cast %433 : i32 to index
    %c0_156 = arith.constant 0 : index
    %437 = vector.load %arg18[%436, %c0_156] : memref<64x256xf32, #tpu.memory_space<vmem>>, vector<8x256xf32>
    %438 = arith.index_cast %435 : i32 to index
    %c0_157 = arith.constant 0 : index
    %439 = vector.load %arg19[%438, %c0_157] : memref<64x256xf32, #tpu.memory_space<vmem>>, vector<8x256xf32>
    %440 = arith.addf %437, %439 : vector<8x256xf32>
    %441 = arith.truncf %431 : vector<8x64xf32> to vector<8x64xbf16>
    %cst_158 = arith.constant dense<0.000000e+00> : vector<8x256xf32>
    %442 = tpu.matmul %441, %351, %cst_158 {dimension_numbers = #tpu.dot_dimension_numbers<[1], [0], [0], [1], [0, 0, 1, 1], [], []>} : vector<8x64xbf16>, vector<64x256xbf16>, vector<8x256xf32> -> vector<8x256xf32>
    %443 = arith.addf %440, %442 : vector<8x256xf32>
    %444 = vector.extract_strided_slice %443 {offsets = [0, 0], sizes = [8, 192], strides = [1, 1]} : vector<8x256xf32> to vector<8x192xf32>
    %445 = arith.negf %444 : vector<8x192xf32>
    %446 = math.exp %445 : vector<8x192xf32>
    %cst_159 = arith.constant 1.000000e+00 : f32
    %447 = vector.broadcast %cst_159 : f32 to vector<8x192xf32>
    %448 = arith.addf %447, %446 : vector<8x192xf32>
    %449 = arith.divf %447, %448 : vector<8x192xf32>
    %450 = vector.extract_strided_slice %443 {offsets = [0, 192], sizes = [8, 64], strides = [1, 1]} : vector<8x256xf32> to vector<8x64xf32>
    %451 = math.tanh %450 : vector<8x64xf32>
    %452 = vector.extract_strided_slice %449 {offsets = [0, 0], sizes = [8, 64], strides = [1, 1]} : vector<8x192xf32> to vector<8x64xf32>
    %453 = vector.extract_strided_slice %449 {offsets = [0, 64], sizes = [8, 64], strides = [1, 1]} : vector<8x192xf32> to vector<8x64xf32>
    %454 = vector.extract_strided_slice %449 {offsets = [0, 128], sizes = [8, 64], strides = [1, 1]} : vector<8x192xf32> to vector<8x64xf32>
    %455 = arith.mulf %453, %432 : vector<8x64xf32>
    %456 = arith.mulf %452, %451 : vector<8x64xf32>
    %457 = arith.addf %455, %456 : vector<8x64xf32>
    %458 = math.tanh %457 : vector<8x64xf32>
    %459 = arith.mulf %454, %458 : vector<8x64xf32>
    %460 = arith.index_cast %433 : i32 to index
    %c0_160 = arith.constant 0 : index
    %461 = vector.load %arg1[%460, %c0_160] : memref<64x64xf32, #tpu.memory_space<vmem>>, vector<8x64xf32>
    %462 = arith.mulf %459, %461 : vector<8x64xf32>
    %463 = vector.extract_strided_slice %462 {offsets = [0, 0], sizes = [8, 32], strides = [1, 1]} : vector<8x64xf32> to vector<8x32xf32>
    %464 = arith.index_cast %433 : i32 to index
    %c0_161 = arith.constant 0 : index
    %465 = vector.load %arg14[%464, %c0_161] : memref<64x32xf32, #tpu.memory_space<vmem>>, vector<8x32xf32>
    tpu.vector_store %arg14[%464, %c0_161], %463 {strides = array<i32>} : memref<64x32xf32, #tpu.memory_space<vmem>>, vector<8x32xf32>,
    %466 = vector.extract_strided_slice %462 {offsets = [0, 32], sizes = [8, 32], strides = [1, 1]} : vector<8x64xf32> to vector<8x32xf32>
    %467 = arith.index_cast %435 : i32 to index
    %c0_162 = arith.constant 0 : index
    %468 = vector.load %arg15[%467, %c0_162] : memref<64x32xf32, #tpu.memory_space<vmem>>, vector<8x32xf32>
    tpu.vector_store %arg15[%467, %c0_162], %466 {strides = array<i32>} : memref<64x32xf32, #tpu.memory_space<vmem>>, vector<8x32xf32>,
    %cst_163 = arith.constant 0.000000e+00 : f32
    %469 = vector.broadcast %cst_163 : f32 to vector<8x64xf32>
    %470 = arith.cmpf ogt, %461, %469 : vector<8x64xf32>
    %471 = arith.select %470, %459, %431 : vector<8x64xi1>, vector<8x64xf32>
    %472 = arith.select %470, %457, %432 : vector<8x64xi1>, vector<8x64xf32>
    %c3_i32_164 = arith.constant 3 : i32
    %c8_i32_165 = arith.constant 8 : i32
    %473 = arith.muli %c3_i32_164, %c8_i32_165 : i32
    %c7_i32_166 = arith.constant 7 : i32
    %474 = arith.subi %c7_i32_166, %c3_i32_164 : i32
    %c8_i32_167 = arith.constant 8 : i32
    %475 = arith.muli %474, %c8_i32_167 : i32
    %476 = arith.index_cast %473 : i32 to index
    %c0_168 = arith.constant 0 : index
    %477 = vector.load %arg18[%476, %c0_168] : memref<64x256xf32, #tpu.memory_space<vmem>>, vector<8x256xf32>
    %478 = arith.index_cast %475 : i32 to index
    %c0_169 = arith.constant 0 : index
    %479 = vector.load %arg19[%478, %c0_169] : memref<64x256xf32, #tpu.memory_space<vmem>>, vector<8x256xf32>
    %480 = arith.addf %477, %479 : vector<8x256xf32>
    %481 = arith.truncf %471 : vector<8x64xf32> to vector<8x64xbf16>
    %cst_170 = arith.constant dense<0.000000e+00> : vector<8x256xf32>
    %482 = tpu.matmul %481, %351, %cst_170 {dimension_numbers = #tpu.dot_dimension_numbers<[1], [0], [0], [1], [0, 0, 1, 1], [], []>} : vector<8x64xbf16>, vector<64x256xbf16>, vector<8x256xf32> -> vector<8x256xf32>
    %483 = arith.addf %480, %482 : vector<8x256xf32>
    %484 = vector.extract_strided_slice %483 {offsets = [0, 0], sizes = [8, 192], strides = [1, 1]} : vector<8x256xf32> to vector<8x192xf32>
    %485 = arith.negf %484 : vector<8x192xf32>
    %486 = math.exp %485 : vector<8x192xf32>
    %cst_171 = arith.constant 1.000000e+00 : f32
    %487 = vector.broadcast %cst_171 : f32 to vector<8x192xf32>
    %488 = arith.addf %487, %486 : vector<8x192xf32>
    %489 = arith.divf %487, %488 : vector<8x192xf32>
    %490 = vector.extract_strided_slice %483 {offsets = [0, 192], sizes = [8, 64], strides = [1, 1]} : vector<8x256xf32> to vector<8x64xf32>
    %491 = math.tanh %490 : vector<8x64xf32>
    %492 = vector.extract_strided_slice %489 {offsets = [0, 0], sizes = [8, 64], strides = [1, 1]} : vector<8x192xf32> to vector<8x64xf32>
    %493 = vector.extract_strided_slice %489 {offsets = [0, 64], sizes = [8, 64], strides = [1, 1]} : vector<8x192xf32> to vector<8x64xf32>
    %494 = vector.extract_strided_slice %489 {offsets = [0, 128], sizes = [8, 64], strides = [1, 1]} : vector<8x192xf32> to vector<8x64xf32>
    %495 = arith.mulf %493, %472 : vector<8x64xf32>
    %496 = arith.mulf %492, %491 : vector<8x64xf32>
    %497 = arith.addf %495, %496 : vector<8x64xf32>
    %498 = math.tanh %497 : vector<8x64xf32>
    %499 = arith.mulf %494, %498 : vector<8x64xf32>
    %500 = arith.index_cast %473 : i32 to index
    %c0_172 = arith.constant 0 : index
    %501 = vector.load %arg1[%500, %c0_172] : memref<64x64xf32, #tpu.memory_space<vmem>>, vector<8x64xf32>
    %502 = arith.mulf %499, %501 : vector<8x64xf32>
    %503 = vector.extract_strided_slice %502 {offsets = [0, 0], sizes = [8, 32], strides = [1, 1]} : vector<8x64xf32> to vector<8x32xf32>
    %504 = arith.index_cast %473 : i32 to index
    %c0_173 = arith.constant 0 : index
    %505 = vector.load %arg14[%504, %c0_173] : memref<64x32xf32, #tpu.memory_space<vmem>>, vector<8x32xf32>
    tpu.vector_store %arg14[%504, %c0_173], %503 {strides = array<i32>} : memref<64x32xf32, #tpu.memory_space<vmem>>, vector<8x32xf32>,
    %506 = vector.extract_strided_slice %502 {offsets = [0, 32], sizes = [8, 32], strides = [1, 1]} : vector<8x64xf32> to vector<8x32xf32>
    %507 = arith.index_cast %475 : i32 to index
    %c0_174 = arith.constant 0 : index
    %508 = vector.load %arg15[%507, %c0_174] : memref<64x32xf32, #tpu.memory_space<vmem>>, vector<8x32xf32>
    tpu.vector_store %arg15[%507, %c0_174], %506 {strides = array<i32>} : memref<64x32xf32, #tpu.memory_space<vmem>>, vector<8x32xf32>,
    %cst_175 = arith.constant 0.000000e+00 : f32
    %509 = vector.broadcast %cst_175 : f32 to vector<8x64xf32>
    %510 = arith.cmpf ogt, %501, %509 : vector<8x64xf32>
    %511 = arith.select %510, %499, %471 : vector<8x64xi1>, vector<8x64xf32>
    %512 = arith.select %510, %497, %472 : vector<8x64xi1>, vector<8x64xf32>
    %c4_i32_176 = arith.constant 4 : i32
    %c8_i32_177 = arith.constant 8 : i32
    %513 = arith.muli %c4_i32_176, %c8_i32_177 : i32
    %c7_i32_178 = arith.constant 7 : i32
    %514 = arith.subi %c7_i32_178, %c4_i32_176 : i32
    %c8_i32_179 = arith.constant 8 : i32
    %515 = arith.muli %514, %c8_i32_179 : i32
    %516 = arith.index_cast %513 : i32 to index
    %c0_180 = arith.constant 0 : index
    %517 = vector.load %arg18[%516, %c0_180] : memref<64x256xf32, #tpu.memory_space<vmem>>, vector<8x256xf32>
    %518 = arith.index_cast %515 : i32 to index
    %c0_181 = arith.constant 0 : index
    %519 = vector.load %arg19[%518, %c0_181] : memref<64x256xf32, #tpu.memory_space<vmem>>, vector<8x256xf32>
    %520 = arith.addf %517, %519 : vector<8x256xf32>
    %521 = arith.truncf %511 : vector<8x64xf32> to vector<8x64xbf16>
    %cst_182 = arith.constant dense<0.000000e+00> : vector<8x256xf32>
    %522 = tpu.matmul %521, %351, %cst_182 {dimension_numbers = #tpu.dot_dimension_numbers<[1], [0], [0], [1], [0, 0, 1, 1], [], []>} : vector<8x64xbf16>, vector<64x256xbf16>, vector<8x256xf32> -> vector<8x256xf32>
    %523 = arith.addf %520, %522 : vector<8x256xf32>
    %524 = vector.extract_strided_slice %523 {offsets = [0, 0], sizes = [8, 192], strides = [1, 1]} : vector<8x256xf32> to vector<8x192xf32>
    %525 = arith.negf %524 : vector<8x192xf32>
    %526 = math.exp %525 : vector<8x192xf32>
    %cst_183 = arith.constant 1.000000e+00 : f32
    %527 = vector.broadcast %cst_183 : f32 to vector<8x192xf32>
    %528 = arith.addf %527, %526 : vector<8x192xf32>
    %529 = arith.divf %527, %528 : vector<8x192xf32>
    %530 = vector.extract_strided_slice %523 {offsets = [0, 192], sizes = [8, 64], strides = [1, 1]} : vector<8x256xf32> to vector<8x64xf32>
    %531 = math.tanh %530 : vector<8x64xf32>
    %532 = vector.extract_strided_slice %529 {offsets = [0, 0], sizes = [8, 64], strides = [1, 1]} : vector<8x192xf32> to vector<8x64xf32>
    %533 = vector.extract_strided_slice %529 {offsets = [0, 64], sizes = [8, 64], strides = [1, 1]} : vector<8x192xf32> to vector<8x64xf32>
    %534 = vector.extract_strided_slice %529 {offsets = [0, 128], sizes = [8, 64], strides = [1, 1]} : vector<8x192xf32> to vector<8x64xf32>
    %535 = arith.mulf %533, %512 : vector<8x64xf32>
    %536 = arith.mulf %532, %531 : vector<8x64xf32>
    %537 = arith.addf %535, %536 : vector<8x64xf32>
    %538 = math.tanh %537 : vector<8x64xf32>
    %539 = arith.mulf %534, %538 : vector<8x64xf32>
    %540 = arith.index_cast %513 : i32 to index
    %c0_184 = arith.constant 0 : index
    %541 = vector.load %arg1[%540, %c0_184] : memref<64x64xf32, #tpu.memory_space<vmem>>, vector<8x64xf32>
    %542 = arith.mulf %539, %541 : vector<8x64xf32>
    %543 = vector.extract_strided_slice %542 {offsets = [0, 0], sizes = [8, 32], strides = [1, 1]} : vector<8x64xf32> to vector<8x32xf32>
    %544 = arith.index_cast %513 : i32 to index
    %c0_185 = arith.constant 0 : index
    %545 = vector.load %arg14[%544, %c0_185] : memref<64x32xf32, #tpu.memory_space<vmem>>, vector<8x32xf32>
    tpu.vector_store %arg14[%544, %c0_185], %543 {strides = array<i32>} : memref<64x32xf32, #tpu.memory_space<vmem>>, vector<8x32xf32>,
    %546 = vector.extract_strided_slice %542 {offsets = [0, 32], sizes = [8, 32], strides = [1, 1]} : vector<8x64xf32> to vector<8x32xf32>
    %547 = arith.index_cast %515 : i32 to index
    %c0_186 = arith.constant 0 : index
    %548 = vector.load %arg15[%547, %c0_186] : memref<64x32xf32, #tpu.memory_space<vmem>>, vector<8x32xf32>
    tpu.vector_store %arg15[%547, %c0_186], %546 {strides = array<i32>} : memref<64x32xf32, #tpu.memory_space<vmem>>, vector<8x32xf32>,
    %cst_187 = arith.constant 0.000000e+00 : f32
    %549 = vector.broadcast %cst_187 : f32 to vector<8x64xf32>
    %550 = arith.cmpf ogt, %541, %549 : vector<8x64xf32>
    %551 = arith.select %550, %539, %511 : vector<8x64xi1>, vector<8x64xf32>
    %552 = arith.select %550, %537, %512 : vector<8x64xi1>, vector<8x64xf32>
    %c5_i32_188 = arith.constant 5 : i32
    %c8_i32_189 = arith.constant 8 : i32
    %553 = arith.muli %c5_i32_188, %c8_i32_189 : i32
    %c7_i32_190 = arith.constant 7 : i32
    %554 = arith.subi %c7_i32_190, %c5_i32_188 : i32
    %c8_i32_191 = arith.constant 8 : i32
    %555 = arith.muli %554, %c8_i32_191 : i32
    %556 = arith.index_cast %553 : i32 to index
    %c0_192 = arith.constant 0 : index
    %557 = vector.load %arg18[%556, %c0_192] : memref<64x256xf32, #tpu.memory_space<vmem>>, vector<8x256xf32>
    %558 = arith.index_cast %555 : i32 to index
    %c0_193 = arith.constant 0 : index
    %559 = vector.load %arg19[%558, %c0_193] : memref<64x256xf32, #tpu.memory_space<vmem>>, vector<8x256xf32>
    %560 = arith.addf %557, %559 : vector<8x256xf32>
    %561 = arith.truncf %551 : vector<8x64xf32> to vector<8x64xbf16>
    %cst_194 = arith.constant dense<0.000000e+00> : vector<8x256xf32>
    %562 = tpu.matmul %561, %351, %cst_194 {dimension_numbers = #tpu.dot_dimension_numbers<[1], [0], [0], [1], [0, 0, 1, 1], [], []>} : vector<8x64xbf16>, vector<64x256xbf16>, vector<8x256xf32> -> vector<8x256xf32>
    %563 = arith.addf %560, %562 : vector<8x256xf32>
    %564 = vector.extract_strided_slice %563 {offsets = [0, 0], sizes = [8, 192], strides = [1, 1]} : vector<8x256xf32> to vector<8x192xf32>
    %565 = arith.negf %564 : vector<8x192xf32>
    %566 = math.exp %565 : vector<8x192xf32>
    %cst_195 = arith.constant 1.000000e+00 : f32
    %567 = vector.broadcast %cst_195 : f32 to vector<8x192xf32>
    %568 = arith.addf %567, %566 : vector<8x192xf32>
    %569 = arith.divf %567, %568 : vector<8x192xf32>
    %570 = vector.extract_strided_slice %563 {offsets = [0, 192], sizes = [8, 64], strides = [1, 1]} : vector<8x256xf32> to vector<8x64xf32>
    %571 = math.tanh %570 : vector<8x64xf32>
    %572 = vector.extract_strided_slice %569 {offsets = [0, 0], sizes = [8, 64], strides = [1, 1]} : vector<8x192xf32> to vector<8x64xf32>
    %573 = vector.extract_strided_slice %569 {offsets = [0, 64], sizes = [8, 64], strides = [1, 1]} : vector<8x192xf32> to vector<8x64xf32>
    %574 = vector.extract_strided_slice %569 {offsets = [0, 128], sizes = [8, 64], strides = [1, 1]} : vector<8x192xf32> to vector<8x64xf32>
    %575 = arith.mulf %573, %552 : vector<8x64xf32>
    %576 = arith.mulf %572, %571 : vector<8x64xf32>
    %577 = arith.addf %575, %576 : vector<8x64xf32>
    %578 = math.tanh %577 : vector<8x64xf32>
    %579 = arith.mulf %574, %578 : vector<8x64xf32>
    %580 = arith.index_cast %553 : i32 to index
    %c0_196 = arith.constant 0 : index
    %581 = vector.load %arg1[%580, %c0_196] : memref<64x64xf32, #tpu.memory_space<vmem>>, vector<8x64xf32>
    %582 = arith.mulf %579, %581 : vector<8x64xf32>
    %583 = vector.extract_strided_slice %582 {offsets = [0, 0], sizes = [8, 32], strides = [1, 1]} : vector<8x64xf32> to vector<8x32xf32>
    %584 = arith.index_cast %553 : i32 to index
    %c0_197 = arith.constant 0 : index
    %585 = vector.load %arg14[%584, %c0_197] : memref<64x32xf32, #tpu.memory_space<vmem>>, vector<8x32xf32>
    tpu.vector_store %arg14[%584, %c0_197], %583 {strides = array<i32>} : memref<64x32xf32, #tpu.memory_space<vmem>>, vector<8x32xf32>,
    %586 = vector.extract_strided_slice %582 {offsets = [0, 32], sizes = [8, 32], strides = [1, 1]} : vector<8x64xf32> to vector<8x32xf32>
    %587 = arith.index_cast %555 : i32 to index
    %c0_198 = arith.constant 0 : index
    %588 = vector.load %arg15[%587, %c0_198] : memref<64x32xf32, #tpu.memory_space<vmem>>, vector<8x32xf32>
    tpu.vector_store %arg15[%587, %c0_198], %586 {strides = array<i32>} : memref<64x32xf32, #tpu.memory_space<vmem>>, vector<8x32xf32>,
    %cst_199 = arith.constant 0.000000e+00 : f32
    %589 = vector.broadcast %cst_199 : f32 to vector<8x64xf32>
    %590 = arith.cmpf ogt, %581, %589 : vector<8x64xf32>
    %591 = arith.select %590, %579, %551 : vector<8x64xi1>, vector<8x64xf32>
    %592 = arith.select %590, %577, %552 : vector<8x64xi1>, vector<8x64xf32>
    %c6_i32_200 = arith.constant 6 : i32
    %c8_i32_201 = arith.constant 8 : i32
    %593 = arith.muli %c6_i32_200, %c8_i32_201 : i32
    %c7_i32_202 = arith.constant 7 : i32
    %594 = arith.subi %c7_i32_202, %c6_i32_200 : i32
    %c8_i32_203 = arith.constant 8 : i32
    %595 = arith.muli %594, %c8_i32_203 : i32
    %596 = arith.index_cast %593 : i32 to index
    %c0_204 = arith.constant 0 : index
    %597 = vector.load %arg18[%596, %c0_204] : memref<64x256xf32, #tpu.memory_space<vmem>>, vector<8x256xf32>
    %598 = arith.index_cast %595 : i32 to index
    %c0_205 = arith.constant 0 : index
    %599 = vector.load %arg19[%598, %c0_205] : memref<64x256xf32, #tpu.memory_space<vmem>>, vector<8x256xf32>
    %600 = arith.addf %597, %599 : vector<8x256xf32>
    %601 = arith.truncf %591 : vector<8x64xf32> to vector<8x64xbf16>
    %cst_206 = arith.constant dense<0.000000e+00> : vector<8x256xf32>
    %602 = tpu.matmul %601, %351, %cst_206 {dimension_numbers = #tpu.dot_dimension_numbers<[1], [0], [0], [1], [0, 0, 1, 1], [], []>} : vector<8x64xbf16>, vector<64x256xbf16>, vector<8x256xf32> -> vector<8x256xf32>
    %603 = arith.addf %600, %602 : vector<8x256xf32>
    %604 = vector.extract_strided_slice %603 {offsets = [0, 0], sizes = [8, 192], strides = [1, 1]} : vector<8x256xf32> to vector<8x192xf32>
    %605 = arith.negf %604 : vector<8x192xf32>
    %606 = math.exp %605 : vector<8x192xf32>
    %cst_207 = arith.constant 1.000000e+00 : f32
    %607 = vector.broadcast %cst_207 : f32 to vector<8x192xf32>
    %608 = arith.addf %607, %606 : vector<8x192xf32>
    %609 = arith.divf %607, %608 : vector<8x192xf32>
    %610 = vector.extract_strided_slice %603 {offsets = [0, 192], sizes = [8, 64], strides = [1, 1]} : vector<8x256xf32> to vector<8x64xf32>
    %611 = math.tanh %610 : vector<8x64xf32>
    %612 = vector.extract_strided_slice %609 {offsets = [0, 0], sizes = [8, 64], strides = [1, 1]} : vector<8x192xf32> to vector<8x64xf32>
    %613 = vector.extract_strided_slice %609 {offsets = [0, 64], sizes = [8, 64], strides = [1, 1]} : vector<8x192xf32> to vector<8x64xf32>
    %614 = vector.extract_strided_slice %609 {offsets = [0, 128], sizes = [8, 64], strides = [1, 1]} : vector<8x192xf32> to vector<8x64xf32>
    %615 = arith.mulf %613, %592 : vector<8x64xf32>
    %616 = arith.mulf %612, %611 : vector<8x64xf32>
    %617 = arith.addf %615, %616 : vector<8x64xf32>
    %618 = math.tanh %617 : vector<8x64xf32>
    %619 = arith.mulf %614, %618 : vector<8x64xf32>
    %620 = arith.index_cast %593 : i32 to index
    %c0_208 = arith.constant 0 : index
    %621 = vector.load %arg1[%620, %c0_208] : memref<64x64xf32, #tpu.memory_space<vmem>>, vector<8x64xf32>
    %622 = arith.mulf %619, %621 : vector<8x64xf32>
    %623 = vector.extract_strided_slice %622 {offsets = [0, 0], sizes = [8, 32], strides = [1, 1]} : vector<8x64xf32> to vector<8x32xf32>
    %624 = arith.index_cast %593 : i32 to index
    %c0_209 = arith.constant 0 : index
    %625 = vector.load %arg14[%624, %c0_209] : memref<64x32xf32, #tpu.memory_space<vmem>>, vector<8x32xf32>
    tpu.vector_store %arg14[%624, %c0_209], %623 {strides = array<i32>} : memref<64x32xf32, #tpu.memory_space<vmem>>, vector<8x32xf32>,
    %626 = vector.extract_strided_slice %622 {offsets = [0, 32], sizes = [8, 32], strides = [1, 1]} : vector<8x64xf32> to vector<8x32xf32>
    %627 = arith.index_cast %595 : i32 to index
    %c0_210 = arith.constant 0 : index
    %628 = vector.load %arg15[%627, %c0_210] : memref<64x32xf32, #tpu.memory_space<vmem>>, vector<8x32xf32>
    tpu.vector_store %arg15[%627, %c0_210], %626 {strides = array<i32>} : memref<64x32xf32, #tpu.memory_space<vmem>>, vector<8x32xf32>,
    %cst_211 = arith.constant 0.000000e+00 : f32
    %629 = vector.broadcast %cst_211 : f32 to vector<8x64xf32>
    %630 = arith.cmpf ogt, %621, %629 : vector<8x64xf32>
    %631 = arith.select %630, %619, %591 : vector<8x64xi1>, vector<8x64xf32>
    %632 = arith.select %630, %617, %592 : vector<8x64xi1>, vector<8x64xf32>
    %c7_i32_212 = arith.constant 7 : i32
    %c8_i32_213 = arith.constant 8 : i32
    %633 = arith.muli %c7_i32_212, %c8_i32_213 : i32
    %c7_i32_214 = arith.constant 7 : i32
    %634 = arith.subi %c7_i32_214, %c7_i32_212 : i32
    %c8_i32_215 = arith.constant 8 : i32
    %635 = arith.muli %634, %c8_i32_215 : i32
    %636 = arith.index_cast %633 : i32 to index
    %c0_216 = arith.constant 0 : index
    %637 = vector.load %arg18[%636, %c0_216] : memref<64x256xf32, #tpu.memory_space<vmem>>, vector<8x256xf32>
    %638 = arith.index_cast %635 : i32 to index
    %c0_217 = arith.constant 0 : index
    %639 = vector.load %arg19[%638, %c0_217] : memref<64x256xf32, #tpu.memory_space<vmem>>, vector<8x256xf32>
    %640 = arith.addf %637, %639 : vector<8x256xf32>
    %641 = arith.truncf %631 : vector<8x64xf32> to vector<8x64xbf16>
    %cst_218 = arith.constant dense<0.000000e+00> : vector<8x256xf32>
    %642 = tpu.matmul %641, %351, %cst_218 {dimension_numbers = #tpu.dot_dimension_numbers<[1], [0], [0], [1], [0, 0, 1, 1], [], []>} : vector<8x64xbf16>, vector<64x256xbf16>, vector<8x256xf32> -> vector<8x256xf32>
    %643 = arith.addf %640, %642 : vector<8x256xf32>
    %644 = vector.extract_strided_slice %643 {offsets = [0, 0], sizes = [8, 192], strides = [1, 1]} : vector<8x256xf32> to vector<8x192xf32>
    %645 = arith.negf %644 : vector<8x192xf32>
    %646 = math.exp %645 : vector<8x192xf32>
    %cst_219 = arith.constant 1.000000e+00 : f32
    %647 = vector.broadcast %cst_219 : f32 to vector<8x192xf32>
    %648 = arith.addf %647, %646 : vector<8x192xf32>
    %649 = arith.divf %647, %648 : vector<8x192xf32>
    %650 = vector.extract_strided_slice %643 {offsets = [0, 192], sizes = [8, 64], strides = [1, 1]} : vector<8x256xf32> to vector<8x64xf32>
    %651 = math.tanh %650 : vector<8x64xf32>
    %652 = vector.extract_strided_slice %649 {offsets = [0, 0], sizes = [8, 64], strides = [1, 1]} : vector<8x192xf32> to vector<8x64xf32>
    %653 = vector.extract_strided_slice %649 {offsets = [0, 64], sizes = [8, 64], strides = [1, 1]} : vector<8x192xf32> to vector<8x64xf32>
    %654 = vector.extract_strided_slice %649 {offsets = [0, 128], sizes = [8, 64], strides = [1, 1]} : vector<8x192xf32> to vector<8x64xf32>
    %655 = arith.mulf %653, %632 : vector<8x64xf32>
    %656 = arith.mulf %652, %651 : vector<8x64xf32>
    %657 = arith.addf %655, %656 : vector<8x64xf32>
    %658 = math.tanh %657 : vector<8x64xf32>
    %659 = arith.mulf %654, %658 : vector<8x64xf32>
    %660 = arith.index_cast %633 : i32 to index
    %c0_220 = arith.constant 0 : index
    %661 = vector.load %arg1[%660, %c0_220] : memref<64x64xf32, #tpu.memory_space<vmem>>, vector<8x64xf32>
    %662 = arith.mulf %659, %661 : vector<8x64xf32>
    %663 = vector.extract_strided_slice %662 {offsets = [0, 0], sizes = [8, 32], strides = [1, 1]} : vector<8x64xf32> to vector<8x32xf32>
    %664 = arith.index_cast %633 : i32 to index
    %c0_221 = arith.constant 0 : index
    %665 = vector.load %arg14[%664, %c0_221] : memref<64x32xf32, #tpu.memory_space<vmem>>, vector<8x32xf32>
    tpu.vector_store %arg14[%664, %c0_221], %663 {strides = array<i32>} : memref<64x32xf32, #tpu.memory_space<vmem>>, vector<8x32xf32>,
    %666 = vector.extract_strided_slice %662 {offsets = [0, 32], sizes = [8, 32], strides = [1, 1]} : vector<8x64xf32> to vector<8x32xf32>
    %667 = arith.index_cast %635 : i32 to index
    %c0_222 = arith.constant 0 : index
    %668 = vector.load %arg15[%667, %c0_222] : memref<64x32xf32, #tpu.memory_space<vmem>>, vector<8x32xf32>
    tpu.vector_store %arg15[%667, %c0_222], %666 {strides = array<i32>} : memref<64x32xf32, #tpu.memory_space<vmem>>, vector<8x32xf32>,
    %cst_223 = arith.constant 0.000000e+00 : f32
    %669 = vector.broadcast %cst_223 : f32 to vector<8x64xf32>
    %670 = arith.cmpf ogt, %661, %669 : vector<8x64xf32>
    %671 = arith.select %670, %659, %631 : vector<8x64xi1>, vector<8x64xf32>
    %672 = arith.select %670, %657, %632 : vector<8x64xi1>, vector<8x64xf32>
    %c8_i32_224 = arith.constant 8 : i32
    %c0_225 = arith.constant 0 : index
    %c0_226 = arith.constant 0 : index
    %673 = vector.load %arg12[%c0_225, %c0_226] : memref<64x32xbf16, #tpu.memory_space<vmem>>, vector<64x32xbf16>
    %c0_227 = arith.constant 0 : index
    %c0_228 = arith.constant 0 : index
    %674 = vector.load %arg13[%c0_227, %c0_228] : memref<1x32xf32, #tpu.memory_space<vmem>>, vector<1x32xf32>
    %675 = arith.truncf %671 : vector<8x64xf32> to vector<8x64xbf16>
    %cst_229 = arith.constant dense<0.000000e+00> : vector<8x32xf32>
    %676 = tpu.matmul %675, %673, %cst_229 {dimension_numbers = #tpu.dot_dimension_numbers<[1], [0], [0], [1], [0, 0, 1, 1], [], []>} : vector<8x64xbf16>, vector<64x32xbf16>, vector<8x32xf32> -> vector<8x32xf32>
    %677 = vector.broadcast %674 : vector<1x32xf32> to vector<8x32xf32>
    %678 = arith.addf %676, %677 : vector<8x32xf32>
    %679 = math.tanh %678 : vector<8x32xf32>
    %c0_230 = arith.constant 0 : index
    %c0_231 = arith.constant 0 : index
    %680 = vector.load %arg16[%c0_230, %c0_231] : memref<8x32xf32, #tpu.memory_space<vmem>>, vector<8x32xf32>
    tpu.vector_store %arg16[%c0_230, %c0_231], %679 {strides = array<i32>} : memref<8x32xf32, #tpu.memory_space<vmem>>, vector<8x32xf32>,
    %681 = arith.truncf %672 : vector<8x64xf32> to vector<8x64xbf16>
    %cst_232 = arith.constant dense<0.000000e+00> : vector<8x32xf32>
    %682 = tpu.matmul %681, %673, %cst_232 {dimension_numbers = #tpu.dot_dimension_numbers<[1], [0], [0], [1], [0, 0, 1, 1], [], []>} : vector<8x64xbf16>, vector<64x32xbf16>, vector<8x32xf32> -> vector<8x32xf32>
    %683 = vector.broadcast %674 : vector<1x32xf32> to vector<8x32xf32>
    %684 = arith.addf %682, %683 : vector<8x32xf32>
    %685 = math.tanh %684 : vector<8x32xf32>
    %c0_233 = arith.constant 0 : index
    %c0_234 = arith.constant 0 : index
    %686 = vector.load %arg17[%c0_233, %c0_234] : memref<8x32xf32, #tpu.memory_space<vmem>>, vector<8x32xf32>
    tpu.vector_store %arg17[%c0_233, %c0_234], %685 {strides = array<i32>} : memref<8x32xf32, #tpu.memory_space<vmem>>, vector<8x32xf32>,
    return
  }
}

</mosaic_0001>

<bundles_post_ra>
// kernel: encoder_pack_forward.1
= control target key start
LH: loop header
LB: loop body
LE: loop exit
PB: predicated region body
PF: predicated region fallthrough
CT: control target
= control target key end

     0   :  { %s4063_s0 = inlined_call_operand.vmem [shape: bf16[64,16], index: 0, kind: input, shape index: {}]   ;;  %s4064_s1 = inlined_call_operand.vmem [shape: f32[64,64], index: 1, kind: input, shape index: {}]   ;;  %s4065_s2 = inlined_call_operand.vmem [shape: bf16[16,256], index: 2, kind: input, shape index: {}]   ;;  %s4066_s3 = inlined_call_operand.vmem [shape: bf16[16,256], index: 3, kind: input, shape index: {}]   ;;  %s4067_s4 = inlined_call_operand.vmem [shape: bf16[64,256], index: 4, kind: input, shape index: {}]   ;;  %s4068_s5 = inlined_call_operand.vmem [shape: f32[1,256], index: 5, kind: input, shape index: {}]   ;;  %s4069_s6 = inlined_call_operand.vmem [shape: bf16[32,256], index: 6, kind: input, shape index: {}]   ;;  %s4070_s7 = inlined_call_operand.vmem [shape: bf16[32,256], index: 7, kind: input, shape index: {}]   ;;  %s4071_s8 = inlined_call_operand.vmem [shape: bf16[32,256], index: 8, kind: input, shape index: {}]   ;;  %s4072_s9 = inlined_call_operand.vmem [shape: bf16[32,256], index: 9, kind: input, shape index: {}]   ;;  %s4073_s10 = inlined_call_operand.vmem [shape: bf16[64,256], index: 10, kind: input, shape index: {}]   ;;  %s4074_s11 = inlined_call_operand.vmem [shape: f32[1,256], index: 11, kind: input, shape index: {}]   ;;  %s4075_s12 = inlined_call_operand.vmem [shape: bf16[64,32], index: 12, kind: input, shape index: {}]   ;;  %s4076_s13 = inlined_call_operand.vmem [shape: f32[1,32], index: 13, kind: input, shape index: {}]   ;;  %s4077_s14 = inlined_call_operand.vmem [shape: f32[64,32], index: 14, kind: output, shape index: {0}]   ;;  %s4078_s15 = inlined_call_operand.vmem [shape: f32[64,32], index: 15, kind: output, shape index: {1}]   ;;  %s4079_s16 = inlined_call_operand.hbm [shape: f32[8,32], index: 16, kind: output, shape index: {2}]   ;;  %s4080_s17 = inlined_call_operand.hbm [shape: f32[8,32], index: 17, kind: output, shape index: {3}]  }
   0x1   :  { %4083 = sst [smem:[#allocation12_spill]] %s4063_s0 }
   0x2   :  { %4084 = sst [smem:[#allocation13_spill]] %s4064_s1 }
   0x3   :  { %23 = vsyncpa [#allocation7], 0  ;;  %v2872_v0 = vld [vmem:[%s4065_s2 + $0x4] ss:$8 sps:$4 sm:$0xff]   ;;  %v3178_v2 = vmov 0   ;;  %s4085_s1 = sld [smem:[#allocation12_spill]] }
   0x4   :  { %v2874_v1 = vld [vmem:[%s4066_s3 + $0x4] ss:$8 sps:$4 sm:$0xff]   ;;  %151 = vmatprep.mubr.bf16.mxu0 %v3178_v2  ;;  %236 = vmatprep.mubr.bf16.mxu1 %v3178_v2  ;;  %v2876_v3 = vld [vmem:[%s4065_s2] ss:$8 sps:$4 sm:$0xff]   ;;  %vm106_vm0 = vcmask 130048  }
   0x5   :  { %119 = vmatprep.subr.bf16.mxu0 %v2872_v0  ;;  %v2877_v4 = vld [vmem:[%s4066_s3] ss:$8 sps:$4 sm:$0xff]   ;;  %204 = vmatprep.subr.bf16.mxu1 %v2874_v1  ;;  %v3295_v6 = vld [vmem:[%s4067_s4 + $0x4] ss:$8 sps:$4 sm:$0xff]   ;;  %v3306_v8 = vld [vmem:[%s4067_s4 + $0x14] ss:$8 sps:$4 sm:$0xff]  }
   0x6   :  { %120 = vmatpush1.bf16.msra.mxu0 %v2876_v3  ;;  %205 = vmatpush1.bf16.msra.mxu1 %v2877_v4  ;;  %v3300_v7 = vld [vmem:[%s4067_s4] ss:$8 sps:$4 sm:$0xff]   ;;  %v3316_v9 = vld [vmem:[%s4067_s4 + $0x10] ss:$8 sps:$4 sm:$0xff]   ;;  %v3323_v10 = vld [vmem:[%s4067_s4 + $0x24] ss:$8 sps:$4 sm:$0xff]  }
   0x7   :  { %367 = vmatprep.subr.bf16.mxu0 %v3295_v6  ;;  %466 = vmatprep.subr.bf16.mxu1 %v3295_v6  ;;  %v3332_v12 = vld [vmem:[%s4067_s4 + $0x20] ss:$8 sps:$4 sm:$0xff]   ;;  %v3339_v13 = vld [vmem:[%s4067_s4 + $0x34] ss:$8 sps:$4 sm:$0xff]   ;;  %v3348_v14 = vld [vmem:[%s4067_s4 + $0x30] ss:$8 sps:$4 sm:$0xff]  }
   0x9   :  { %v2878_v5 = vld [vmem:[%s4085_s1] sm:$0xff]   ;;  %v2882_v11 = vld [vmem:[%s4085_s1 + $0x8] sm:$0xff]   ;;  %v2886_v15 = vld [vmem:[%s4085_s1 + $0x10] sm:$0xff]  }
   0xa   :  { %2688 = vmatmul.mubr.msk.bf16.vlgmr.msra.gmra.mrb[0].mxu0 %vm106_vm0, %v2878_v5  ;;  %2694 = vmatmul.mubr.msk.bf16.vlgmr.msra.gmra.mrb[0].mxu1 %vm106_vm0, %v2878_v5 }
   0xb   :  { %368 = vmatpush1.bf16.msra.mxu0 %v3300_v7  ;;  %161 = vmatprep.mubr.bf16.mxu0 %v3178_v2 }
   0xc   :  { %246 = vmatprep.mubr.bf16.mxu1 %v3178_v2  ;;  %369 = vmatprep.subr.bf16.mxu0 %v3306_v8 }
   0xd   :  { %467 = vmatpush1.bf16.msra.mxu1 %v3300_v7 }
   0xe   :  { %468 = vmatprep.subr.bf16.mxu1 %v3306_v8 }
   0xf   :  { %370 = vmatpush1.bf16.msra.mxu0 %v3316_v9 }
  0x10   :  { %371 = vmatprep.subr.bf16.mxu0 %v3323_v10 }
  0x11   :  { %469 = vmatpush1.bf16.msra.mxu1 %v3316_v9 }
  0x12   :  { %2689 = vmatmul.mubr.msk.bf16.gmra.mrb[4].mxu0 %vm106_vm0, %v2882_v11  ;;  %2695 = vmatmul.mubr.msk.bf16.gmra.mrb[4].mxu1 %vm106_vm0, %v2882_v11 }
  0x13   :  { %171 = vmatprep.mubr.bf16.mxu0 %v3178_v2  ;;  %256 = vmatprep.mubr.bf16.mxu1 %v3178_v2 }
  0x14   :  { %372 = vmatpush1.bf16.msra.mxu0 %v3332_v12  ;;  %470 = vmatprep.subr.bf16.mxu1 %v3323_v10 }
  0x15   :  { %373 = vmatprep.subr.bf16.mxu0 %v3339_v13  ;;  %471 = vmatpush1.bf16.msra.mxu1 %v3332_v12 }
  0x16   :  { %472 = vmatprep.subr.bf16.mxu1 %v3339_v13 }
  0x18   :  { %374 = vmatpush1.bf16.msra.mxu0 %v3348_v14 }
  0x19   :  { %473 = vmatpush1.bf16.msra.mxu1 %v3348_v14  ;;  %568 = vmatprep.subr.bf16.mxu0 %v3295_v6 }
  0x1a   :  { %2690 = vmatmul.mubr.msk.bf16.gmra.mrb[8].mxu0 %vm106_vm0, %v2886_v15  ;;  %2696 = vmatmul.mubr.msk.bf16.gmra.mrb[8].mxu1 %vm106_vm0, %v2886_v15 }
  0x1b   :  { %24 = vsyncpa [#allocation9], 0  ;;  %181 = vmatprep.mubr.bf16.mxu0 %v3178_v2  ;;  %266 = vmatprep.mubr.bf16.mxu1 %v3178_v2  ;;  %v2890_v16 = vld [vmem:[%s4085_s1 + $0x18] sm:$0xff]   ;;  %v66_v17 = vlaneseq  ;;  %v64_v20 = vld [vmem:[%s4068_s5] sm:$0x3]  ;;  %s3179_s5 = smov 64  }
  0x1c   :  { %670 = vmatprep.subr.bf16.mxu1 %v3295_v6  ;;  %s4086_s26 = sld [smem:[#allocation13_spill]]  ;;  %vm442_vm2 = vcmask 261120   ;;  %vm363_vm3 = vcmask 523264   ;;  %s3180_s2 = smov 96  }
  0x1d   :  { %v3385_v18 = vshrl.u32 %v66_v17, 7  ;;  %s3183_s24 = smov [#allocation8]  }
  0x1e   :  { %s2666_s25 = sshll.u32 %s3183_s24, 4  ;;  %s2667_s25 = int_to_ptr.vmem [resolvable:$true] %s2666_s25 }
  0x1f   :  { %v68_v19 = vsub.s32 0, %v3385_v18  ;;  %v72_v21 = vsub.s32 1, %v3385_v18  ;;  %p3135_p1 = scmp.lt.s32.totalorder %s2667_s25, %s2667_s25 }
  0x21   :  { %v69_v24 = vrot.slane %v64_v20, %v68_v19  ;;  %v73_v27 = vrot.slane %v64_v20, %v72_v21 }
  0x22   :  { %2691 = vmatmul.mubr.msk.bf16.gmra.mrb[12].mxu0 %vm106_vm0, %v2890_v16  ;;  %2697 = vmatmul.mubr.msk.bf16.gmra.mrb[12].mxu1 %vm106_vm0, %v2890_v16 }
  0x23   :  { %399 = vmatprep.mubr.bf16.mxu0 %v3178_v2  ;;  %498 = vmatprep.mubr.bf16.mxu1 %v3178_v2 }
  0x2a   :  { %400 = vmatmul.mubr.bf16.vlgmr.msra.gmra.mrb[16].mxu0 %v3178_v2 }
  0x2b   :  { %569 = vmatpush1.bf16.msra.mxu0 %v3300_v7  ;;  %600 = vmatprep.mubr.bf16.mxu0 %v3178_v2 }
  0x2c   :  { %570 = vmatprep.subr.bf16.mxu0 %v3306_v8 }
  0x2f   :  { %571 = vmatpush1.bf16.msra.mxu0 %v3316_v9 }
  0x30   :  { %572 = vmatprep.subr.bf16.mxu0 %v3323_v10 }
  0x33   :  { %573 = vmatpush1.bf16.msra.mxu0 %v3332_v12 }
  0x34   :  { %574 = vmatprep.subr.bf16.mxu0 %v3339_v13 }
  0x37   :  { %575 = vmatpush1.bf16.msra.mxu0 %v3348_v14 }
  0x38   :  { %772 = vmatprep.subr.bf16.mxu0 %v3295_v6 }
  0xdd   :  { %v153_v22 = vpop.f32.mrb[0].mxu0  ;;  %v3392_v23 = vpop.f32.mrb[0].mxu1 }
  0xde   :  { %v155_v25 = vpop.f32.mrb[1].mxu0  ;;  %v240_v26 = vpop.f32.mrb[1].mxu1  ;;  %v154_v5 = vadd.f32 %v153_v22, %v69_v24 }
  0xdf   :  { %v157_v28 = vpop.f32.mrb[2].mxu0  ;;  %v242_v29 = vpop.f32.mrb[2].mxu1  ;;  %v156_v20 = vadd.f32 %v155_v25, %v73_v27 }
  0xe0   :  { %v158_v30 = vadd.f32 %v157_v28, %v69_v24  ;;  %v159_v31 = vpop.f32.mrb[3].mxu0  ;;  %v244_v32 = vpop.f32.mrb[3].mxu1 }
  0xe1   :  { %v160_v33 = vadd.f32 %v159_v31, %v73_v27 }
  0xe5   :  { %v163_v34 = vpop.f32.mrb[4].mxu0  ;;  %v248_v35 = vpop.f32.mrb[4].mxu1 }
  0xe6   :  { %v164_v36 = vadd.f32 %v163_v34, %v69_v24  ;;  %v165_v37 = vpop.f32.mrb[5].mxu0  ;;  %v250_v38 = vpop.f32.mrb[5].mxu1 }
  0xe7   :  { %v166_v39 = vadd.f32 %v165_v37, %v73_v27  ;;  %v167_v40 = vpop.f32.mrb[6].mxu0  ;;  %v252_v41 = vpop.f32.mrb[6].mxu1 }
  0xe8   :  { %v168_v42 = vadd.f32 %v167_v40, %v69_v24  ;;  %v169_v43 = vpop.f32.mrb[7].mxu0  ;;  %v254_v44 = vpop.f32.mrb[7].mxu1 }
  0xe9   :  { %v170_v45 = vadd.f32 %v169_v43, %v73_v27 }
  0xed   :  { %v173_v46 = vpop.f32.mrb[8].mxu0  ;;  %v258_v47 = vpop.f32.mrb[8].mxu1 }
  0xee   :  { %v174_v48 = vadd.f32 %v173_v46, %v69_v24  ;;  %v3398_v49 = vadd.f32 %v258_v47, %v168_v42  ;;  %v175_v50 = vpop.f32.mrb[9].mxu0  ;;  %v260_v51 = vpop.f32.mrb[9].mxu1 }
  0xef   :  { %v176_v52 = vadd.f32 %v175_v50, %v73_v27  ;;  %v3400_v53 = vadd.f32 %v260_v51, %v170_v45  ;;  %v177_v54 = vpop.f32.mrb[10].mxu0  ;;  %v262_v55 = vpop.f32.mrb[10].mxu1 }
  0xf0   :  { %v178_v56 = vadd.f32 %v177_v54, %v69_v24  ;;  %v3402_v57 = vadd.f32 %v262_v55, %v164_v36  ;;  %v179_v58 = vpop.f32.mrb[11].mxu0  ;;  %v264_v59 = vpop.f32.mrb[11].mxu1  ;;  %v3404_v60 = vadd.f32 %v252_v41, %v174_v48 }
  0xf1   :  { %v180_v61 = vadd.f32 %v179_v58, %v73_v27  ;;  %v3406_v62 = vadd.f32 %v264_v59, %v166_v39  ;;  %v3408_v63 = vadd.f32 %v254_v44, %v176_v52  ;;  %v440_v59 = vld [vmem:[%s4086_s26] sm:$0xff] }
  0xf2   :  { %v3410_v0 = vadd.f32 %v248_v35, %v178_v56  ;;  %vm449_vm1 = vcmp.gt.f32.partialorder %v440_v59, 0.0 }
  0xf3   :  { %v3412_v1 = vadd.f32 %v250_v38, %v180_v61 }
  0xf5   :  { %v183_v3 = vpop.f32.mrb[12].mxu0  ;;  %v268_v4 = vpop.f32.mrb[12].mxu1 }
  0xf6   :  { %v184_v11 = vadd.f32 %v183_v3, %v69_v24  ;;  %v3414_v15 = vadd.f32 %v268_v4, %v158_v30  ;;  %v185_v16 = vpop.f32.mrb[13].mxu0  ;;  %v270_v17 = vpop.f32.mrb[13].mxu1 }
  0xf7   :  { %v186_v28 = vadd.f32 %v185_v16, %v73_v27  ;;  %v3416_v31 = vadd.f32 %v270_v17, %v160_v33  ;;  %v187_v34 = vpop.f32.mrb[14].mxu0  ;;  %v272_v36 = vpop.f32.mrb[14].mxu1 }
  0xf8   :  { %v188_v37 = vadd.f32 %v187_v34, %v69_v24  ;;  %v321_v39 = vadd.f32 %v272_v36, %v154_v5  ;;  %v189_v35 = vpop.f32.mrb[15].mxu0  ;;  %v274_v40 = vpop.f32.mrb[15].mxu1  ;;  %v3418_v38 = vadd.f32 %v242_v29, %v184_v11 }
  0xf9   :  { %v190_v41 = vadd.f32 %v189_v35, %v73_v27  ;;  %v322_v42 = vadd.f32 %v274_v40, %v156_v20  ;;  %v3420_v22 = vadd.f32 %v244_v32, %v186_v28 }
  0xfa   :  { %v3423_v30 = vadd.f32 %v3392_v23, %v188_v37 }
  0xfb   :  { %v3425_v43 = vadd.f32 %v240_v26, %v190_v41 }
  0xfd   :  { %v401_v25 = vpop.f32.mrb[16].mxu0 }
  0xfe   :  { %v408_v33 = vadd.f32 %v401_v25, %v321_v39  ;;  %v403_v44 = vpop.f32.mrb[17].mxu0 }
  0xff   :  { %v409_v45 = vadd.f32 %v403_v44, %v322_v42  ;;  %v405_v46 = vpop.f32.mrb[18].mxu0 }
 0x100   :  { %v406_v24 = vpop.f32.mrb[19].mxu0  ;;  %v2706_v27 = vmul.f32 -1.442695, %v408_v33 }
 0x101   :  { %2934 = vtanh.f32 %v409_v45  ;;  %v2707_v55 = vmul.f32 -1.442695, %v409_v45 }
 0x102   :  { %2936 = vpow2.f32 %v2706_v27 }
 0x10b   :  { %v2935_v47 = vpop.eup %2934 }
 0x10c   :  { %425 = vrot.lane.b32.xlu0 %v2935_v47, %s3179_s5  ;;  %v2937_v29 = vpop.eup %2936 }
 0x10d   :  { %v416_v32 = vadd.f32 1.0, %v2937_v29 }
 0x10f   :  { %2938 = vrcp.f32 %v416_v32  ;;  %v543_v32 = vld [vmem:[%s4086_s26 + $0x8] sm:$0xff] }
 0x110   :  { %vm551_vm4 = vcmp.gt.f32.partialorder %v543_v32, 0.0 }
 0x119   :  { %v2939_v23 = vpop.eup %2938 }
 0x11a   :  { %v423_v50 = vmul.f32 0.0, %v2939_v23 }
 0x17e   :  { %v426_v48 = vpop.permute.xlu0 %425 }
 0x17f   :  { %v428_v26 = vmul.f32 %v2939_v23, %v426_v48 }
 0x181   :  { %430 = vrot.lane.b32.xlu0 %v428_v26, %s3179_s5 }
 0x1f3   :  { %v431_v51 = vpop.permute.xlu0 %430 }
 0x1f4   :  { %v433_v52 = vadd.f32 %v431_v51, %v423_v50 }
 0x1f6   :  { %2940 = vtanh.f32 %v433_v52 }
 0x1f7   :  { %2942 = vpow2.f32 %v2707_v55 }
 0x200   :  { %v2941_v54 = vpop.eup %2940 }
 0x201   :  { %436 = vrot.lane.b32.xlu1 %v2941_v54, %s3179_s5  ;;  %v2943_v56 = vpop.eup %2942 }
 0x202   :  { %v417_v58 = vadd.f32 1.0, %v2943_v56 }
 0x204   :  { %2944 = vrcp.f32 %v417_v58 }
 0x205   :  { %452 = vrot.lane.b32.xlu1 %v433_v52, %s3179_s5 }
 0x20e   :  { %v2945_v61 = vpop.eup %2944 }
 0x273   :  { %v437_v3 = vpop.permute.xlu1 %436 }
 0x274   :  { %v439_v4 = vmul.f32 %v2945_v61, %v437_v3 }
 0x276   :  { %v3434_v5 = vmul.f32 %v440_v59, %v439_v4  ;;  %v450_v11 = vsel %vm449_vm1, %v439_v4, 0.0 }
 0x277   :  { %v462_v16 = vpack.c.bf16 %v450_v11, %v450_v11  ;;  %v453_v17 = vpop.permute.xlu1 %452 }
 0x278   :  { %443 = vst.msk [vmem:[#allocation4] sm:$0xff] %vm442_vm2, %v3434_v5  ;;  %v455_v20 = vsel %vm449_vm1, %v453_v17, 0.0  ;;  %vm3182_vm1 = vmmov 0  }
 0x279   :  { %2708 = vmatmul.mubr.msk.bf16.vlgmr.msra.gmra.mrb[16].mxu1 %vm363_vm3, %v462_v16  ;;  %523 = vrot.lane.b32.xlu1 %v455_v20, %s3179_s5 }
 0x27a   :  { %671 = vmatpush1.bf16.msra.mxu1 %v3300_v7  ;;  %702 = vmatprep.mubr.bf16.mxu1 %v3178_v2 }
 0x27b   :  { %672 = vmatprep.subr.bf16.mxu1 %v3306_v8 }
 0x27e   :  { %673 = vmatpush1.bf16.msra.mxu1 %v3316_v9 }
 0x27f   :  { %674 = vmatprep.subr.bf16.mxu1 %v3323_v10 }
 0x282   :  { %675 = vmatpush1.bf16.msra.mxu1 %v3332_v12 }
 0x283   :  { %676 = vmatprep.subr.bf16.mxu1 %v3339_v13 }
 0x286   :  { %677 = vmatpush1.bf16.msra.mxu1 %v3348_v14 }
 0x287   :  { %874 = vmatprep.subr.bf16.mxu1 %v3295_v6 }
 0x34c   :  { %v500_v28 = vpop.f32.mrb[16].mxu1 }
 0x34d   :  { %v507_v34 = vadd.f32 %v500_v28, %v3414_v15  ;;  %v502_v36 = vpop.f32.mrb[17].mxu1  ;;  %v524_v15 = vpop.permute.xlu1 %523 }
 0x34e   :  { %v508_v37 = vadd.f32 %v502_v36, %v3416_v31  ;;  %v504_v39 = vpop.f32.mrb[18].mxu1 }
 0x34f   :  { %v505_v35 = vpop.f32.mrb[19].mxu1  ;;  %v2709_v41 = vmul.f32 -1.442695, %v507_v34 }
 0x350   :  { %2946 = vtanh.f32 %v508_v37  ;;  %v2710_v27 = vmul.f32 -1.442695, %v508_v37 }
 0x351   :  { %2948 = vpow2.f32 %v2709_v41 }
 0x35a   :  { %v2947_v40 = vpop.eup %2946 }
 0x35b   :  { %528 = vrot.lane.b32.xlu0 %v2947_v40, %s3179_s5  ;;  %v2949_v42 = vpop.eup %2948 }
 0x35c   :  { %v515_v25 = vadd.f32 1.0, %v2949_v42 }
 0x35e   :  { %2950 = vrcp.f32 %v515_v25  ;;  %v645_v25 = vld [vmem:[%s4086_s26 + $0x10] sm:$0xff] }
 0x35f   :  { %vm653_vm5 = vcmp.gt.f32.partialorder %v645_v25, 0.0 }
 0x368   :  { %v2951_v33 = vpop.eup %2950 }
 0x369   :  { %v526_v46 = vmul.f32 %v2951_v33, %v524_v15 }
 0x3cd   :  { %v529_v44 = vpop.permute.xlu0 %528 }
 0x3ce   :  { %v531_v45 = vmul.f32 %v2951_v33, %v529_v44 }
 0x3d0   :  { %533 = vrot.lane.b32.xlu0 %v531_v45, %s3179_s5 }
 0x442   :  { %v534_v24 = vpop.permute.xlu0 %533 }
 0x443   :  { %v536_v31 = vadd.f32 %v534_v24, %v526_v46 }
 0x445   :  { %2952 = vtanh.f32 %v536_v31  ;;  %554 = vrot.lane.b32.xlu0 %v536_v31, %s3179_s5 }
 0x446   :  { %2954 = vpow2.f32 %v2710_v27 }
 0x44f   :  { %v2953_v47 = vpop.eup %2952 }
 0x450   :  { %539 = vrot.lane.b32.xlu1 %v2953_v47, %s3179_s5  ;;  %v2955_v29 = vpop.eup %2954 }
 0x451   :  { %v516_v23 = vadd.f32 1.0, %v2955_v29 }
 0x453   :  { %2956 = vrcp.f32 %v516_v23 }
 0x45d   :  { %v2957_v50 = vpop.eup %2956 }
 0x4b7   :  { %v555_v48 = vpop.permute.xlu0 %554 }
 0x4b8   :  { %v557_v26 = vsel %vm551_vm4, %v555_v48, %v455_v20 }
 0x4b9   :  { %625 = vrot.lane.b32.xlu0 %v557_v26, %s3179_s5 }
 0x4c2   :  { %v540_v51 = vpop.permute.xlu1 %539 }
 0x4c3   :  { %v542_v52 = vmul.f32 %v2957_v50, %v540_v51 }
 0x4c5   :  { %v3459_v54 = vmul.f32 %v543_v32, %v542_v52  ;;  %v552_v55 = vsel %vm551_vm4, %v542_v52, %v450_v11 }
 0x4c6   :  { %v564_v56 = vpack.c.bf16 %v552_v55, %v552_v55 }
 0x4c7   :  { %545 = vst.msk [vmem:[#allocation4 + $0x8] sm:$0xff] %vm442_vm2, %v3459_v54 }
 0x4c8   :  { %2711 = vmatmul.mubr.msk.bf16.vlgmr.msra.gmra.mrb[20].mxu0 %vm363_vm3, %v564_v56 }
 0x4c9   :  { %773 = vmatpush1.bf16.msra.mxu0 %v3300_v7  ;;  %804 = vmatprep.mubr.bf16.mxu0 %v3178_v2 }
 0x4ca   :  { %774 = vmatprep.subr.bf16.mxu0 %v3306_v8 }
 0x4cd   :  { %775 = vmatpush1.bf16.msra.mxu0 %v3316_v9 }
 0x4ce   :  { %776 = vmatprep.subr.bf16.mxu0 %v3323_v10 }
 0x4d1   :  { %777 = vmatpush1.bf16.msra.mxu0 %v3332_v12 }
 0x4d2   :  { %778 = vmatprep.subr.bf16.mxu0 %v3339_v13 }
 0x4d5   :  { %779 = vmatpush1.bf16.msra.mxu0 %v3348_v14 }
 0x4d6   :  { %976 = vmatprep.subr.bf16.mxu0 %v3295_v6 }
 0x59b   :  { %v602_v58 = vpop.f32.mrb[20].mxu0 }
 0x59c   :  { %v609_v59 = vadd.f32 %v602_v58, %v3402_v57  ;;  %v604_v61 = vpop.f32.mrb[21].mxu0  ;;  %v626_v57 = vpop.permute.xlu0 %625 }
 0x59d   :  { %v610_v3 = vadd.f32 %v604_v61, %v3406_v62  ;;  %v606_v4 = vpop.f32.mrb[22].mxu0 }
 0x59e   :  { %v607_v11 = vpop.f32.mrb[23].mxu0  ;;  %v2712_v17 = vmul.f32 -1.442695, %v609_v59 }
 0x59f   :  { %2958 = vtanh.f32 %v610_v3  ;;  %v2713_v41 = vmul.f32 -1.442695, %v610_v3 }
 0x5a0   :  { %2960 = vpow2.f32 %v2712_v17  ;;  %v747_v17 = vld [vmem:[%s4086_s26 + $0x18] sm:$0xff] }
 0x5a1   :  { %vm755_vm6 = vcmp.gt.f32.partialorder %v747_v17, 0.0 }
 0x5a9   :  { %v2959_v16 = vpop.eup %2958 }
 0x5aa   :  { %630 = vrot.lane.b32.xlu1 %v2959_v16, %s3179_s5  ;;  %v2961_v20 = vpop.eup %2960 }
 0x5ab   :  { %v617_v28 = vadd.f32 1.0, %v2961_v20 }
 0x5ad   :  { %2962 = vrcp.f32 %v617_v28 }
 0x5b7   :  { %v2963_v34 = vpop.eup %2962 }
 0x5b8   :  { %v628_v39 = vmul.f32 %v2963_v34, %v626_v57 }
 0x61c   :  { %v631_v36 = vpop.permute.xlu1 %630 }
 0x61d   :  { %v633_v37 = vmul.f32 %v2963_v34, %v631_v36 }
 0x61f   :  { %635 = vrot.lane.b32.xlu1 %v633_v37, %s3179_s5 }
 0x691   :  { %v636_v35 = vpop.permute.xlu1 %635 }
 0x692   :  { %v638_v62 = vadd.f32 %v636_v35, %v628_v39 }
 0x694   :  { %2964 = vtanh.f32 %v638_v62  ;;  %656 = vrot.lane.b32.xlu1 %v638_v62, %s3179_s5 }
 0x695   :  { %2966 = vpow2.f32 %v2713_v41 }
 0x69e   :  { %v2965_v40 = vpop.eup %2964 }
 0x69f   :  { %641 = vrot.lane.b32.xlu0 %v2965_v40, %s3179_s5  ;;  %v2967_v42 = vpop.eup %2966 }
 0x6a0   :  { %v618_v33 = vadd.f32 1.0, %v2967_v42 }
 0x6a2   :  { %2968 = vrcp.f32 %v618_v33 }
 0x6ac   :  { %v2969_v15 = vpop.eup %2968 }
 0x706   :  { %v657_v44 = vpop.permute.xlu1 %656 }
 0x707   :  { %v659_v45 = vsel %vm653_vm5, %v657_v44, %v557_v26 }
 0x708   :  { %727 = vrot.lane.b32.xlu1 %v659_v45, %s3179_s5 }
 0x711   :  { %v642_v46 = vpop.permute.xlu0 %641 }
 0x712   :  { %v644_v24 = vmul.f32 %v2969_v15, %v642_v46 }
 0x714   :  { %v3483_v31 = vmul.f32 %v645_v25, %v644_v24  ;;  %v654_v47 = vsel %vm653_vm5, %v644_v24, %v552_v55 }
 0x715   :  { %v666_v27 = vpack.c.bf16 %v654_v47, %v654_v47 }
 0x716   :  { %647 = vst.msk [vmem:[#allocation4 + $0x10] sm:$0xff] %vm442_vm2, %v3483_v31 }
 0x717   :  { %2714 = vmatmul.mubr.msk.bf16.vlgmr.msra.gmra.mrb[20].mxu1 %vm363_vm3, %v666_v27 }
 0x718   :  { %875 = vmatpush1.bf16.msra.mxu1 %v3300_v7  ;;  %906 = vmatprep.mubr.bf16.mxu1 %v3178_v2 }
 0x719   :  { %876 = vmatprep.subr.bf16.mxu1 %v3306_v8 }
 0x71c   :  { %877 = vmatpush1.bf16.msra.mxu1 %v3316_v9 }
 0x71d   :  { %878 = vmatprep.subr.bf16.mxu1 %v3323_v10 }
 0x720   :  { %879 = vmatpush1.bf16.msra.mxu1 %v3332_v12 }
 0x721   :  { %880 = vmatprep.subr.bf16.mxu1 %v3339_v13 }
 0x724   :  { %881 = vmatpush1.bf16.msra.mxu1 %v3348_v14 }
 0x725   :  { %1078 = vmatprep.subr.bf16.mxu1 %v3295_v6 }
 0x7ea   :  { %v704_v29 = vpop.f32.mrb[20].mxu1 }
 0x7eb   :  { %v711_v32 = vadd.f32 %v704_v29, %v3398_v49  ;;  %v706_v23 = vpop.f32.mrb[21].mxu1  ;;  %v728_v49 = vpop.permute.xlu1 %727 }
 0x7ec   :  { %v712_v48 = vadd.f32 %v706_v23, %v3400_v53  ;;  %v708_v26 = vpop.f32.mrb[22].mxu1 }
 0x7ed   :  { %v709_v50 = vpop.f32.mrb[23].mxu1  ;;  %v2715_v52 = vmul.f32 -1.442695, %v711_v32 }
 0x7ee   :  { %2970 = vtanh.f32 %v712_v48  ;;  %v2716_v11 = vmul.f32 -1.442695, %v712_v48 }
 0x7ef   :  { %2972 = vpow2.f32 %v2715_v52 }
 0x7f8   :  { %v2971_v51 = vpop.eup %2970 }
 0x7f9   :  { %732 = vrot.lane.b32.xlu0 %v2971_v51, %s3179_s5  ;;  %v2973_v55 = vpop.eup %2972  ;;  %v849_v51 = vld [vmem:[%s4086_s26 + $0x20] sm:$0xff] }
 0x7fa   :  { %v719_v56 = vadd.f32 1.0, %v2973_v55  ;;  %vm857_vm7 = vcmp.gt.f32.partialorder %v849_v51, 0.0 }
 0x7fc   :  { %2974 = vrcp.f32 %v719_v56 }
 0x806   :  { %v2975_v58 = vpop.eup %2974 }
 0x807   :  { %v730_v61 = vmul.f32 %v2975_v58, %v728_v49 }
 0x86b   :  { %v733_v59 = vpop.permute.xlu0 %732 }
 0x86c   :  { %v735_v6 = vmul.f32 %v2975_v58, %v733_v59 }
 0x86e   :  { %737 = vrot.lane.b32.xlu0 %v735_v6, %s3179_s5 }
 0x8e0   :  { %v738_v3 = vpop.permute.xlu0 %737 }
 0x8e1   :  { %v740_v53 = vadd.f32 %v738_v3, %v730_v61 }
 0x8e3   :  { %2976 = vtanh.f32 %v740_v53  ;;  %758 = vrot.lane.b32.xlu0 %v740_v53, %s3179_s5 }
 0x8e4   :  { %2978 = vpow2.f32 %v2716_v11 }
 0x8ed   :  { %v2977_v4 = vpop.eup %2976 }
 0x8ee   :  { %743 = vrot.lane.b32.xlu1 %v2977_v4, %s3179_s5  ;;  %v2979_v16 = vpop.eup %2978 }
 0x8ef   :  { %v720_v20 = vadd.f32 1.0, %v2979_v16 }
 0x8f1   :  { %2980 = vrcp.f32 %v720_v20 }
 0x8fb   :  { %v2981_v36 = vpop.eup %2980 }
 0x955   :  { %v759_v28 = vpop.permute.xlu0 %758 }
 0x956   :  { %v761_v34 = vsel %vm755_vm6, %v759_v28, %v659_v45 }
 0x957   :  { %829 = vrot.lane.b32.xlu0 %v761_v34, %s3179_s5 }
 0x960   :  { %v744_v37 = vpop.permute.xlu1 %743 }
 0x961   :  { %v746_v57 = vmul.f32 %v2981_v36, %v744_v37 }
 0x963   :  { %v3507_v39 = vmul.f32 %v747_v17, %v746_v57  ;;  %v756_v35 = vsel %vm755_vm6, %v746_v57, %v654_v47 }
 0x964   :  { %v768_v62 = vpack.c.bf16 %v756_v35, %v756_v35 }
 0x965   :  { %749 = vst.msk [vmem:[#allocation4 + $0x18] sm:$0xff] %vm442_vm2, %v3507_v39 }
 0x966   :  { %2717 = vmatmul.mubr.msk.bf16.vlgmr.msra.gmra.mrb[24].mxu0 %vm363_vm3, %v768_v62 }
 0x967   :  { %977 = vmatpush1.bf16.msra.mxu0 %v3300_v7  ;;  %1008 = vmatprep.mubr.bf16.mxu0 %v3178_v2 }
 0x968   :  { %978 = vmatprep.subr.bf16.mxu0 %v3306_v8 }
 0x96b   :  { %979 = vmatpush1.bf16.msra.mxu0 %v3316_v9 }
 0x96c   :  { %980 = vmatprep.subr.bf16.mxu0 %v3323_v10 }
 0x96f   :  { %981 = vmatpush1.bf16.msra.mxu0 %v3332_v12 }
 0x970   :  { %982 = vmatprep.subr.bf16.mxu0 %v3339_v13 }
 0x973   :  { %983 = vmatpush1.bf16.msra.mxu0 %v3348_v14 }
 0xa39   :  { %v806_v40 = vpop.f32.mrb[24].mxu0 }
 0xa3a   :  { %v813_v41 = vadd.f32 %v806_v40, %v3404_v60  ;;  %v808_v42 = vpop.f32.mrb[25].mxu0  ;;  %v830_v60 = vpop.permute.xlu0 %829 }
 0xa3b   :  { %v814_v25 = vadd.f32 %v808_v42, %v3408_v63  ;;  %v810_v33 = vpop.f32.mrb[26].mxu0 }
 0xa3c   :  { %v811_v44 = vpop.f32.mrb[27].mxu0  ;;  %v2718_v15 = vmul.f32 -1.442695, %v813_v41 }
 0xa3d   :  { %2982 = vtanh.f32 %v814_v25  ;;  %v2719_v26 = vmul.f32 -1.442695, %v814_v25 }
 0xa3e   :  { %2984 = vpow2.f32 %v2718_v15 }
 0xa47   :  { %v2983_v45 = vpop.eup %2982 }
 0xa48   :  { %834 = vrot.lane.b32.xlu1 %v2983_v45, %s3179_s5  ;;  %v2985_v46 = vpop.eup %2984 }
 0xa49   :  { %v821_v24 = vadd.f32 1.0, %v2985_v46 }
 0xa4b   :  { %2986 = vrcp.f32 %v821_v24 }
 0xa55   :  { %v2987_v47 = vpop.eup %2986 }
 0xa56   :  { %v832_v32 = vmul.f32 %v2987_v47, %v830_v60 }
 0xaba   :  { %v835_v27 = vpop.permute.xlu1 %834 }
 0xabb   :  { %v837_v29 = vmul.f32 %v2987_v47, %v835_v27 }
 0xabd   :  { %839 = vrot.lane.b32.xlu1 %v837_v29, %s3179_s5 }
 0xb2f   :  { %v840_v23 = vpop.permute.xlu1 %839 }
 0xb30   :  { %v842_v63 = vadd.f32 %v840_v23, %v832_v32 }
 0xb32   :  { %2988 = vtanh.f32 %v842_v63  ;;  %860 = vrot.lane.b32.xlu1 %v842_v63, %s3179_s5 }
 0xb33   :  { %2990 = vpow2.f32 %v2719_v26 }
 0xb3c   :  { %v2989_v48 = vpop.eup %2988 }
 0xb3d   :  { %845 = vrot.lane.b32.xlu0 %v2989_v48, %s3179_s5  ;;  %v2991_v50 = vpop.eup %2990 }
 0xb3e   :  { %v822_v52 = vadd.f32 1.0, %v2991_v50 }
 0xb40   :  { %2992 = vrcp.f32 %v822_v52 }
 0xb4a   :  { %v2993_v58 = vpop.eup %2992 }
 0xba4   :  { %v861_v55 = vpop.permute.xlu1 %860 }
 0xba5   :  { %v863_v56 = vsel %vm857_vm7, %v861_v55, %v761_v34 }
 0xba6   :  { %931 = vrot.lane.b32.xlu1 %v863_v56, %s3179_s5 }
 0xbaf   :  { %v846_v59 = vpop.permute.xlu0 %845 }
 0xbb0   :  { %v848_v6 = vmul.f32 %v2993_v58, %v846_v59 }
 0xbb2   :  { %v3530_v49 = vmul.f32 %v849_v51, %v848_v6  ;;  %v858_v61 = vsel %vm857_vm7, %v848_v6, %v756_v35  ;;  %v951_v35 = vld [vmem:[%s4086_s26 + $0x28] sm:$0xff]  ;;  %v1053_v6 = vld [vmem:[%s4086_s26 + $0x30] sm:$0xff] }
 0xbb3   :  { %v870_v3 = vpack.c.bf16 %v858_v61, %v858_v61  ;;  %vm959_vm8 = vcmp.gt.f32.partialorder %v951_v35, 0.0  ;;  %vm1061_vm9 = vcmp.gt.f32.partialorder %v1053_v6, 0.0 }
 0xbb4   :  { %851 = vst.msk [vmem:[#allocation4 + $0x20] sm:$0xff] %vm442_vm2, %v3530_v49 }
 0xbb5   :  { %2720 = vmatmul.mubr.msk.bf16.vlgmr.msra.gmra.mrb[24].mxu1 %vm363_vm3, %v870_v3 }
 0xbb6   :  { %1079 = vmatpush1.bf16.msra.mxu1 %v3300_v7  ;;  %1110 = vmatprep.mubr.bf16.mxu1 %v3178_v2 }
 0xbb7   :  { %1080 = vmatprep.subr.bf16.mxu1 %v3306_v8 }
 0xbba   :  { %1081 = vmatpush1.bf16.msra.mxu1 %v3316_v9 }
 0xbbb   :  { %1082 = vmatprep.subr.bf16.mxu1 %v3323_v10 }
 0xbbe   :  { %1083 = vmatpush1.bf16.msra.mxu1 %v3332_v12 }
 0xbbf   :  { %1084 = vmatprep.subr.bf16.mxu1 %v3339_v13 }
 0xbc2   :  { %1085 = vmatpush1.bf16.msra.mxu1 %v3348_v14 }
 0xc88   :  { %v908_v53 = vpop.f32.mrb[24].mxu1 }
 0xc89   :  { %v915_v4 = vadd.f32 %v908_v53, %v3410_v0  ;;  %v910_v11 = vpop.f32.mrb[25].mxu1  ;;  %v932_v0 = vpop.permute.xlu1 %931 }
 0xc8a   :  { %v916_v7 = vadd.f32 %v910_v11, %v3412_v1  ;;  %v912_v16 = vpop.f32.mrb[26].mxu1 }
 0xc8b   :  { %v913_v17 = vpop.f32.mrb[27].mxu1  ;;  %v2721_v9 = vmul.f32 -1.442695, %v915_v4 }
 0xc8c   :  { %2994 = vtanh.f32 %v916_v7  ;;  %v2722_v37 = vmul.f32 -1.442695, %v916_v7 }
 0xc8d   :  { %2996 = vpow2.f32 %v2721_v9 }
 0xc96   :  { %v2995_v8 = vpop.eup %2994 }
 0xc97   :  { %936 = vrot.lane.b32.xlu0 %v2995_v8, %s3179_s5  ;;  %v2997_v10 = vpop.eup %2996 }
 0xc98   :  { %v923_v12 = vadd.f32 1.0, %v2997_v10 }
 0xc9a   :  { %2998 = vrcp.f32 %v923_v12 }
 0xca4   :  { %v2999_v13 = vpop.eup %2998 }
 0xca5   :  { %v934_v28 = vmul.f32 %v2999_v13, %v932_v0 }
 0xd09   :  { %v937_v20 = vpop.permute.xlu0 %936 }
 0xd0a   :  { %v939_v14 = vmul.f32 %v2999_v13, %v937_v20 }
 0xd0c   :  { %941 = vrot.lane.b32.xlu0 %v939_v14, %s3179_s5 }
 0xd7e   :  { %v942_v34 = vpop.permute.xlu0 %941 }
 0xd7f   :  { %v944_v1 = vadd.f32 %v942_v34, %v934_v28 }
 0xd81   :  { %3000 = vtanh.f32 %v944_v1  ;;  %962 = vrot.lane.b32.xlu0 %v944_v1, %s3179_s5 }
 0xd82   :  { %3002 = vpow2.f32 %v2722_v37 }
 0xd8b   :  { %v3001_v36 = vpop.eup %3000 }
 0xd8c   :  { %947 = vrot.lane.b32.xlu1 %v3001_v36, %s3179_s5  ;;  %v3003_v57 = vpop.eup %3002 }
 0xd8d   :  { %v924_v62 = vadd.f32 1.0, %v3003_v57 }
 0xd8f   :  { %3004 = vrcp.f32 %v924_v62 }
 0xd99   :  { %v3005_v42 = vpop.eup %3004 }
 0xdf3   :  { %v963_v40 = vpop.permute.xlu0 %962 }
 0xdf4   :  { %v965_v41 = vsel %vm959_vm8, %v963_v40, %v863_v56 }
 0xdf5   :  { %1033 = vrot.lane.b32.xlu0 %v965_v41, %s3179_s5 }
 0xdfe   :  { %v948_v25 = vpop.permute.xlu1 %947 }
 0xdff   :  { %v950_v33 = vmul.f32 %v3005_v42, %v948_v25 }
 0xe01   :  { %v3553_v44 = vmul.f32 %v951_v35, %v950_v33  ;;  %v960_v45 = vsel %vm959_vm8, %v950_v33, %v858_v61 }
 0xe02   :  { %v972_v15 = vpack.c.bf16 %v960_v45, %v960_v45 }
 0xe03   :  { %953 = vst.msk [vmem:[#allocation4 + $0x28] sm:$0xff] %vm442_vm2, %v3553_v44 }
 0xe04   :  { %2723 = vmatmul.mubr.msk.bf16.vlgmr.msra.gmra.mrb[28].mxu0 %vm363_vm3, %v972_v15  ;;  %v2896_v15 = vld [vmem:[%s4070_s7 + $0x4] ss:$8 sps:$4 sm:$0xff]  }
 0xe05   :  { %1259 = vmatprep.mubr.bf16.mxu0 %v3178_v2  ;;  %1227 = vmatprep.subr.bf16.mxu0 %v2896_v15 }
 0xed7   :  { %v1010_v46 = vpop.f32.mrb[28].mxu0 }
 0xed8   :  { %v1017_v24 = vadd.f32 %v1010_v46, %v3418_v38  ;;  %v1012_v47 = vpop.f32.mrb[29].mxu0  ;;  %v1034_v38 = vpop.permute.xlu0 %1033  ;;  %v2897_v46 = vld [vmem:[%s4072_s9] ss:$8 sps:$4 sm:$0xff]  }
 0xed9   :  { %v1018_v27 = vadd.f32 %v1012_v47, %v3420_v22  ;;  %v1014_v29 = vpop.f32.mrb[30].mxu0  ;;  %v2900_v47 = vld [vmem:[%s4070_s7 + $0x10] ss:$8 sps:$4 sm:$0xff]  }
 0xeda   :  { %v1015_v60 = vpop.f32.mrb[31].mxu0  ;;  %v2724_v23 = vmul.f32 -1.442695, %v1017_v24  ;;  %v2899_v24 = vld [vmem:[%s4072_s9 + $0x4] ss:$8 sps:$4 sm:$0xff]  }
 0xedb   :  { %3006 = vtanh.f32 %v1018_v27  ;;  %v2725_v58 = vmul.f32 -1.442695, %v1018_v27  ;;  %1461 = vmatprep.subr.bf16.mxu1 %v2899_v24  ;;  %v2902_v27 = vld [vmem:[%s4070_s7 + $0x14] ss:$8 sps:$4 sm:$0xff]   ;;  %v2903_v29 = vld [vmem:[%s4072_s9 + $0x10] ss:$8 sps:$4 sm:$0xff]  }
 0xedc   :  { %3008 = vpow2.f32 %v2724_v23  ;;  %v2905_v60 = vld [vmem:[%s4072_s9 + $0x14] ss:$8 sps:$4 sm:$0xff]  }
 0xedd   :  { %v1155_v23 = vld [vmem:[%s4086_s26 + $0x38] sm:$0xff] }
 0xee5   :  { %v3007_v32 = vpop.eup %3006 }
 0xee6   :  { %1038 = vrot.lane.b32.xlu1 %v3007_v32, %s3179_s5  ;;  %v3009_v63 = vpop.eup %3008 }
 0xee7   :  { %v1025_v48 = vadd.f32 1.0, %v3009_v63 }
 0xee9   :  { %3010 = vrcp.f32 %v1025_v48 }
 0xef3   :  { %v3011_v26 = vpop.eup %3010 }
 0xef4   :  { %v1036_v52 = vmul.f32 %v3011_v26, %v1034_v38 }
 0xf58   :  { %v1039_v50 = vpop.permute.xlu1 %1038 }
 0xf59   :  { %v1041_v51 = vmul.f32 %v3011_v26, %v1039_v50  ;;  %v2908_v26 = vld [vmem:[%s4069_s6 + $0x4] ss:$8 sps:$4 sm:$0xff]  }
 0xf5b   :  { %1043 = vrot.lane.b32.xlu1 %v1041_v51, %s3179_s5  ;;  %v2911_v51 = vld [vmem:[%s4071_s8 + $0x4] ss:$8 sps:$4 sm:$0xff]  }
 0xfcd   :  { %v1044_v55 = vpop.permute.xlu1 %1043 }
 0xfce   :  { %v1046_v22 = vadd.f32 %v1044_v55, %v1036_v52 }
 0xfd0   :  { %3012 = vtanh.f32 %v1046_v22  ;;  %1064 = vrot.lane.b32.xlu1 %v1046_v22, %s3179_s5 }
 0xfd1   :  { %3014 = vpow2.f32 %v2725_v58  ;;  %v2906_v58 = vld [vmem:[%s4069_s6] ss:$8 sps:$4 sm:$0xff]  }
 0xfda   :  { %v3013_v56 = vpop.eup %3012 }
 0xfdb   :  { %1049 = vrot.lane.b32.xlu0 %v3013_v56, %s3179_s5  ;;  %v3015_v59 = vpop.eup %3014 }
 0xfdc   :  { %v1026_v61 = vadd.f32 1.0, %v3015_v59  ;;  %v2917_v59 = vld [vmem:[%s4071_s8 + $0x14] ss:$8 sps:$4 sm:$0xff]  }
 0xfde   :  { %3016 = vrcp.f32 %v1026_v61  ;;  %v2912_v61 = vld [vmem:[%s4069_s6 + $0x10] ss:$8 sps:$4 sm:$0xff]  }
 0xfe8   :  { %v3017_v4 = vpop.eup %3016 }
0x1042   :  { %v1065_v3 = vpop.permute.xlu1 %1064 }
0x1043   :  { %v1067_v53 = vsel %vm1061_vm9, %v1065_v3, %v965_v41  ;;  %v2915_v3 = vld [vmem:[%s4071_s8 + $0x10] ss:$8 sps:$4 sm:$0xff]  }
0x1044   :  { %1135 = vrot.lane.b32.xlu1 %v1067_v53, %s3179_s5  ;;  %v3658_v53 = vld [vmem:[%s4073_s10 + $0x4] ss:$8 sps:$4 sm:$0xff]  }
0x104d   :  { %v1050_v11 = vpop.permute.xlu0 %1049 }
0x104e   :  { %v1052_v7 = vmul.f32 %v3017_v4, %v1050_v11 }
0x1050   :  { %v1054_v16 = vmul.f32 %v1053_v6, %v1052_v7  ;;  %v1062_v17 = vsel %vm1061_vm9, %v1052_v7, %v960_v45  ;;  %v2894_v45 = vld [vmem:[%s4070_s7] ss:$8 sps:$4 sm:$0xff]  }
0x1051   :  { %v1074_v8 = vpack.c.bf16 %v1062_v17, %v1062_v17  ;;  %1228 = vmatpush1.bf16.msra.mxu0 %v2894_v45 }
0x1052   :  { %1055 = vst.msk [vmem:[#allocation4 + $0x30] sm:$0xff] %vm442_vm2, %v1054_v16  ;;  %1229 = vmatprep.subr.bf16.mxu0 %v2902_v27 }
0x1053   :  { %2726 = vmatmul.mubr.msk.bf16.vlgmr.msra.gmra.mrb[28].mxu1 %vm363_vm3, %v1074_v8 }
0x1054   :  { %1493 = vmatprep.mubr.bf16.mxu1 %v3178_v2  ;;  %1462 = vmatpush1.bf16.msra.mxu1 %v2897_v46 }
0x1055   :  { %1463 = vmatprep.subr.bf16.mxu1 %v2905_v60  ;;  %1230 = vmatpush1.bf16.msra.mxu0 %v2900_v47 }
0x1056   :  { %1332 = vmatprep.subr.bf16.mxu0 %v2908_v26 }
0x1058   :  { %1464 = vmatpush1.bf16.msra.mxu1 %v2903_v29 }
0x1059   :  { %1554 = vmatprep.subr.bf16.mxu1 %v2911_v51 }
0x1126   :  { %v1112_v9 = vpop.f32.mrb[28].mxu1 }
0x1127   :  { %v1119_v10 = vadd.f32 %v1112_v9, %v3423_v30  ;;  %v1114_v12 = vpop.f32.mrb[29].mxu1  ;;  %v1136_v30 = vpop.permute.xlu1 %1135 }
0x1128   :  { %v1120_v13 = vadd.f32 %v1114_v12, %v3425_v43  ;;  %v1116_v20 = vpop.f32.mrb[30].mxu1 }
0x1129   :  { %v1117_v14 = vpop.f32.mrb[31].mxu1  ;;  %v2727_v28 = vmul.f32 -1.442695, %v1119_v10  ;;  %v1163_v20 = vld [vmem:[#allocation4] sm:$0xff] }
0x112a   :  { %3018 = vtanh.f32 %v1120_v13  ;;  %v3677_v14 = vld [vmem:[%s4073_s10] ss:$8 sps:$4 sm:$0xff]  }
0x112b   :  { %3020 = vpow2.f32 %v2727_v28  ;;  %v3682_v28 = vld [vmem:[%s4073_s10 + $0x14] ss:$8 sps:$4 sm:$0xff]  }
0x1134   :  { %v3019_v0 = vpop.eup %3018 }
0x1135   :  { %1140 = vrot.lane.b32.xlu0 %v3019_v0, %s3179_s5  ;;  %v3021_v34 = vpop.eup %3020 }
0x1136   :  { %v1127_v1 = vadd.f32 1.0, %v3021_v34  ;;  %v3691_v34 = vld [vmem:[%s4073_s10 + $0x10] ss:$8 sps:$4 sm:$0xff]  }
0x1138   :  { %3022 = vrcp.f32 %v1127_v1  ;;  %v3698_v1 = vld [vmem:[%s4073_s10 + $0x24] ss:$8 sps:$4 sm:$0xff]  }
0x1142   :  { %v3023_v36 = vpop.eup %3022 }
0x1143   :  { %v1138_v43 = vmul.f32 %v3023_v36, %v1136_v30  ;;  %v3707_v30 = vld [vmem:[%s4073_s10 + $0x20] ss:$8 sps:$4 sm:$0xff]  }
0x11a7   :  { %v1141_v37 = vpop.permute.xlu0 %1140 }
0x11a8   :  { %v1143_v57 = vmul.f32 %v3023_v36, %v1141_v37  ;;  %v1166_v36 = vld [vmem:[#allocation4 + $0x18] sm:$0xff]  ;;  %v1165_v37 = vld [vmem:[#allocation4 + $0x10] sm:$0xff] }
0x11aa   :  { %1145 = vrot.lane.b32.xlu0 %v1143_v57, %s3179_s5  ;;  %v1172_v57 = vpack.c.bf16 %v1166_v36, %v1165_v37 }
0x11ae   :  { %1057 = vrot.lane.b32.xlu0 %v1054_v16, %s3180_s2 }
0x11b2   :  { %853 = vrot.lane.b32.xlu0 %v3530_v49, %s3180_s2 }
0x11b6   :  { %649 = vrot.lane.b32.xlu0 %v3483_v31, %s3180_s2 }
0x11ba   :  { %445 = vrot.lane.b32.xlu0 %v3434_v5, %s3180_s2  ;;  %v2728_v5 = vmul.f32 -1.442695, %v1120_v13  ;;  %v1164_v13 = vld [vmem:[#allocation4 + $0x8] sm:$0xff] }
0x11bb   :  { %v1171_v0 = vpack.c.bf16 %v1164_v13, %v1163_v20 }
0x121c   :  { %v1146_v35 = vpop.permute.xlu0 %1145 }
0x121d   :  { %v1148_v62 = vadd.f32 %v1146_v35, %v1138_v43  ;;  %v3712_v43 = vld [vmem:[%s4073_s10 + $0x34] ss:$8 sps:$4 sm:$0xff]   ;;  %v3723_v35 = vld [vmem:[%s4073_s10 + $0x30] ss:$8 sps:$4 sm:$0xff]  }
0x121f   :  { %3024 = vtanh.f32 %v1148_v62  ;;  %v1168_v62 = vld [vmem:[#allocation4 + $0x28] sm:$0xff] }
0x1220   :  { %v1058_v40 = vpop.permute.xlu0 %1057  ;;  %3026 = vpow2.f32 %v2728_v5  ;;  %v1405_v5 = vld [vmem:[%s4074_s11] sm:$0x3] }
0x1221   :  { %1060 = vst.msk [vmem:[#allocation5 + $0x8] sm:$0xff] %vm442_vm2, %v1058_v40  ;;  %v1167_v40 = vld [vmem:[#allocation4 + $0x20] sm:$0xff]  ;;  %v1414_v47 = vrot.slane %v1405_v5, %v72_v21 }
0x1224   :  { %v854_v41 = vpop.permute.xlu0 %853 }
0x1225   :  { %856 = vst.msk [vmem:[#allocation5 + $0x18] sm:$0xff] %vm442_vm2, %v854_v41  ;;  %v1173_v41 = vpack.c.bf16 %v1168_v62, %v1167_v40 }
0x1228   :  { %v650_v42 = vpop.permute.xlu0 %649  ;;  %v1176_v55 = vld [vmem:[#allocation5 + $0x8] sm:$0xff] }
0x1229   :  { %v3025_v25 = vpop.eup %3024  ;;  %652 = vst.msk [vmem:[#allocation5 + $0x28] sm:$0xff] %vm442_vm2, %v650_v42 }
0x122a   :  { %1151 = vrot.lane.b32.xlu1 %v3025_v25, %s3179_s5  ;;  %v3027_v49 = vpop.eup %3026  ;;  %v1169_v25 = vld [vmem:[#allocation4 + $0x30] sm:$0xff] }
0x122b   :  { %v1128_v33 = vadd.f32 1.0, %v3027_v49  ;;  %v1410_v49 = vrot.slane %v1405_v5, %v68_v19 }
0x122c   :  { %v446_v31 = vpop.permute.xlu0 %445  ;;  %v1178_v11 = vld [vmem:[#allocation5 + $0x18] sm:$0xff] }
0x122d   :  { %448 = vst.msk [vmem:[#allocation5 + $0x38] sm:$0xff] %vm442_vm2, %v446_v31  ;;  %3028 = vrcp.f32 %v1128_v33 }
0x1230   :  { %v1180_v17 = vld [vmem:[#allocation5 + $0x28] sm:$0xff] }
0x1234   :  { %v1182_v10 = vld [vmem:[#allocation5 + $0x38] sm:$0xff] }
0x1237   :  { %v3029_v32 = vpop.eup %3028 }
0x129c   :  { %v1152_v63 = vpop.permute.xlu1 %1151 }
0x129d   :  { %v1154_v48 = vmul.f32 %v3029_v32, %v1152_v63 }
0x129f   :  { %v1156_v50 = vmul.f32 %v1155_v23, %v1154_v48 }
0x12a1   :  { %1157 = vst.msk [vmem:[#allocation4 + $0x38] sm:$0xff] %vm442_vm2, %v1156_v50  ;;  %1159 = vrot.lane.b32.xlu1 %v1156_v50, %s3180_s2 }
0x12a5   :  { %955 = vrot.lane.b32.xlu1 %v3553_v44, %s3180_s2  ;;  %v2914_v44 = vld [vmem:[%s4069_s6 + $0x14] ss:$8 sps:$4 sm:$0xff]  }
0x12a8   :  { %v1170_v42 = vld [vmem:[#allocation4 + $0x38] sm:$0xff] }
0x12a9   :  { %751 = vrot.lane.b32.xlu1 %v3507_v39, %s3180_s2  ;;  %v2909_v39 = vld [vmem:[%s4071_s8] ss:$8 sps:$4 sm:$0xff]   ;;  %v1174_v31 = vpack.c.bf16 %v1170_v42, %v1169_v25 }
0x12ad   :  { %547 = vrot.lane.b32.xlu1 %v3459_v54, %s3180_s2 }
0x1313   :  { %v1160_v38 = vpop.permute.xlu1 %1159 }
0x1314   :  { %1162 = vst.msk [vmem:[#allocation5] sm:$0xff] %vm442_vm2, %v1160_v38 }
0x1317   :  { %v956_v52 = vpop.permute.xlu1 %955 }
0x1318   :  { %958 = vst.msk [vmem:[#allocation5 + $0x10] sm:$0xff] %vm442_vm2, %v956_v52 }
0x131b   :  { %v752_v22 = vpop.permute.xlu1 %751  ;;  %v1175_v56 = vld [vmem:[#allocation5] sm:$0xff] }
0x131c   :  { %754 = vst.msk [vmem:[#allocation5 + $0x20] sm:$0xff] %vm442_vm2, %v752_v22  ;;  %v1183_v54 = vpack.c.bf16 %v1176_v55, %v1175_v56 }
0x131e   :  { %2733 = vmatmul.mubr.msk.bf16.vlgmr.msra.gmra.mrb[32].mxu0 %vm442_vm2, %v1183_v54  ;;  %2749 = vmatmul.mubr.msk.bf16.vlgmr.msra.gmra.mrb[32].mxu1 %vm442_vm2, %v1183_v54 }
0x131f   :  { %1333 = vmatpush1.bf16.msra.mxu0 %v2906_v58  ;;  %v548_v6 = vpop.permute.xlu1 %547  ;;  %1555 = vmatpush1.bf16.msra.mxu1 %v2909_v39  ;;  %v1177_v4 = vld [vmem:[#allocation5 + $0x10] sm:$0xff] }
0x1320   :  { %550 = vst.msk [vmem:[#allocation5 + $0x30] sm:$0xff] %vm442_vm2, %v548_v6  ;;  %1269 = vmatprep.mubr.bf16.mxu0 %v3178_v2  ;;  %1503 = vmatprep.mubr.bf16.mxu1 %v3178_v2  ;;  %v1184_v7 = vpack.c.bf16 %v1178_v11, %v1177_v4 }
0x1321   :  { %1334 = vmatprep.subr.bf16.mxu0 %v2914_v44  ;;  %1556 = vmatprep.subr.bf16.mxu1 %v2917_v59 }
0x1323   :  { %1335 = vmatpush1.bf16.msra.mxu0 %v2912_v61  ;;  %1557 = vmatpush1.bf16.msra.mxu1 %v2915_v3  ;;  %v1179_v16 = vld [vmem:[#allocation5 + $0x20] sm:$0xff] }
0x1324   :  { %1713 = vmatprep.subr.bf16.mxu0 %v3658_v53  ;;  %1811 = vmatprep.subr.bf16.mxu1 %v3658_v53  ;;  %v1185_v8 = vpack.c.bf16 %v1180_v17, %v1179_v16 }
0x1326   :  { %2734 = vmatmul.mubr.msk.bf16.gmra.mrb[36].mxu0 %vm442_vm2, %v1184_v7  ;;  %2750 = vmatmul.mubr.msk.bf16.gmra.mrb[36].mxu1 %vm442_vm2, %v1184_v7 }
0x1327   :  { %1279 = vmatprep.mubr.bf16.mxu0 %v3178_v2  ;;  %1513 = vmatprep.mubr.bf16.mxu1 %v3178_v2  ;;  %v1181_v9 = vld [vmem:[#allocation5 + $0x30] sm:$0xff] }
0x1328   :  { %v1186_v12 = vpack.c.bf16 %v1182_v10, %v1181_v9 }
0x132e   :  { %2735 = vmatmul.mubr.msk.bf16.gmra.mrb[40].mxu0 %vm442_vm2, %v1185_v8  ;;  %2751 = vmatmul.mubr.msk.bf16.gmra.mrb[40].mxu1 %vm442_vm2, %v1185_v8 }
0x132f   :  { %1289 = vmatprep.mubr.bf16.mxu0 %v3178_v2  ;;  %1523 = vmatprep.mubr.bf16.mxu1 %v3178_v2 }
0x1336   :  { %2736 = vmatmul.mubr.msk.bf16.gmra.mrb[44].mxu0 %vm442_vm2, %v1186_v12  ;;  %2752 = vmatmul.mubr.msk.bf16.gmra.mrb[44].mxu1 %vm442_vm2, %v1186_v12 }
0x1337   :  { %1364 = vmatprep.mubr.bf16.mxu0 %v3178_v2  ;;  %1586 = vmatprep.mubr.bf16.mxu1 %v3178_v2 }
0x133e   :  { %2741 = vmatmul.mubr.msk.bf16.vlgmr.msra.gmra.mrb[32].mxu0 %vm442_vm2, %v1171_v0  ;;  %2757 = vmatmul.mubr.msk.bf16.vlgmr.msra.gmra.mrb[32].mxu1 %vm442_vm2, %v1171_v0 }
0x133f   :  { %1714 = vmatpush1.bf16.msra.mxu0 %v3677_v14  ;;  %1374 = vmatprep.mubr.bf16.mxu0 %v3178_v2 }
0x1340   :  { %1596 = vmatprep.mubr.bf16.mxu1 %v3178_v2  ;;  %1715 = vmatprep.subr.bf16.mxu0 %v3682_v28 }
0x1341   :  { %1812 = vmatpush1.bf16.msra.mxu1 %v3677_v14 }
0x1342   :  { %1813 = vmatprep.subr.bf16.mxu1 %v3682_v28 }
0x1343   :  { %1716 = vmatpush1.bf16.msra.mxu0 %v3691_v34 }
0x1344   :  { %1717 = vmatprep.subr.bf16.mxu0 %v3698_v1 }
0x1345   :  { %1814 = vmatpush1.bf16.msra.mxu1 %v3691_v34 }
0x1346   :  { %2742 = vmatmul.mubr.msk.bf16.gmra.mrb[36].mxu0 %vm442_vm2, %v1172_v57  ;;  %2758 = vmatmul.mubr.msk.bf16.gmra.mrb[36].mxu1 %vm442_vm2, %v1172_v57 }
0x1347   :  { %1384 = vmatprep.mubr.bf16.mxu0 %v3178_v2  ;;  %1606 = vmatprep.mubr.bf16.mxu1 %v3178_v2 }
0x1348   :  { %1718 = vmatpush1.bf16.msra.mxu0 %v3707_v30  ;;  %1815 = vmatprep.subr.bf16.mxu1 %v3698_v1 }
0x1349   :  { %1719 = vmatprep.subr.bf16.mxu0 %v3712_v43  ;;  %1816 = vmatpush1.bf16.msra.mxu1 %v3707_v30 }
0x134a   :  { %1817 = vmatprep.subr.bf16.mxu1 %v3712_v43 }
0x134c   :  { %1720 = vmatpush1.bf16.msra.mxu0 %v3723_v35 }
0x134d   :  { %1818 = vmatpush1.bf16.msra.mxu1 %v3723_v35  ;;  %1913 = vmatprep.subr.bf16.mxu0 %v3658_v53 }
0x134e   :  { %2743 = vmatmul.mubr.msk.bf16.gmra.mrb[40].mxu0 %vm442_vm2, %v1173_v41  ;;  %2759 = vmatmul.mubr.msk.bf16.gmra.mrb[40].mxu1 %vm442_vm2, %v1173_v41 }
0x134f   :  { %1394 = vmatprep.mubr.bf16.mxu0 %v3178_v2  ;;  %1616 = vmatprep.mubr.bf16.mxu1 %v3178_v2 }
0x1350   :  { %2015 = vmatprep.subr.bf16.mxu1 %v3658_v53 }
0x1356   :  { %2744 = vmatmul.mubr.msk.bf16.gmra.mrb[44].mxu0 %vm442_vm2, %v1174_v31  ;;  %2760 = vmatmul.mubr.msk.bf16.gmra.mrb[44].mxu1 %vm442_vm2, %v1174_v31 }
0x1357   :  { %1745 = vmatprep.mubr.bf16.mxu0 %v3178_v2  ;;  %1843 = vmatprep.mubr.bf16.mxu1 %v3178_v2 }
0x135e   :  { %1746 = vmatmul.mubr.bf16.vlgmr.msra.gmra.mrb[48].mxu0 %v3178_v2 }
0x135f   :  { %1914 = vmatpush1.bf16.msra.mxu0 %v3677_v14  ;;  %1945 = vmatprep.mubr.bf16.mxu0 %v3178_v2 }
0x1360   :  { %1915 = vmatprep.subr.bf16.mxu0 %v3682_v28 }
0x1363   :  { %1916 = vmatpush1.bf16.msra.mxu0 %v3691_v34 }
0x1364   :  { %1917 = vmatprep.subr.bf16.mxu0 %v3698_v1 }
0x1367   :  { %1918 = vmatpush1.bf16.msra.mxu0 %v3707_v30 }
0x1368   :  { %1919 = vmatprep.subr.bf16.mxu0 %v3712_v43 }
0x136b   :  { %1920 = vmatpush1.bf16.msra.mxu0 %v3723_v35 }
0x136c   :  { %2117 = vmatprep.subr.bf16.mxu0 %v3658_v53 }
0x1411   :  { %v1366_v33 = vpop.f32.mrb[32].mxu0  ;;  %v1588_v45 = vpop.f32.mrb[32].mxu1 }
0x1412   :  { %v1417_v15 = vadd.f32 %v1410_v49, %v1366_v33  ;;  %v1368_v46 = vpop.f32.mrb[33].mxu0  ;;  %v1590_v24 = vpop.f32.mrb[33].mxu1 }
0x1413   :  { %v1370_v27 = vpop.f32.mrb[34].mxu0  ;;  %v1592_v29 = vpop.f32.mrb[34].mxu1  ;;  %v1418_v42 = vadd.f32 %v1414_v47, %v1368_v46 }
0x1414   :  { %v1419_v60 = vadd.f32 %v1410_v49, %v1370_v27  ;;  %v1372_v32 = vpop.f32.mrb[35].mxu0  ;;  %v1594_v23 = vpop.f32.mrb[35].mxu1 }
0x1415   :  { %v1420_v63 = vadd.f32 %v1414_v47, %v1372_v32 }
0x1419   :  { %v1376_v48 = vpop.f32.mrb[36].mxu0  ;;  %v1598_v26 = vpop.f32.mrb[36].mxu1 }
0x141a   :  { %v1421_v50 = vadd.f32 %v1410_v49, %v1376_v48  ;;  %v1378_v51 = vpop.f32.mrb[37].mxu0  ;;  %v1600_v38 = vpop.f32.mrb[37].mxu1 }
0x141b   :  { %v1422_v19 = vadd.f32 %v1414_v47, %v1378_v51  ;;  %v1380_v52 = vpop.f32.mrb[38].mxu0  ;;  %v1602_v55 = vpop.f32.mrb[38].mxu1 }
0x141c   :  { %v1423_v22 = vadd.f32 %v1410_v49, %v1380_v52  ;;  %v1382_v56 = vpop.f32.mrb[39].mxu0  ;;  %v1604_v58 = vpop.f32.mrb[39].mxu1 }
0x141d   :  { %v1424_v39 = vadd.f32 %v1414_v47, %v1382_v56 }
0x1421   :  { %v1386_v18 = vpop.f32.mrb[40].mxu0  ;;  %v1608_v21 = vpop.f32.mrb[40].mxu1 }
0x1422   :  { %v1425_v54 = vadd.f32 %v1410_v49, %v1386_v18  ;;  %v3758_v44 = vadd.f32 %v1608_v21, %v1423_v22  ;;  %v1388_v59 = vpop.f32.mrb[41].mxu0  ;;  %v1610_v6 = vpop.f32.mrb[41].mxu1 }
0x1423   :  { %v1426_v61 = vadd.f32 %v1414_v47, %v1388_v59  ;;  %v3760_v3 = vadd.f32 %v1610_v6, %v1424_v39  ;;  %v1390_v4 = vpop.f32.mrb[42].mxu0  ;;  %v1612_v11 = vpop.f32.mrb[42].mxu1 }
0x1424   :  { %v1427_v7 = vadd.f32 %v1410_v49, %v1390_v4  ;;  %v3762_v16 = vadd.f32 %v1612_v11, %v1421_v50  ;;  %v1392_v17 = vpop.f32.mrb[43].mxu0  ;;  %v1614_v8 = vpop.f32.mrb[43].mxu1  ;;  %v3764_v9 = vadd.f32 %v1602_v55, %v1425_v54 }
0x1425   :  { %v1428_v10 = vadd.f32 %v1414_v47, %v1392_v17  ;;  %v3766_v12 = vadd.f32 %v1614_v8, %v1422_v19  ;;  %v3768_v13 = vadd.f32 %v1604_v58, %v1426_v61  ;;  %v1786_v61 = vld [vmem:[%s4086_s26] sm:$0xff] }
0x1426   :  { %v3770_v20 = vadd.f32 %v1598_v26, %v1427_v7  ;;  %vm1794_vm10 = vcmp.gt.f32.partialorder %v1786_v61, 0.0 }
0x1427   :  { %v3772_v0 = vadd.f32 %v1600_v38, %v1428_v10 }
0x1429   :  { %v1396_v36 = vpop.f32.mrb[44].mxu0  ;;  %v1618_v37 = vpop.f32.mrb[44].mxu1 }
0x142a   :  { %v1429_v57 = vadd.f32 %v1410_v49, %v1396_v36  ;;  %v3774_v62 = vadd.f32 %v1618_v37, %v1419_v60  ;;  %v1398_v40 = vpop.f32.mrb[45].mxu0  ;;  %v1620_v41 = vpop.f32.mrb[45].mxu1 }
0x142b   :  { %v1430_v25 = vadd.f32 %v1414_v47, %v1398_v40  ;;  %v3776_v31 = vadd.f32 %v1620_v41, %v1420_v63  ;;  %v1400_v5 = vpop.f32.mrb[46].mxu0  ;;  %v1622_v33 = vpop.f32.mrb[46].mxu1 }
0x142c   :  { %v1431_v27 = vadd.f32 %v1410_v49, %v1400_v5  ;;  %v1671_v32 = vadd.f32 %v1622_v33, %v1417_v15  ;;  %v1402_v48 = vpop.f32.mrb[47].mxu0  ;;  %v1624_v26 = vpop.f32.mrb[47].mxu1  ;;  %v3778_v50 = vadd.f32 %v1592_v29, %v1429_v57 }
0x142d   :  { %v1432_v51 = vadd.f32 %v1414_v47, %v1402_v48  ;;  %v1672_v38 = vadd.f32 %v1624_v26, %v1418_v42  ;;  %v3780_v19 = vadd.f32 %v1594_v23, %v1430_v25 }
0x142e   :  { %v3782_v60 = vadd.f32 %v1588_v45, %v1431_v27 }
0x142f   :  { %v3784_v52 = vadd.f32 %v1590_v24, %v1432_v51 }
0x1431   :  { %v1747_v46 = vpop.f32.mrb[48].mxu0 }
0x1432   :  { %v1754_v55 = vadd.f32 %v1747_v46, %v1671_v32  ;;  %v1749_v63 = vpop.f32.mrb[49].mxu0 }
0x1433   :  { %v1755_v22 = vadd.f32 %v1749_v63, %v1672_v38  ;;  %v1751_v56 = vpop.f32.mrb[50].mxu0 }
0x1434   :  { %v1752_v58 = vpop.f32.mrb[51].mxu0  ;;  %v2769_v15 = vmul.f32 -1.442695, %v1754_v55 }
0x1435   :  { %3030 = vtanh.f32 %v1755_v22  ;;  %v2770_v59 = vmul.f32 -1.442695, %v1755_v22 }
0x1436   :  { %3032 = vpow2.f32 %v2769_v15 }
0x143f   :  { %v3031_v49 = vpop.eup %3030 }
0x1440   :  { %1771 = vrot.lane.b32.xlu0 %v3031_v49, %s3179_s5  ;;  %v3033_v47 = vpop.eup %3032  ;;  %v1888_v49 = vld [vmem:[%s4086_s26 + $0x8] sm:$0xff] }
0x1441   :  { %v1762_v29 = vadd.f32 1.0, %v3033_v47  ;;  %vm1896_vm11 = vcmp.gt.f32.partialorder %v1888_v49, 0.0 }
0x1443   :  { %3034 = vrcp.f32 %v1762_v29 }
0x144d   :  { %v3035_v23 = vpop.eup %3034 }
0x144e   :  { %v1769_v24 = vmul.f32 0.0, %v3035_v23 }
0x14b2   :  { %v1772_v45 = vpop.permute.xlu0 %1771 }
0x14b3   :  { %v1774_v39 = vmul.f32 %v3035_v23, %v1772_v45 }
0x14b5   :  { %1776 = vrot.lane.b32.xlu1 %v1774_v39, %s3179_s5 }
0x1527   :  { %v1777_v18 = vpop.permute.xlu1 %1776 }
0x1528   :  { %v1779_v21 = vadd.f32 %v1777_v18, %v1769_v24 }
0x152a   :  { %3036 = vtanh.f32 %v1779_v21  ;;  %1797 = vrot.lane.b32.xlu1 %v1779_v21, %s3179_s5 }
0x152b   :  { %3038 = vpow2.f32 %v2770_v59 }
0x1534   :  { %v3037_v54 = vpop.eup %3036 }
0x1535   :  { %1782 = vrot.lane.b32.xlu0 %v3037_v54, %s3179_s5  ;;  %v3039_v6 = vpop.eup %3038 }
0x1536   :  { %v1763_v4 = vadd.f32 1.0, %v3039_v6 }
0x1538   :  { %3040 = vrcp.f32 %v1763_v4 }
0x1542   :  { %v3041_v17 = vpop.eup %3040 }
0x159c   :  { %v1798_v11 = vpop.permute.xlu1 %1797 }
0x159d   :  { %v1800_v7 = vsel %vm1794_vm10, %v1798_v11, 0.0 }
0x159e   :  { %1868 = vrot.lane.b32.xlu1 %v1800_v7, %s3179_s5 }
0x15a7   :  { %v1783_v8 = vpop.permute.xlu0 %1782 }
0x15a8   :  { %v1785_v10 = vmul.f32 %v3041_v17, %v1783_v8 }
0x15aa   :  { %v3794_v36 = vmul.f32 %v1786_v61, %v1785_v10  ;;  %v1795_v37 = vsel %vm1794_vm10, %v1785_v10, 0.0 }
0x15ab   :  { %v1807_v57 = vpack.c.bf16 %v1795_v37, %v1795_v37 }
0x15ac   :  { %1788 = vst.msk [vmem:[%s4077_s14] sm:$0xff] %vm442_vm2, %v3794_v36 }
0x15ad   :  { %2771 = vmatmul.mubr.msk.bf16.vlgmr.msra.gmra.mrb[48].mxu1 %vm363_vm3, %v1807_v57 }
0x15ae   :  { %2016 = vmatpush1.bf16.msra.mxu1 %v3677_v14  ;;  %2047 = vmatprep.mubr.bf16.mxu1 %v3178_v2 }
0x15af   :  { %2017 = vmatprep.subr.bf16.mxu1 %v3682_v28 }
0x15b2   :  { %2018 = vmatpush1.bf16.msra.mxu1 %v3691_v34 }
0x15b3   :  { %2019 = vmatprep.subr.bf16.mxu1 %v3698_v1 }
0x15b6   :  { %2020 = vmatpush1.bf16.msra.mxu1 %v3707_v30 }
0x15b7   :  { %2021 = vmatprep.subr.bf16.mxu1 %v3712_v43 }
0x15ba   :  { %2022 = vmatpush1.bf16.msra.mxu1 %v3723_v35 }
0x15bb   :  { %2219 = vmatprep.subr.bf16.mxu1 %v3658_v53 }
0x1680   :  { %v1845_v40 = vpop.f32.mrb[48].mxu1 }
0x1681   :  { %v1852_v41 = vadd.f32 %v1845_v40, %v3774_v62  ;;  %v1847_v42 = vpop.f32.mrb[49].mxu1  ;;  %v1869_v62 = vpop.permute.xlu1 %1868 }
0x1682   :  { %v1853_v25 = vadd.f32 %v1847_v42, %v3776_v31  ;;  %v1849_v5 = vpop.f32.mrb[50].mxu1 }
0x1683   :  { %v1850_v33 = vpop.f32.mrb[51].mxu1  ;;  %v2772_v32 = vmul.f32 -1.442695, %v1852_v41 }
0x1684   :  { %3042 = vtanh.f32 %v1853_v25  ;;  %v2773_v56 = vmul.f32 -1.442695, %v1853_v25 }
0x1685   :  { %3044 = vpow2.f32 %v2772_v32 }
0x168e   :  { %v3043_v27 = vpop.eup %3042 }
0x168f   :  { %1873 = vrot.lane.b32.xlu0 %v3043_v27, %s3179_s5  ;;  %v3045_v48 = vpop.eup %3044  ;;  %v1990_v27 = vld [vmem:[%s4086_s26 + $0x10] sm:$0xff] }
0x1690   :  { %v1860_v26 = vadd.f32 1.0, %v3045_v48  ;;  %vm1998_vm12 = vcmp.gt.f32.partialorder %v1990_v27, 0.0 }
0x1692   :  { %3046 = vrcp.f32 %v1860_v26 }
0x169c   :  { %v3047_v51 = vpop.eup %3046 }
0x169d   :  { %v1871_v55 = vmul.f32 %v3047_v51, %v1869_v62 }
0x1701   :  { %v1874_v38 = vpop.permute.xlu0 %1873 }
0x1702   :  { %v1876_v46 = vmul.f32 %v3047_v51, %v1874_v38 }
0x1704   :  { %1878 = vrot.lane.b32.xlu0 %v1876_v46, %s3179_s5 }
0x1776   :  { %v1879_v63 = vpop.permute.xlu0 %1878 }
0x1777   :  { %v1881_v31 = vadd.f32 %v1879_v63, %v1871_v55 }
0x1779   :  { %3048 = vtanh.f32 %v1881_v31  ;;  %1899 = vrot.lane.b32.xlu0 %v1881_v31, %s3179_s5 }
0x177a   :  { %3050 = vpow2.f32 %v2773_v56 }
0x1783   :  { %v3049_v22 = vpop.eup %3048 }
0x1784   :  { %1884 = vrot.lane.b32.xlu1 %v3049_v22, %s3179_s5  ;;  %v3051_v58 = vpop.eup %3050 }
0x1785   :  { %v1861_v15 = vadd.f32 1.0, %v3051_v58 }
0x1787   :  { %3052 = vrcp.f32 %v1861_v15 }
0x1791   :  { %v3053_v23 = vpop.eup %3052 }
0x17eb   :  { %v1900_v47 = vpop.permute.xlu0 %1899 }
0x17ec   :  { %v1902_v29 = vsel %vm1896_vm11, %v1900_v47, %v1800_v7 }
0x17ed   :  { %1970 = vrot.lane.b32.xlu0 %v1902_v29, %s3179_s5 }
0x17f6   :  { %v1885_v45 = vpop.permute.xlu1 %1884 }
0x17f7   :  { %v1887_v39 = vmul.f32 %v3053_v23, %v1885_v45 }
0x17f9   :  { %v3821_v24 = vmul.f32 %v1888_v49, %v1887_v39  ;;  %v1897_v18 = vsel %vm1896_vm11, %v1887_v39, %v1795_v37 }
0x17fa   :  { %v1909_v21 = vpack.c.bf16 %v1897_v18, %v1897_v18 }
0x17fb   :  { %1890 = vst.msk [vmem:[%s4077_s14 + $0x8] sm:$0xff] %vm442_vm2, %v3821_v24 }
0x17fc   :  { %2774 = vmatmul.mubr.msk.bf16.vlgmr.msra.gmra.mrb[52].mxu0 %vm363_vm3, %v1909_v21 }
0x17fd   :  { %2118 = vmatpush1.bf16.msra.mxu0 %v3677_v14  ;;  %2149 = vmatprep.mubr.bf16.mxu0 %v3178_v2 }
0x17fe   :  { %2119 = vmatprep.subr.bf16.mxu0 %v3682_v28 }
0x1801   :  { %2120 = vmatpush1.bf16.msra.mxu0 %v3691_v34 }
0x1802   :  { %2121 = vmatprep.subr.bf16.mxu0 %v3698_v1 }
0x1805   :  { %2122 = vmatpush1.bf16.msra.mxu0 %v3707_v30 }
0x1806   :  { %2123 = vmatprep.subr.bf16.mxu0 %v3712_v43 }
0x1809   :  { %2124 = vmatpush1.bf16.msra.mxu0 %v3723_v35 }
0x180a   :  { %2321 = vmatprep.subr.bf16.mxu0 %v3658_v53 }
0x18cf   :  { %v1947_v54 = vpop.f32.mrb[52].mxu0 }
0x18d0   :  { %v1954_v59 = vadd.f32 %v1947_v54, %v3762_v16  ;;  %v1949_v6 = vpop.f32.mrb[53].mxu0  ;;  %v1971_v16 = vpop.permute.xlu0 %1970 }
0x18d1   :  { %v1955_v61 = vadd.f32 %v1949_v6, %v3766_v12  ;;  %v1951_v4 = vpop.f32.mrb[54].mxu0 }
0x18d2   :  { %v1952_v11 = vpop.f32.mrb[55].mxu0  ;;  %v2775_v17 = vmul.f32 -1.442695, %v1954_v59  ;;  %v2092_v4 = vld [vmem:[%s4086_s26 + $0x18] sm:$0xff] }
0x18d3   :  { %3054 = vtanh.f32 %v1955_v61  ;;  %v2776_v5 = vmul.f32 -1.442695, %v1955_v61  ;;  %vm2100_vm13 = vcmp.gt.f32.partialorder %v2092_v4, 0.0 }
0x18d4   :  { %3056 = vpow2.f32 %v2775_v17 }
0x18dd   :  { %v3055_v7 = vpop.eup %3054 }
0x18de   :  { %1975 = vrot.lane.b32.xlu1 %v3055_v7, %s3179_s5  ;;  %v3057_v8 = vpop.eup %3056 }
0x18df   :  { %v1962_v10 = vadd.f32 1.0, %v3057_v8 }
0x18e1   :  { %3058 = vrcp.f32 %v1962_v10 }
0x18eb   :  { %v3059_v37 = vpop.eup %3058 }
0x18ec   :  { %v1973_v41 = vmul.f32 %v3059_v37, %v1971_v16 }
0x1950   :  { %v1976_v57 = vpop.permute.xlu1 %1975 }
0x1951   :  { %v1978_v40 = vmul.f32 %v3059_v37, %v1976_v57 }
0x1953   :  { %1980 = vrot.lane.b32.xlu1 %v1978_v40, %s3179_s5 }
0x19c5   :  { %v1981_v42 = vpop.permute.xlu1 %1980 }
0x19c6   :  { %v1983_v12 = vadd.f32 %v1981_v42, %v1973_v41 }
0x19c8   :  { %3060 = vtanh.f32 %v1983_v12  ;;  %2001 = vrot.lane.b32.xlu1 %v1983_v12, %s3179_s5 }
0x19c9   :  { %3062 = vpow2.f32 %v2776_v5 }
0x19d2   :  { %v3061_v25 = vpop.eup %3060 }
0x19d3   :  { %1986 = vrot.lane.b32.xlu0 %v3061_v25, %s3179_s5  ;;  %v3063_v33 = vpop.eup %3062 }
0x19d4   :  { %v1963_v32 = vadd.f32 1.0, %v3063_v33 }
0x19d6   :  { %3064 = vrcp.f32 %v1963_v32 }
0x19e0   :  { %v3065_v51 = vpop.eup %3064 }
0x1a3a   :  { %v2002_v48 = vpop.permute.xlu1 %2001 }
0x1a3b   :  { %v2004_v26 = vsel %vm1998_vm12, %v2002_v48, %v1902_v29 }
0x1a3c   :  { %2072 = vrot.lane.b32.xlu1 %v2004_v26, %s3179_s5 }
0x1a45   :  { %v1987_v38 = vpop.permute.xlu0 %1986 }
0x1a46   :  { %v1989_v46 = vmul.f32 %v3065_v51, %v1987_v38 }
0x1a48   :  { %v3848_v62 = vmul.f32 %v1990_v27, %v1989_v46  ;;  %v1999_v55 = vsel %vm1998_vm12, %v1989_v46, %v1897_v18 }
0x1a49   :  { %v2011_v63 = vpack.c.bf16 %v1999_v55, %v1999_v55 }
0x1a4a   :  { %1992 = vst.msk [vmem:[%s4077_s14 + $0x10] sm:$0xff] %vm442_vm2, %v3848_v62 }
0x1a4b   :  { %2777 = vmatmul.mubr.msk.bf16.vlgmr.msra.gmra.mrb[52].mxu1 %vm363_vm3, %v2011_v63 }
0x1a4c   :  { %2220 = vmatpush1.bf16.msra.mxu1 %v3677_v14  ;;  %2251 = vmatprep.mubr.bf16.mxu1 %v3178_v2 }
0x1a4d   :  { %2221 = vmatprep.subr.bf16.mxu1 %v3682_v28 }
0x1a50   :  { %2222 = vmatpush1.bf16.msra.mxu1 %v3691_v34 }
0x1a51   :  { %2223 = vmatprep.subr.bf16.mxu1 %v3698_v1 }
0x1a54   :  { %2224 = vmatpush1.bf16.msra.mxu1 %v3707_v30 }
0x1a55   :  { %2225 = vmatprep.subr.bf16.mxu1 %v3712_v43 }
0x1a58   :  { %2226 = vmatpush1.bf16.msra.mxu1 %v3723_v35 }
0x1a59   :  { %2423 = vmatprep.subr.bf16.mxu1 %v3658_v53 }
0x1b1e   :  { %v2049_v31 = vpop.f32.mrb[52].mxu1 }
0x1b1f   :  { %v2056_v22 = vadd.f32 %v2049_v31, %v3758_v44  ;;  %v2051_v56 = vpop.f32.mrb[53].mxu1  ;;  %v2073_v44 = vpop.permute.xlu1 %2072 }
0x1b20   :  { %v2057_v58 = vadd.f32 %v2051_v56, %v3760_v3  ;;  %v2053_v49 = vpop.f32.mrb[54].mxu1 }
0x1b21   :  { %v2054_v15 = vpop.f32.mrb[55].mxu1  ;;  %v2778_v29 = vmul.f32 -1.442695, %v2056_v22 }
0x1b22   :  { %3066 = vtanh.f32 %v2057_v58  ;;  %v2779_v6 = vmul.f32 -1.442695, %v2057_v58  ;;  %v2194_v58 = vld [vmem:[%s4086_s26 + $0x20] sm:$0xff] }
0x1b23   :  { %3068 = vpow2.f32 %v2778_v29  ;;  %vm2202_vm14 = vcmp.gt.f32.partialorder %v2194_v58, 0.0 }
0x1b2c   :  { %v3067_v47 = vpop.eup %3066 }
0x1b2d   :  { %2077 = vrot.lane.b32.xlu0 %v3067_v47, %s3179_s5  ;;  %v3069_v23 = vpop.eup %3068 }
0x1b2e   :  { %v2064_v45 = vadd.f32 1.0, %v3069_v23 }
0x1b30   :  { %3070 = vrcp.f32 %v2064_v45 }
0x1b3a   :  { %v3071_v39 = vpop.eup %3070 }
0x1b3b   :  { %v2075_v21 = vmul.f32 %v3071_v39, %v2073_v44 }
0x1b9f   :  { %v2078_v18 = vpop.permute.xlu0 %2077 }
0x1ba0   :  { %v2080_v53 = vmul.f32 %v3071_v39, %v2078_v18 }
0x1ba2   :  { %2082 = vrot.lane.b32.xlu0 %v2080_v53, %s3179_s5 }
0x1c14   :  { %v2083_v54 = vpop.permute.xlu0 %2082 }
0x1c15   :  { %v2085_v3 = vadd.f32 %v2083_v54, %v2075_v21 }
0x1c17   :  { %3072 = vtanh.f32 %v2085_v3  ;;  %2103 = vrot.lane.b32.xlu0 %v2085_v3, %s3179_s5 }
0x1c18   :  { %3074 = vpow2.f32 %v2779_v6 }
0x1c21   :  { %v3073_v59 = vpop.eup %3072 }
0x1c22   :  { %2088 = vrot.lane.b32.xlu1 %v3073_v59, %s3179_s5  ;;  %v3075_v61 = vpop.eup %3074 }
0x1c23   :  { %v2065_v11 = vadd.f32 1.0, %v3075_v61 }
0x1c25   :  { %3076 = vrcp.f32 %v2065_v11 }
0x1c2f   :  { %v3077_v8 = vpop.eup %3076 }
0x1c89   :  { %v2104_v7 = vpop.permute.xlu0 %2103 }
0x1c8a   :  { %v2106_v17 = vsel %vm2100_vm13, %v2104_v7, %v2004_v26 }
0x1c8b   :  { %2174 = vrot.lane.b32.xlu0 %v2106_v17, %s3179_s5 }
0x1c94   :  { %v2089_v10 = vpop.permute.xlu1 %2088 }
0x1c95   :  { %v2091_v37 = vmul.f32 %v3077_v8, %v2089_v10 }
0x1c97   :  { %v3875_v57 = vmul.f32 %v2092_v4, %v2091_v37  ;;  %v2101_v40 = vsel %vm2100_vm13, %v2091_v37, %v1999_v55 }
0x1c98   :  { %v2113_v16 = vpack.c.bf16 %v2101_v40, %v2101_v40 }
0x1c99   :  { %2094 = vst.msk [vmem:[%s4077_s14 + $0x18] sm:$0xff] %vm442_vm2, %v3875_v57 }
0x1c9a   :  { %2780 = vmatmul.mubr.msk.bf16.vlgmr.msra.gmra.mrb[56].mxu0 %vm363_vm3, %v2113_v16 }
0x1c9b   :  { %2322 = vmatpush1.bf16.msra.mxu0 %v3677_v14  ;;  %2353 = vmatprep.mubr.bf16.mxu0 %v3178_v2 }
0x1c9c   :  { %2323 = vmatprep.subr.bf16.mxu0 %v3682_v28 }
0x1c9f   :  { %2324 = vmatpush1.bf16.msra.mxu0 %v3691_v34 }
0x1ca0   :  { %2325 = vmatprep.subr.bf16.mxu0 %v3698_v1 }
0x1ca3   :  { %2326 = vmatpush1.bf16.msra.mxu0 %v3707_v30 }
0x1ca4   :  { %2327 = vmatprep.subr.bf16.mxu0 %v3712_v43 }
0x1ca7   :  { %2328 = vmatpush1.bf16.msra.mxu0 %v3723_v35 }
0x1d6d   :  { %v2151_v41 = vpop.f32.mrb[56].mxu0 }
0x1d6e   :  { %v2158_v42 = vadd.f32 %v2151_v41, %v3764_v9  ;;  %v2153_v12 = vpop.f32.mrb[57].mxu0  ;;  %v2175_v9 = vpop.permute.xlu0 %2174 }
0x1d6f   :  { %v2159_v25 = vadd.f32 %v2153_v12, %v3768_v13  ;;  %v2155_v5 = vpop.f32.mrb[58].mxu0 }
0x1d70   :  { %v2156_v33 = vpop.f32.mrb[59].mxu0  ;;  %v2781_v32 = vmul.f32 -1.442695, %v2158_v42 }
0x1d71   :  { %3078 = vtanh.f32 %v2159_v25  ;;  %v2782_v22 = vmul.f32 -1.442695, %v2159_v25 }
0x1d72   :  { %3080 = vpow2.f32 %v2781_v32 }
0x1d7b   :  { %v3079_v27 = vpop.eup %3078 }
0x1d7c   :  { %2179 = vrot.lane.b32.xlu1 %v3079_v27, %s3179_s5  ;;  %v3081_v48 = vpop.eup %3080 }
0x1d7d   :  { %v2166_v26 = vadd.f32 1.0, %v3081_v48 }
0x1d7f   :  { %3082 = vrcp.f32 %v2166_v26 }
0x1d89   :  { %v3083_v51 = vpop.eup %3082 }
0x1d8a   :  { %v2177_v55 = vmul.f32 %v3083_v51, %v2175_v9 }
0x1dee   :  { %v2180_v38 = vpop.permute.xlu1 %2179 }
0x1def   :  { %v2182_v46 = vmul.f32 %v3083_v51, %v2180_v38 }
0x1df1   :  { %2184 = vrot.lane.b32.xlu1 %v2182_v46, %s3179_s5 }
0x1e63   :  { %v2185_v63 = vpop.permute.xlu1 %2184 }
0x1e64   :  { %v2187_v13 = vadd.f32 %v2185_v63, %v2177_v55 }
0x1e66   :  { %3084 = vtanh.f32 %v2187_v13  ;;  %2205 = vrot.lane.b32.xlu1 %v2187_v13, %s3179_s5 }
0x1e67   :  { %3086 = vpow2.f32 %v2782_v22 }
0x1e70   :  { %v3085_v31 = vpop.eup %3084 }
0x1e71   :  { %2190 = vrot.lane.b32.xlu0 %v3085_v31, %s3179_s5  ;;  %v3087_v56 = vpop.eup %3086 }
0x1e72   :  { %v2167_v49 = vadd.f32 1.0, %v3087_v56 }
0x1e74   :  { %3088 = vrcp.f32 %v2167_v49 }
0x1e7e   :  { %v3089_v29 = vpop.eup %3088 }
0x1ed8   :  { %v2206_v15 = vpop.permute.xlu1 %2205 }
0x1ed9   :  { %v2208_v47 = vsel %vm2202_vm14, %v2206_v15, %v2106_v17  ;;  %v2296_v17 = vld [vmem:[%s4086_s26 + $0x28] sm:$0xff]  ;;  %v2398_v15 = vld [vmem:[%s4086_s26 + $0x30] sm:$0xff] }
0x1eda   :  { %2276 = vrot.lane.b32.xlu1 %v2208_v47, %s3179_s5  ;;  %vm2304_vm15 = vcmp.gt.f32.partialorder %v2296_v17, 0.0  ;;  %vm2406_vm0 = vcmp.gt.f32.partialorder %v2398_v15, 0.0 }
0x1ee3   :  { %v2191_v23 = vpop.permute.xlu0 %2190 }
0x1ee4   :  { %v2193_v45 = vmul.f32 %v3089_v29, %v2191_v23 }
0x1ee6   :  { %v3901_v39 = vmul.f32 %v2194_v58, %v2193_v45  ;;  %v2203_v18 = vsel %vm2202_vm14, %v2193_v45, %v2101_v40 }
0x1ee7   :  { %v2215_v53 = vpack.c.bf16 %v2203_v18, %v2203_v18 }
0x1ee8   :  { %2196 = vst.msk [vmem:[%s4077_s14 + $0x20] sm:$0xff] %vm442_vm2, %v3901_v39 }
0x1ee9   :  { %2783 = vmatmul.mubr.msk.bf16.vlgmr.msra.gmra.mrb[56].mxu1 %vm363_vm3, %v2215_v53 }
0x1eea   :  { %2424 = vmatpush1.bf16.msra.mxu1 %v3677_v14  ;;  %2455 = vmatprep.mubr.bf16.mxu1 %v3178_v2 }
0x1eeb   :  { %2425 = vmatprep.subr.bf16.mxu1 %v3682_v28 }
0x1eee   :  { %2426 = vmatpush1.bf16.msra.mxu1 %v3691_v34 }
0x1eef   :  { %2427 = vmatprep.subr.bf16.mxu1 %v3698_v1 }
0x1ef2   :  { %2428 = vmatpush1.bf16.msra.mxu1 %v3707_v30 }
0x1ef3   :  { %2429 = vmatprep.subr.bf16.mxu1 %v3712_v43 }
0x1ef6   :  { %2430 = vmatpush1.bf16.msra.mxu1 %v3723_v35 }
0x1fbc   :  { %v2253_v44 = vpop.f32.mrb[56].mxu1 }
0x1fbd   :  { %v2260_v21 = vadd.f32 %v2253_v44, %v3770_v20  ;;  %v2255_v54 = vpop.f32.mrb[57].mxu1  ;;  %v2277_v20 = vpop.permute.xlu1 %2276 }
0x1fbe   :  { %v2261_v14 = vadd.f32 %v2255_v54, %v3772_v0  ;;  %v2257_v3 = vpop.f32.mrb[58].mxu1 }
0x1fbf   :  { %v2258_v2 = vpop.f32.mrb[59].mxu1  ;;  %v2784_v34 = vmul.f32 -1.442695, %v2260_v21 }
0x1fc0   :  { %3090 = vtanh.f32 %v2261_v14  ;;  %v2785_v11 = vmul.f32 -1.442695, %v2261_v14 }
0x1fc1   :  { %3092 = vpow2.f32 %v2784_v34 }
0x1fca   :  { %v3091_v28 = vpop.eup %3090 }
0x1fcb   :  { %2281 = vrot.lane.b32.xlu0 %v3091_v28, %s3179_s5  ;;  %v3093_v1 = vpop.eup %3092 }
0x1fcc   :  { %v2268_v30 = vadd.f32 1.0, %v3093_v1 }
0x1fce   :  { %3094 = vrcp.f32 %v2268_v30 }
0x1fd8   :  { %v3095_v43 = vpop.eup %3094 }
0x1fd9   :  { %v2279_v6 = vmul.f32 %v3095_v43, %v2277_v20 }
0x203d   :  { %v2282_v59 = vpop.permute.xlu0 %2281 }
0x203e   :  { %v2284_v35 = vmul.f32 %v3095_v43, %v2282_v59 }
0x2040   :  { %2286 = vrot.lane.b32.xlu0 %v2284_v35, %s3179_s5 }
0x20b2   :  { %v2287_v61 = vpop.permute.xlu0 %2286 }
0x20b3   :  { %v2289_v0 = vadd.f32 %v2287_v61, %v2279_v6 }
0x20b5   :  { %3096 = vtanh.f32 %v2289_v0  ;;  %2307 = vrot.lane.b32.xlu0 %v2289_v0, %s3179_s5  ;;  %v2931_v0 = vld [vmem:[%s4075_s12 + $0x8] sm:$0xff]  }
0x20b6   :  { %3098 = vpow2.f32 %v2785_v11  ;;  %v2933_v11 = vld [vmem:[%s4075_s12 + $0x18] sm:$0xff]  }
0x20bf   :  { %v3097_v4 = vpop.eup %3096 }
0x20c0   :  { %2292 = vrot.lane.b32.xlu1 %v3097_v4, %s3179_s5  ;;  %v3099_v7 = vpop.eup %3098  ;;  %v2932_v4 = vld [vmem:[%s4075_s12 + $0x10] sm:$0xff]  }
0x20c1   :  { %v2269_v8 = vadd.f32 1.0, %v3099_v7 }
0x20c3   :  { %3100 = vrcp.f32 %v2269_v8 }
0x20cd   :  { %v3101_v40 = vpop.eup %3100 }
0x2127   :  { %v2308_v10 = vpop.permute.xlu0 %2307 }
0x2128   :  { %v2310_v37 = vsel %vm2304_vm15, %v2308_v10, %v2208_v47 }
0x2129   :  { %2378 = vrot.lane.b32.xlu0 %v2310_v37, %s3179_s5 }
0x2132   :  { %v2293_v16 = vpop.permute.xlu1 %2292 }
0x2133   :  { %v2295_v41 = vmul.f32 %v3101_v40, %v2293_v16  ;;  %v2500_v40 = vld [vmem:[%s4086_s26 + $0x38] sm:$0xff] }
0x2134   :  { %vm2508_vm4 = vcmp.gt.f32.partialorder %v2500_v40, 0.0 }
0x2135   :  { %v3927_v42 = vmul.f32 %v2296_v17, %v2295_v41  ;;  %v2305_v12 = vsel %vm2304_vm15, %v2295_v41, %v2203_v18 }
0x2136   :  { %v2317_v25 = vpack.c.bf16 %v2305_v12, %v2305_v12 }
0x2137   :  { %2298 = vst.msk [vmem:[%s4077_s14 + $0x28] sm:$0xff] %vm442_vm2, %v3927_v42 }
0x2138   :  { %2786 = vmatmul.mubr.msk.bf16.vlgmr.msra.gmra.mrb[60].mxu0 %vm363_vm3, %v2317_v25 }
0x220b   :  { %v2355_v5 = vpop.f32.mrb[60].mxu0 }
0x220c   :  { %v2362_v33 = vadd.f32 %v2355_v5, %v3778_v50  ;;  %v2357_v27 = vpop.f32.mrb[61].mxu0  ;;  %v2379_v50 = vpop.permute.xlu0 %2378 }
0x220d   :  { %v2363_v32 = vadd.f32 %v2357_v27, %v3780_v19  ;;  %v2359_v48 = vpop.f32.mrb[62].mxu0 }
0x220e   :  { %v2360_v26 = vpop.f32.mrb[63].mxu0  ;;  %v2787_v38 = vmul.f32 -1.442695, %v2362_v33 }
0x220f   :  { %3102 = vtanh.f32 %v2363_v32  ;;  %v2788_v58 = vmul.f32 -1.442695, %v2363_v32 }
0x2210   :  { %3104 = vpow2.f32 %v2787_v38 }
0x2219   :  { %v3103_v51 = vpop.eup %3102 }
0x221a   :  { %2383 = vrot.lane.b32.xlu1 %v3103_v51, %s3179_s5  ;;  %v3105_v46 = vpop.eup %3104 }
0x221b   :  { %v2370_v9 = vadd.f32 1.0, %v3105_v46 }
0x221d   :  { %3106 = vrcp.f32 %v2370_v9 }
0x2227   :  { %v3107_v55 = vpop.eup %3106 }
0x2228   :  { %v2381_v31 = vmul.f32 %v3107_v55, %v2379_v50 }
0x228c   :  { %v2384_v63 = vpop.permute.xlu1 %2383 }
0x228d   :  { %v2386_v13 = vmul.f32 %v3107_v55, %v2384_v63  ;;  %v2792_v55 = vld [vmem:[%s4076_s13] ss:$0 sm:$0xff] }
0x228f   :  { %2388 = vrot.lane.b32.xlu1 %v2386_v13, %s3179_s5 }
0x2301   :  { %v2389_v22 = vpop.permute.xlu1 %2388 }
0x2302   :  { %v2391_v19 = vadd.f32 %v2389_v22, %v2381_v31 }
0x2304   :  { %3108 = vtanh.f32 %v2391_v19  ;;  %2409 = vrot.lane.b32.xlu1 %v2391_v19, %s3179_s5 }
0x2305   :  { %3110 = vpow2.f32 %v2788_v58 }
0x230e   :  { %v3109_v56 = vpop.eup %3108 }
0x230f   :  { %2394 = vrot.lane.b32.xlu0 %v3109_v56, %s3179_s5  ;;  %v3111_v49 = vpop.eup %3110 }
0x2310   :  { %v2371_v47 = vadd.f32 1.0, %v3111_v49 }
0x2312   :  { %3112 = vrcp.f32 %v2371_v47 }
0x231c   :  { %v3113_v45 = vpop.eup %3112 }
0x2376   :  { %v2410_v29 = vpop.permute.xlu1 %2409 }
0x2377   :  { %v3944_v23 = vsel %vm2406_vm0, %v2410_v29, %v2310_v37 }
0x2378   :  { %2480 = vrot.lane.b32.xlu1 %v3944_v23, %s3179_s5 }
0x2381   :  { %v2395_v18 = vpop.permute.xlu0 %2394 }
0x2382   :  { %v2397_v53 = vmul.f32 %v3113_v45, %v2395_v18 }
0x2384   :  { %v2399_v44 = vmul.f32 %v2398_v15, %v2397_v53  ;;  %v3948_v21 = vsel %vm2406_vm0, %v2397_v53, %v2305_v12 }
0x2385   :  { %v2419_v54 = vpack.c.bf16 %v3948_v21, %v3948_v21 }
0x2386   :  { %2400 = vst.msk [vmem:[%s4077_s14 + $0x30] sm:$0xff] %vm442_vm2, %v2399_v44 }
0x2387   :  { %2789 = vmatmul.mubr.msk.bf16.vlgmr.msra.gmra.mrb[60].mxu1 %vm363_vm3, %v2419_v54 }
0x23ea   :  { %v2481_v7 = vpop.permute.xlu1 %2480 }
0x245a   :  { %v2457_v14 = vpop.f32.mrb[60].mxu1 }
0x245b   :  { %v2464_v3 = vadd.f32 %v2457_v14, %v3782_v60  ;;  %v2459_v2 = vpop.f32.mrb[61].mxu1  ;;  %v2930_v60 = vld [vmem:[%s4075_s12] sm:$0xff]  }
0x245c   :  { %v2465_v28 = vadd.f32 %v2459_v2, %v3784_v52  ;;  %v2461_v34 = vpop.f32.mrb[62].mxu1  ;;  %v3181_v52 = vmov 0.0  }
0x245d   :  { %v2462_v1 = vpop.f32.mrb[63].mxu1  ;;  %v2790_v43 = vmul.f32 -1.442695, %v2464_v3  ;;  %2821 = vmatprep.subr.bf16.mxu1 %v3181_v52  ;;  %2809 = vmatprep.subr.bf16.mxu0 %v3181_v52 }
0x245e   :  { %3114 = vtanh.f32 %v2465_v28  ;;  %2822 = vmatpush3.bf16.msra.mxu1 %v2930_v60  ;;  %2810 = vmatpush3.bf16.msra.mxu0 %v2930_v60 }
0x245f   :  { %3116 = vpow2.f32 %v2790_v43  ;;  %2823 = vmatprep.subr.bf16.mxu1 %v3181_v52  ;;  %2811 = vmatprep.subr.bf16.mxu0 %v3181_v52 }
0x2460   :  { %2829 = vmatprep.mubr.msk.bf16.mxu1 %vm3182_vm1, %v3181_v52  ;;  %2817 = vmatprep.mubr.msk.bf16.mxu0 %vm3182_vm1, %v3181_v52 }
0x2462   :  { %2824 = vmatpush3.bf16.msra.mxu1 %v2931_v0  ;;  %2812 = vmatpush3.bf16.msra.mxu0 %v2931_v0 }
0x2463   :  { %2825 = vmatprep.subr.bf16.mxu1 %v3181_v52  ;;  %2813 = vmatprep.subr.bf16.mxu0 %v3181_v52 }
0x2466   :  { %2826 = vmatpush3.bf16.msra.mxu1 %v2932_v4  ;;  %2814 = vmatpush3.bf16.msra.mxu0 %v2932_v4 }
0x2467   :  { %2827 = vmatprep.subr.bf16.mxu1 %v3181_v52  ;;  %2815 = vmatprep.subr.bf16.mxu0 %v3181_v52 }
0x2468   :  { %v3115_v30 = vpop.eup %3114 }
0x2469   :  { %2485 = vrot.lane.b32.xlu0 %v3115_v30, %s3179_s5  ;;  %v3117_v59 = vpop.eup %3116 }
0x246a   :  { %v2472_v35 = vadd.f32 1.0, %v3117_v59  ;;  %2828 = vmatpush3.bf16.msra.mxu1 %v2933_v11  ;;  %2816 = vmatpush3.bf16.msra.mxu0 %v2933_v11 }
0x246c   :  { %3118 = vrcp.f32 %v2472_v35 }
0x2476   :  { %v3119_v20 = vpop.eup %3118 }
0x2477   :  { %v2483_v17 = vmul.f32 %v3119_v20, %v2481_v7 }
0x24db   :  { %v2486_v6 = vpop.permute.xlu0 %2485 }
0x24dc   :  { %v2488_v61 = vmul.f32 %v3119_v20, %v2486_v6 }
0x24de   :  { %2490 = vrot.lane.b32.xlu0 %v2488_v61, %s3179_s5 }
0x2550   :  { %v2491_v8 = vpop.permute.xlu0 %2490 }
0x2551   :  { %v2493_v10 = vadd.f32 %v2491_v8, %v2483_v17 }
0x2553   :  { %3120 = vtanh.f32 %v2493_v10  ;;  %2511 = vrot.lane.b32.xlu0 %v2493_v10, %s3179_s5 }
0x2557   :  { %1892 = vrot.lane.b32.xlu0 %v3821_v24, %s3180_s2  ;;  %v2791_v24 = vmul.f32 -1.442695, %v2465_v28 }
0x2559   :  { %3122 = vpow2.f32 %v2791_v24 }
0x255b   :  { %2096 = vrot.lane.b32.xlu0 %v3875_v57, %s3180_s2 }
0x255d   :  { %v3121_v37 = vpop.eup %3120 }
0x255e   :  { %2496 = vrot.lane.b32.xlu1 %v3121_v37, %s3179_s5 }
0x255f   :  { %2300 = vrot.lane.b32.xlu0 %v3927_v42, %s3180_s2 }
0x2562   :  { %1790 = vrot.lane.b32.xlu1 %v3794_v36, %s3180_s2 }
0x2563   :  { %v3123_v57 = vpop.eup %3122 }
0x2564   :  { %v2473_v16 = vadd.f32 1.0, %v3123_v57 }
0x2566   :  { %1994 = vrot.lane.b32.xlu1 %v3848_v62, %s3180_s2  ;;  %3124 = vrcp.f32 %v2473_v16 }
0x256a   :  { %2198 = vrot.lane.b32.xlu1 %v3901_v39, %s3180_s2 }
0x256e   :  { %2402 = vrot.lane.b32.xlu1 %v2399_v44, %s3180_s2 }
0x2570   :  { %v3125_v12 = vpop.eup %3124 }
0x25c5   :  { %v2512_v41 = vpop.permute.xlu0 %2511 }
0x25c6   :  { %v2514_v36 = vsel %vm2508_vm4, %v2512_v41, %v3944_v23 }
0x25c7   :  { %v2600_v62 = vpack.c.bf16 %v2514_v36, %v2514_v36 }
0x25c9   :  { %2830 = vmatmul.mubr.msk.bf16.vlgmr.msra.gmra.mrb[64].mxu1 %vm363_vm3, %v2600_v62  ;;  %v1893_v39 = vpop.permute.xlu0 %1892 }
0x25ca   :  { %1895 = vst.msk [vmem:[%s4078_s15 + $0x30] sm:$0xff] %vm442_vm2, %v1893_v39 }
0x25cd   :  { %v2097_v42 = vpop.permute.xlu0 %2096 }
0x25ce   :  { %2099 = vst.msk [vmem:[%s4078_s15 + $0x20] sm:$0xff] %vm442_vm2, %v2097_v42 }
0x25d0   :  { %v2497_v25 = vpop.permute.xlu1 %2496 }
0x25d1   :  { %v2499_v5 = vmul.f32 %v3125_v12, %v2497_v25  ;;  %v2301_v33 = vpop.permute.xlu0 %2300 }
0x25d2   :  { %2303 = vst.msk [vmem:[%s4078_s15 + $0x10] sm:$0xff] %vm442_vm2, %v2301_v33 }
0x25d3   :  { %v2501_v27 = vmul.f32 %v2500_v40, %v2499_v5  ;;  %v2509_v32 = vsel %vm2508_vm4, %v2499_v5, %v3948_v21 }
0x25d4   :  { %v2524_v48 = vpack.c.bf16 %v2509_v32, %v2509_v32  ;;  %v1791_v26 = vpop.permute.xlu1 %1790 }
0x25d5   :  { %2502 = vst.msk [vmem:[%s4077_s14 + $0x38] sm:$0xff] %vm442_vm2, %v2501_v27  ;;  %1793 = vst.msk [vmem:[%s4078_s15 + $0x38] sm:$0xff] %vm442_vm2, %v1791_v26  ;;  %2504 = vrot.lane.b32.xlu0 %v2501_v27, %s3180_s2 }
0x25d6   :  { %2818 = vmatmul.mubr.msk.bf16.vlgmr.msra.gmra.mrb[64].mxu0 %vm363_vm3, %v2524_v48 }
0x25d8   :  { %v1995_v51 = vpop.permute.xlu1 %1994 }
0x25d9   :  { %1997 = vst.msk [vmem:[%s4078_s15 + $0x28] sm:$0xff] %vm442_vm2, %v1995_v51 }
0x25dc   :  { %v2199_v38 = vpop.permute.xlu1 %2198 }
0x25dd   :  { %2201 = vst.msk [vmem:[%s4078_s15 + $0x18] sm:$0xff] %vm442_vm2, %v2199_v38 }
0x25e0   :  { %v2403_v46 = vpop.permute.xlu1 %2402 }
0x25e1   :  { %2405 = vst.msk [vmem:[%s4078_s15 + $0x8] sm:$0xff] %vm442_vm2, %v2403_v46 }
0x2647   :  { %v2505_v9 = vpop.permute.xlu0 %2504 }
0x2648   :  { %2507 = vst.msk [vmem:[%s4078_s15] sm:$0xff] %vm442_vm2, %v2505_v9  ;;  %s3130_s15 = scalar_lea.vmem %s2667_s25, 128 }
0x2649   :  { %p3131_p0 = scmp.ne.s32.totalorder %s2667_s25, %s3130_s15  ;;  %p3136_p2 = scmp.lt.s32.totalorder %s3130_s15, %s3130_s15 }
0x264b   :  { %p3137_p3 = por %p3136_p2, %p3135_p1 }
0x264d   :  { %p3138_p4 = pnand %p3137_p3, %p3131_p0 }
0x269c   :  { %v2638_v63 = vpop.f32.mrb[64].mxu1 }
0x269d   :  { %v2639_v13 = vadd.f32 %v2792_v55, %v2638_v63  ;;  %v2831_v50 = vpop.f32.mrb[65].mxu1 }
0x269e   :  { %v2641_v31 = vpop.f32.mrb[66].mxu1 }
0x269f   :  { %3126 = vtanh.f32 %v2639_v13  ;;  %v2832_v22 = vpop.f32.mrb[67].mxu1 }
0x26a9   :  { %v3127_v19 = vpop.eup %3126  ;;  %v2592_v56 = vpop.f32.mrb[64].mxu0 }
0x26aa   :  { %2645 = vst.msk [vmem:[#allocation8] sm:$0xff] %vm442_vm2, %v3127_v19  ;;  %v2593_v58 = vadd.f32 %v2792_v55, %v2592_v56  ;;  %v2819_v49 = vpop.f32.mrb[65].mxu0 }
0x26ab   :  { %v2595_v15 = vpop.f32.mrb[66].mxu0 }
0x26ac   :  { %3141 = shalt.err (!%p3138_p4)
}
0x26ad   :  { %s3142_s9 = scalar_lea.hbm %s4080_s17, 128 }
0x26ae   :  { %p3143_p5 = scmp.ne.s32.totalorder %s4080_s17, %s3142_s9  ;;  %p3146_p6 = scmp.lt.u32.totalorder %s3142_s9, %s4080_s17 }
0x26b0   :  { %p3148_p7 = pnand %p3146_p6, %p3143_p5 }
0x26b2   :  { %3151 = shalt.err (!%p3148_p7)
}
0x26b3   :  { %2669 = dma.vmem_to_hbm [thread:$0]  %s2667_s25, 128, %s4080_s17, [#allocation9]   ;;  %3128 = vtanh.f32 %v2593_v58  ;;  %v2820_v47 = vpop.f32.mrb[67].mxu0 }
0x26b4   :  { %s3184_s26 = smov [#allocation6]  }
0x26b5   :  { %s2656_s18 = sshll.u32 %s3184_s26, 4  ;;  %s2657_s18 = int_to_ptr.vmem [resolvable:$true] %s2656_s18 }
0x26b6   :  { %s3152_s19 = scalar_lea.vmem %s2657_s18, 128  ;;  %p3157_p9 = scmp.lt.s32.totalorder %s2657_s18, %s2657_s18 }
0x26b7   :  { %p3153_p8 = scmp.ne.s32.totalorder %s2657_s18, %s3152_s19  ;;  %p3158_p10 = scmp.lt.s32.totalorder %s3152_s19, %s3152_s19 }
0x26b9   :  { %p3159_p11 = por %p3158_p10, %p3157_p9 }
0x26bb   :  { %p3160_p12 = pnand %p3159_p11, %p3153_p8 }
0x26bd   :  { %v3129_v29 = vpop.eup %3128 }
0x26be   :  { %2599 = vst.msk [vmem:[#allocation6] sm:$0xff] %vm442_vm2, %v3129_v29 }
0x26bf   :  { %3163 = shalt.err (!%p3160_p12)
}
0x26c0   :  { %s3164_s21 = scalar_lea.hbm %s4079_s16, 128 }
0x26c1   :  { %p3165_p13 = scmp.ne.s32.totalorder %s4079_s16, %s3164_s21  ;;  %p3168_p0 = scmp.lt.u32.totalorder %s3164_s21, %s4079_s16 }
0x26c3   :  { %p3170_p1 = pnand %p3168_p0, %p3165_p13 }
0x26c5   :  { %3173 = shalt.err (!%p3170_p1)
}
0x26c6   :  { %2659 = dma.vmem_to_hbm [thread:$0]  %s2657_s18, 128, %s4079_s16, [#allocation7]  }
0x26c7   :  { %3174 = dma.done.wait [#allocation7], 128  }
0x26c8   :  { %3175 = vsyncadd [#allocation7], 4294967168 }
0x26c9   :  { %3176 = dma.done.wait [#allocation9], 128  }
0x26ca   :  { %3177 = vsyncadd [#allocation9], 4294967168 }
0x26cb   :  { %2680 = vsyncpa [#allocation7], 1 }
0x26cc   :  { %2681 = vsyncpa [#allocation9], 1 }

</bundles_post_ra>
